<compile_context>
chip_gen: v5e
topology: v5e:2x2
jax: 0.10.0
libtpu: 0.0.40
codegen_flags: <defaults>
</compile_context>

<pallas_src>
import functools

import jax
import jax.numpy as jnp
from jax.experimental import pallas as pl
from jax.experimental.pallas import tpu as pltpu


def _round_up(v: int, m: int) -> int:
    return -(-v // m) * m


# ----------------------------------------------------------------------------
# Constant head expand / reduce matrices (built in-kernel from iota; tiny).
# ----------------------------------------------------------------------------
def _head_expand(num_heads: int, c_out: int, padded: int):
    """[H, padded] f32 block one-hot: column p belongs to head p // c_out (0 in padding)."""
    h = jax.lax.broadcasted_iota(jnp.int32, (num_heads, padded), 0)
    p = jax.lax.broadcasted_iota(jnp.int32, (num_heads, padded), 1)
    return jnp.logical_and(p >= h * c_out, p < (h + 1) * c_out).astype(jnp.float32)


def _head_reduce(num_heads: int, c_out: int, padded: int, out_cols: int):
    """[padded, out_cols] f32 block-sum over heads: row h*c_out+c -> column c (0 in padding)."""
    p = jax.lax.broadcasted_iota(jnp.int32, (padded, out_cols), 0)
    c = jax.lax.broadcasted_iota(jnp.int32, (padded, out_cols), 1)
    return jnp.logical_and(p < num_heads * c_out, (p % c_out) == c).astype(jnp.float32)


# ----------------------------------------------------------------------------
# Fused Pallas kernel: full FeaStConv stack (+ ReLU/BatchNorm on hidden layers)
# for ONE graph per grid step.
# ----------------------------------------------------------------------------
def encoder_kernel(
    x_ref,        # [N, C_in0]  f32 node features of this graph
    adj_ref,      # [N, N]      bf16 adjacency counts, adj[i, j] = #edges j->i (incl. self loop)
    deg_inv_ref,  # [N, 1]      f32, 1 / (#incoming edges per node)
    *refs,        # 6 refs per layer (uw, c, lw, bias, gamma, beta), then o_ref
    layer_dims,   # tuple of (c_in, c_out, padded_head_width) per layer
    num_heads: int,
    apply_batch_norm: bool,
):
    num_layers = len(layer_dims)
    param_refs = refs[: 6 * num_layers]
    o_ref = refs[6 * num_layers]

    deg_inv = deg_inv_ref[...]                                               # [N, 1]
    x = x_ref[...]                                                           # [N, C_in0]

    for l, (_c_in, c_out, p_l) in enumerate(layer_dims):
        uw_ref, c_ref, lw_ref, b_ref, gamma_ref, beta_ref = param_refs[6 * l : 6 * l + 6]
        is_last = l == num_layers - 1

        # ---- attention projection (tiny matmuls, f32) --------------------------
        # Spec: logits[i, j, h] = (u(x_i - x_j) + c)_h  with i = destination node.
        ux = jnp.dot(x, uw_ref[...], preferred_element_type=jnp.float32)     # [N, H]
        uxc = ux + c_ref[...]                                                # [N, H]

        # ---- factorized softmax over heads --------------------------------------
        #   exp(logits[i,j,h]) = e[i,h] * f[j,h]  (up to per-i / per-j shifts that
        #   cancel in the softmax ratio); both factors are in (0, 1].
        e = jnp.exp(uxc - jnp.max(uxc, axis=1, keepdims=True))               # [N, H]
        f = jnp.exp(jnp.min(ux, axis=1, keepdims=True) - ux)                 # [N, H]
        # denominator: contract the head dim directly (no [N,H]->[H,N] transpose).
        denom = jax.lax.dot_general(
            e, f, (((1,), (1,)), ((), ())), preferred_element_type=jnp.float32)  # [N, N]
        inv_denom = 1.0 / jnp.maximum(denom, 1e-37)

        # Fused edge mask kept in f32 (range/precision safety: inv_denom is not
        # bounded; a bf16 cast with a clamped exponent spread is the knob for a
        # future compute-bound large-N tiled variant).
        w = adj_ref[...].astype(jnp.float32) * inv_denom                     # [N, N]

        # ---- messages (lane-dense head expand / reduce) -------------------------
        s_expand = _head_expand(num_heads, c_out, p_l)                       # [H, P]
        f_full = jnp.dot(f, s_expand, preferred_element_type=jnp.float32)    # [N, P]
        # deg_inv (mean aggregation) folded into the destination factor AFTER the
        # softmax denominator, so no [N,N] deg-scaled slab and no [N,C] broadcast.
        e_full = jnp.dot(e * deg_inv, s_expand, preferred_element_type=jnp.float32)

        xl = jnp.dot(x, lw_ref[...], preferred_element_type=jnp.float32)     # [N, P]
        y = jnp.dot(w, xl * f_full, preferred_element_type=jnp.float32)      # [N, P]

        out_cols = o_ref.shape[1] if is_last else c_out                      # last layer lane-dense
        s_reduce = _head_reduce(num_heads, c_out, p_l, out_cols)             # [P, out_cols]
        out = jnp.dot(e_full * y, s_reduce, preferred_element_type=jnp.float32) + b_ref[...]

        if not is_last:
            out = jnp.maximum(out, 0.0)  # ReLU
            if apply_batch_norm:
                # BatchNorm1d, training-mode batch statistics (biased var), eps=1e-5,
                # over this graph's nodes (whole node dim lives in one block).
                mean = jnp.mean(out, axis=0, keepdims=True)
                var = jnp.mean((out - mean) ** 2, axis=0, keepdims=True)
                out = (out - mean) * jax.lax.rsqrt(var + 1e-5) * gamma_ref[...] + beta_ref[...]

        x = out

    o_ref[...] = x.astype(o_ref.dtype)


# ----------------------------------------------------------------------------
# VMEM budgeting (true residency, no fixed floor).
# ----------------------------------------------------------------------------
def _vmem_capacity_bytes() -> int:
    try:
        return int(pltpu.get_tpu_info().vmem_capacity_bytes)
    except Exception:
        return 64 << 20  # conservative default: v7x per-TensorCore VMEM


def _vmem_bytes_estimate(n, c_in0, layer_dims, num_heads, out_pad):
    def tile(r, c, itemsize):
        return _round_up(max(int(r), 1), 8) * _round_up(max(int(c), 1), 128) * itemsize

    # double-buffered pipelined per-graph blocks (inputs + output)
    est = 2 * (tile(n, c_in0, 4) + tile(n, n, 2) + tile(n, 1, 4) + tile(n, out_pad, 4))
    # parameters (worst case double-buffered, though their block index is constant)
    for c_in, c_out, p_l in layer_dims:
        est += 2 * (tile(c_in, num_heads, 4) + tile(1, num_heads, 4) + tile(c_in, p_l, 4)
                    + tile(1, out_pad, 4) + 2 * tile(1, c_out, 4))
    # live f32 transients inside one layer body: ~3 [N,N] slabs (adj cast, denom, w)
    # plus a handful of [N, P] working slabs (xl, f_full, e_full, y, out, ...)
    p_max = max(p for _, _, p in layer_dims)
    est += 3 * tile(n, n, 4) + 8 * tile(n, p_max, 4)
    return est


# ----------------------------------------------------------------------------
# Wrapper: batch of graphs, one graph per grid step ("parallel" -> both v7x TCs,
# and graph g+1's DMA overlaps graph g's compute).
# ----------------------------------------------------------------------------
def graph_feature_encoder(x, adj, deg_inv, layer_params, *, apply_batch_norm=True):
    """Fused forward of the whole GraphFeatureEncoder stack, one pallas_call.

    x: [B, N, C_in] f32, adj: [B, N, N] bf16 counts, deg_inv: [B, N, 1] f32.
    Returns [B, N, C_last] f32 (one independent graph per batch entry).
    """
    B, N, c_in0 = x.shape
    num_heads = layer_params[0]["c"].shape[1]
    num_layers = len(layer_params)
    c_last = layer_params[-1]["bias"].shape[1]
    out_pad = _round_up(c_last, 128)  # lane-dense output store; wrapper unpads

    layer_dims = []
    flat_params = []
    for l, p in enumerate(layer_params):
        c_in = p["uw"].shape[0]
        c_out = p["bias"].shape[1]
        p_l = _round_up(num_heads * c_out, 128)  # pad head-block slab to 128 lanes
        lw = p["lw"]
        if lw.shape[1] < p_l:
            lw = jnp.pad(lw, ((0, 0), (0, p_l - lw.shape[1])))
        bias = p["bias"]
        if l == num_layers - 1 and bias.shape[1] < out_pad:
            bias = jnp.pad(bias, ((0, 0), (0, out_pad - bias.shape[1])))
        layer_dims.append((c_in, c_out, p_l))
        flat_params += [p["uw"], p["c"], lw, bias, p["gamma"], p["beta"]]
    layer_dims = tuple(layer_dims)

    # True-residency VMEM budget; make the generation-specific cliff explicit.
    est = _vmem_bytes_estimate(N, c_in0, layer_dims, num_heads, out_pad)
    usable = _vmem_capacity_bytes() - (8 << 20)
    if est > usable:
        # TODO(synk): destination-node-tiled variant (re-stream adj per layer, int8
        # adj in HBM for v5e, two-pass BatchNorm) for graphs too large for VMEM.
        raise NotImplementedError(
            f"graph needs ~{est >> 20} MiB VMEM but only ~{usable >> 20} MiB usable; "
            "tiled large-N variant not implemented")
    vmem_limit = int(min(2 * est + (8 << 20), usable))

    kernel = functools.partial(
        encoder_kernel,
        layer_dims=layer_dims,
        num_heads=num_heads,
        apply_batch_norm=apply_batch_norm,
    )

    def _graph_map(b):
        return (b, 0, 0)

    def _const_map(ndim):
        return lambda b: (0,) * ndim

    in_specs = [
        pl.BlockSpec((None, N, c_in0), _graph_map),   # x
        pl.BlockSpec((None, N, N), _graph_map),       # adj (bf16)
        pl.BlockSpec((None, N, 1), _graph_map),       # deg_inv
    ] + [pl.BlockSpec(p.shape, _const_map(p.ndim)) for p in flat_params]
    out_specs = pl.BlockSpec((None, N, out_pad), _graph_map)

    # Advisory cost estimate so XLA schedules surrounding ops sensibly.
    flops = 0
    for c_in, c_out, p_l in layer_dims:
        flops += 2 * N * c_in * (num_heads + p_l)   # ux + xl projections
        flops += 2 * N * N * num_heads              # softmax denominator
        flops += 2 * 2 * N * num_heads * p_l        # e / f head expansion
        flops += 2 * N * N * p_l                    # aggregation matmul
        flops += 2 * N * p_l * c_out                # head reduction
        flops += 6 * N * N                          # mask / elementwise
    flops *= B
    transcendentals = B * num_layers * (N * N + 2 * N * num_heads)
    bytes_accessed = int(
        x.size * 4 + adj.size * 2 + deg_inv.size * 4
        + sum(int(p.size) * 4 for p in flat_params) + B * N * out_pad * 4)

    out = pl.pallas_call(
        kernel,
        out_shape=jax.ShapeDtypeStruct((B, N, out_pad), jnp.float32),
        grid=(B,),
        in_specs=in_specs,
        out_specs=out_specs,
        compiler_params=pltpu.CompilerParams(
            dimension_semantics=("parallel",),
            vmem_limit_bytes=vmem_limit,
        ),
        cost_estimate=pl.CostEstimate(
            flops=int(flops),
            transcendentals=int(transcendentals),
            bytes_accessed=bytes_accessed,
        ),
    )(x, adj, deg_inv, *flat_params)

    return out[..., :c_last] if out_pad != c_last else out


# ----------------------------------------------------------------------------
# Deterministic parameter construction (mirrors FeatureSteeredConvolution.__init__
# with ensure_trans_invar=True, bias=True, with_self_loops=True).
# ----------------------------------------------------------------------------
def init_params(key, in_features, conv_channels, num_heads):
    layer_params = []
    channels = [in_features] + list(conv_channels)
    for c_in, c_out in zip(channels[:-1], channels[1:]):
        key, k_lin, k_u, k_c, k_b = jax.random.split(key, 5)
        # torch: linear.weight [H*C_out, C_in] ~ U[0,1);  u.weight [H, C_in] ~ U[0,1)
        lin_w = jax.random.uniform(k_lin, (num_heads * c_out, c_in), jnp.float32)
        u_w = jax.random.uniform(k_u, (num_heads, c_in), jnp.float32)
        c_param = 0.1 * jax.random.normal(k_c, (num_heads,), jnp.float32)
        bias = 0.1 * jax.random.normal(k_b, (c_out,), jnp.float32)
        layer_params.append(
            dict(
                lw=lin_w.T,                       # [C_in, H*C_out], head-major columns
                uw=u_w.T,                         # [C_in, H]
                c=c_param.reshape(1, num_heads),  # [1, H]
                bias=bias.reshape(1, c_out),      # [1, C_out]
                gamma=jnp.ones((1, c_out), jnp.float32),   # BatchNorm1d weight
                beta=jnp.zeros((1, c_out), jnp.float32),   # BatchNorm1d bias
            )
        )
    return layer_params


def build_dense_graph(src, dst, num_nodes):
    """remove_self_loops + add_self_loops + dense adjacency counts + mean-deg.

    adj is returned in bf16 (small integer counts, exact up to 256 parallel edges)
    to halve its HBM read; deg_inv stays f32 for exact mean aggregation.
    (A future tiled large-N variant would store adj as int8 for v5e bandwidth.)
    """
    keep = (src != dst).astype(jnp.float32)
    adj = jnp.zeros((num_nodes, num_nodes), jnp.float32).at[dst, src].add(keep)
    adj = adj + jnp.eye(num_nodes, dtype=jnp.float32)  # add self loops once
    deg = jnp.sum(adj, axis=1, keepdims=True)          # incoming-edge count per node
    deg_inv = 1.0 / deg
    return adj.astype(jnp.bfloat16), deg_inv


if __name__ == "__main__":
    # Small, deterministic example: a batch of B graphs, each with
    #   x: [N, in_features] node features, edge_index: [2, E].
    B = 2
    N = 128
    E = 512
    in_features = 16
    conv_channels = [32, 32, 8]
    num_heads = 4

    key = jax.random.PRNGKey(0)
    key, kp = jax.random.split(key)
    layer_params = init_params(kp, in_features, conv_channels, num_heads)

    xs, adjs, degs = [], [], []
    for _ in range(B):
        key, kx, ks, kd = jax.random.split(key, 4)
        x_g = jax.random.normal(kx, (N, in_features), jnp.float32)
        src = jax.random.randint(ks, (E,), 0, N)
        dst = jax.random.randint(kd, (E,), 0, N)
        adj_g, deg_inv_g = build_dense_graph(src, dst, N)
        xs.append(x_g)
        adjs.append(adj_g)
        degs.append(deg_inv_g)

    x_b = jnp.stack(xs)        # [B, N, C_in]
    adj_b = jnp.stack(adjs)    # [B, N, N] bf16
    deg_b = jnp.stack(degs)    # [B, N, 1] f32

    fwd = jax.jit(functools.partial(graph_feature_encoder, apply_batch_norm=True))
    out = fwd(x_b, adj_b, deg_b, layer_params)
    out = jax.block_until_ready(out)

    assert out.shape == (B, N, conv_channels[-1]), out.shape
    assert bool(jnp.all(jnp.isfinite(out)))
    print("KERNEL_OK")
</pallas_src>

<mosaic_0001>
module attributes {stable_mosaic.version = 11 : i64} {
  func.func @encoder_kernel(%arg0: i32, %arg1: memref<1x128x16xf32, #tpu.memory_space<vmem>>, %arg2: memref<1x128x128xbf16, #tpu.memory_space<vmem>>, %arg3: memref<1x128x1xf32, #tpu.memory_space<vmem>>, %arg4: memref<16x4xf32, #tpu.memory_space<vmem>>, %arg5: memref<1x4xf32, #tpu.memory_space<vmem>>, %arg6: memref<16x128xf32, #tpu.memory_space<vmem>>, %arg7: memref<1x32xf32, #tpu.memory_space<vmem>>, %arg8: memref<1x32xf32, #tpu.memory_space<vmem>>, %arg9: memref<1x32xf32, #tpu.memory_space<vmem>>, %arg10: memref<32x4xf32, #tpu.memory_space<vmem>>, %arg11: memref<1x4xf32, #tpu.memory_space<vmem>>, %arg12: memref<32x128xf32, #tpu.memory_space<vmem>>, %arg13: memref<1x32xf32, #tpu.memory_space<vmem>>, %arg14: memref<1x32xf32, #tpu.memory_space<vmem>>, %arg15: memref<1x32xf32, #tpu.memory_space<vmem>>, %arg16: memref<32x4xf32, #tpu.memory_space<vmem>>, %arg17: memref<1x4xf32, #tpu.memory_space<vmem>>, %arg18: memref<32x128xf32, #tpu.memory_space<vmem>>, %arg19: memref<1x128xf32, #tpu.memory_space<vmem>>, %arg20: memref<1x8xf32, #tpu.memory_space<vmem>>, %arg21: memref<1x8xf32, #tpu.memory_space<vmem>>, %arg22: memref<1x128x128xf32, #tpu.memory_space<vmem>>) attributes {dimension_semantics = [#tpu.dimension_semantics<parallel>], iteration_bounds = array<i64: 2>, scalar_prefetch = 0 : i64, scratch_operands = 0 : i64, tpu.core_type = #tpu.core_type<tc>, window_params = [{transform_indices = @transform_0, window_bounds = array<i64: 1, 128, 16>}, {transform_indices = @transform_1, window_bounds = array<i64: 1, 128, 128>}, {transform_indices = @transform_2, window_bounds = array<i64: 1, 128, 1>}, {pipeline_mode = #tpu.pipeline_mode<synchronous>, transform_indices = @transform_3, window_bounds = array<i64: 16, 4>}, {pipeline_mode = #tpu.pipeline_mode<synchronous>, transform_indices = @transform_4, window_bounds = array<i64: 1, 4>}, {pipeline_mode = #tpu.pipeline_mode<synchronous>, transform_indices = @transform_5, window_bounds = array<i64: 16, 128>}, {pipeline_mode = #tpu.pipeline_mode<synchronous>, transform_indices = @transform_6, window_bounds = array<i64: 1, 32>}, {pipeline_mode = #tpu.pipeline_mode<synchronous>, transform_indices = @transform_7, window_bounds = array<i64: 1, 32>}, {pipeline_mode = #tpu.pipeline_mode<synchronous>, transform_indices = @transform_8, window_bounds = array<i64: 1, 32>}, {pipeline_mode = #tpu.pipeline_mode<synchronous>, transform_indices = @transform_9, window_bounds = array<i64: 32, 4>}, {pipeline_mode = #tpu.pipeline_mode<synchronous>, transform_indices = @transform_10, window_bounds = array<i64: 1, 4>}, {pipeline_mode = #tpu.pipeline_mode<synchronous>, transform_indices = @transform_11, window_bounds = array<i64: 32, 128>}, {pipeline_mode = #tpu.pipeline_mode<synchronous>, transform_indices = @transform_12, window_bounds = array<i64: 1, 32>}, {pipeline_mode = #tpu.pipeline_mode<synchronous>, transform_indices = @transform_13, window_bounds = array<i64: 1, 32>}, {pipeline_mode = #tpu.pipeline_mode<synchronous>, transform_indices = @transform_14, window_bounds = array<i64: 1, 32>}, {pipeline_mode = #tpu.pipeline_mode<synchronous>, transform_indices = @transform_15, window_bounds = array<i64: 32, 4>}, {pipeline_mode = #tpu.pipeline_mode<synchronous>, transform_indices = @transform_16, window_bounds = array<i64: 1, 4>}, {pipeline_mode = #tpu.pipeline_mode<synchronous>, transform_indices = @transform_17, window_bounds = array<i64: 32, 128>}, {pipeline_mode = #tpu.pipeline_mode<synchronous>, transform_indices = @transform_18, window_bounds = array<i64: 1, 128>}, {pipeline_mode = #tpu.pipeline_mode<synchronous>, transform_indices = @transform_19, window_bounds = array<i64: 1, 8>}, {pipeline_mode = #tpu.pipeline_mode<synchronous>, transform_indices = @transform_20, window_bounds = array<i64: 1, 8>}, {transform_indices = @transform_21, window_bounds = array<i64: 1, 128, 128>}]} {
    %c0 = arith.constant 0 : index
    %c0_0 = arith.constant 0 : index
    %c0_1 = arith.constant 0 : index
    %0 = vector.load %arg3[%c0, %c0_0, %c0_1] : memref<1x128x1xf32, #tpu.memory_space<vmem>>, vector<1x128x1xf32>
    %1 = vector.shape_cast %0 : vector<1x128x1xf32> to vector<128x1xf32>
    %c0_2 = arith.constant 0 : index
    %c0_3 = arith.constant 0 : index
    %c0_4 = arith.constant 0 : index
    %2 = vector.load %arg1[%c0_2, %c0_3, %c0_4] : memref<1x128x16xf32, #tpu.memory_space<vmem>>, vector<1x128x16xf32>
    %3 = vector.shape_cast %2 : vector<1x128x16xf32> to vector<128x16xf32>
    %c0_5 = arith.constant 0 : index
    %c0_6 = arith.constant 0 : index
    %4 = vector.load %arg4[%c0_5, %c0_6] : memref<16x4xf32, #tpu.memory_space<vmem>>, vector<16x4xf32>
    %cst = arith.constant dense<0.000000e+00> : vector<128x4xf32>
    %5 = tpu.matmul %3, %4, %cst {dimension_numbers = #tpu.dot_dimension_numbers<[1], [0], [0], [1], [0, 0, 1, 1], [], []>} : vector<128x16xf32>, vector<16x4xf32>, vector<128x4xf32> -> vector<128x4xf32>
    %c0_7 = arith.constant 0 : index
    %c0_8 = arith.constant 0 : index
    %6 = vector.load %arg5[%c0_7, %c0_8] : memref<1x4xf32, #tpu.memory_space<vmem>>, vector<1x4xf32>
    %7 = vector.broadcast %6 : vector<1x4xf32> to vector<128x4xf32>
    %8 = arith.addf %5, %7 : vector<128x4xf32>
    %cst_9 = arith.constant dense<0xFF800000> : vector<128xf32>
    %9 = vector.multi_reduction <maximumf>, %8, %cst_9 [1] : vector<128x4xf32> to vector<128xf32>
    %10 = vector.shape_cast %9 : vector<128xf32> to vector<128x1xf32>
    %11 = vector.broadcast %10 : vector<128x1xf32> to vector<128x4xf32>
    %12 = arith.subf %8, %11 : vector<128x4xf32>
    %13 = math.exp %12 : vector<128x4xf32>
    %cst_10 = arith.constant dense<0x7F800000> : vector<128xf32>
    %14 = vector.multi_reduction <minimumf>, %5, %cst_10 [1] : vector<128x4xf32> to vector<128xf32>
    %15 = vector.shape_cast %14 : vector<128xf32> to vector<128x1xf32>
    %16 = vector.broadcast %15 : vector<128x1xf32> to vector<128x4xf32>
    %17 = arith.subf %16, %5 : vector<128x4xf32>
    %18 = math.exp %17 : vector<128x4xf32>
    %cst_11 = arith.constant dense<0.000000e+00> : vector<128x128xf32>
    %19 = tpu.matmul %13, %18, %cst_11 {dimension_numbers = #tpu.dot_dimension_numbers<[1], [1], [0], [0], [0, 0, 1, 0], [], []>} : vector<128x4xf32>, vector<128x4xf32>, vector<128x128xf32> -> vector<128x128xf32>
    %cst_12 = arith.constant 9.99999991E-38 : f32
    %20 = vector.broadcast %cst_12 : f32 to vector<128x128xf32>
    %21 = arith.maximumf %19, %20 : vector<128x128xf32>
    %cst_13 = arith.constant 1.000000e+00 : f32
    %22 = vector.broadcast %cst_13 : f32 to vector<128x128xf32>
    %23 = arith.divf %22, %21 : vector<128x128xf32>
    %c0_14 = arith.constant 0 : index
    %c0_15 = arith.constant 0 : index
    %c0_16 = arith.constant 0 : index
    %24 = vector.load %arg2[%c0_14, %c0_15, %c0_16] : memref<1x128x128xbf16, #tpu.memory_space<vmem>>, vector<1x128x128xbf16>
    %25 = vector.shape_cast %24 : vector<1x128x128xbf16> to vector<128x128xbf16>
    %26 = arith.extf %25 : vector<128x128xbf16> to vector<128x128xf32>
    %27 = arith.mulf %26, %23 : vector<128x128xf32>
    %28 = tpu.iota {dimensions = array<i32: 0>} : vector<4x128xi32>
    %29 = tpu.iota {dimensions = array<i32: 1>} : vector<4x128xi32>
    %c32_i32 = arith.constant 32 : i32
    %30 = vector.broadcast %c32_i32 : i32 to vector<4x128xi32>
    %31 = arith.muli %28, %30 : vector<4x128xi32>
    %32 = arith.cmpi sge, %29, %31 : vector<4x128xi32>
    %c1_i32 = arith.constant 1 : i32
    %33 = vector.broadcast %c1_i32 : i32 to vector<4x128xi32>
    %34 = arith.addi %28, %33 : vector<4x128xi32>
    %c32_i32_17 = arith.constant 32 : i32
    %35 = vector.broadcast %c32_i32_17 : i32 to vector<4x128xi32>
    %36 = arith.muli %34, %35 : vector<4x128xi32>
    %37 = arith.cmpi slt, %29, %36 : vector<4x128xi32>
    %38 = arith.andi %32, %37 : vector<4x128xi1>
    %39 = arith.extui %38 : vector<4x128xi1> to vector<4x128xi32>
    %40 = arith.sitofp %39 : vector<4x128xi32> to vector<4x128xf32>
    %cst_18 = arith.constant dense<0.000000e+00> : vector<128x128xf32>
    %41 = tpu.matmul %18, %40, %cst_18 {dimension_numbers = #tpu.dot_dimension_numbers<[1], [0], [0], [1], [0, 0, 1, 1], [], []>} : vector<128x4xf32>, vector<4x128xf32>, vector<128x128xf32> -> vector<128x128xf32>
    %42 = vector.broadcast %1 : vector<128x1xf32> to vector<128x4xf32>
    %43 = arith.mulf %13, %42 : vector<128x4xf32>
    %cst_19 = arith.constant dense<0.000000e+00> : vector<128x128xf32>
    %44 = tpu.matmul %43, %40, %cst_19 {dimension_numbers = #tpu.dot_dimension_numbers<[1], [0], [0], [1], [0, 0, 1, 1], [], []>} : vector<128x4xf32>, vector<4x128xf32>, vector<128x128xf32> -> vector<128x128xf32>
    %c0_20 = arith.constant 0 : index
    %c0_21 = arith.constant 0 : index
    %45 = vector.load %arg6[%c0_20, %c0_21] : memref<16x128xf32, #tpu.memory_space<vmem>>, vector<16x128xf32>
    %cst_22 = arith.constant dense<0.000000e+00> : vector<128x128xf32>
    %46 = tpu.matmul %3, %45, %cst_22 {dimension_numbers = #tpu.dot_dimension_numbers<[1], [0], [0], [1], [0, 0, 1, 1], [], []>} : vector<128x16xf32>, vector<16x128xf32>, vector<128x128xf32> -> vector<128x128xf32>
    %47 = arith.mulf %46, %41 : vector<128x128xf32>
    %cst_23 = arith.constant dense<0.000000e+00> : vector<128x128xf32>
    %48 = tpu.matmul %27, %47, %cst_23 {dimension_numbers = #tpu.dot_dimension_numbers<[1], [0], [0], [1], [0, 0, 1, 1], [], []>} : vector<128x128xf32>, vector<128x128xf32>, vector<128x128xf32> -> vector<128x128xf32>
    %49 = tpu.iota {dimensions = array<i32: 0>} : vector<128x32xi32>
    %50 = tpu.iota {dimensions = array<i32: 1>} : vector<128x32xi32>
    %c128_i32 = arith.constant 128 : i32
    %51 = vector.broadcast %c128_i32 : i32 to vector<128x32xi32>
    %52 = arith.cmpi slt, %49, %51 : vector<128x32xi32>
    %c32_i32_24 = arith.constant 32 : i32
    %c0_i32 = arith.constant 0 : i32
    %53 = arith.cmpi eq, %c32_i32_24, %c0_i32 : i32
    %c1_i32_25 = arith.constant 1 : i32
    %54 = arith.select %53, %c1_i32_25, %c32_i32_24 : i32
    %55 = vector.broadcast %54 : i32 to vector<128x32xi32>
    %56 = arith.remsi %49, %55 : vector<128x32xi32>
    %c0_i32_26 = arith.constant 0 : i32
    %57 = vector.broadcast %c0_i32_26 : i32 to vector<128x32xi32>
    %58 = arith.cmpi ne, %56, %57 : vector<128x32xi32>
    %c0_i32_27 = arith.constant 0 : i32
    %59 = vector.broadcast %c0_i32_27 : i32 to vector<128x32xi32>
    %60 = arith.cmpi slt, %56, %59 : vector<128x32xi32>
    %c0_i32_28 = arith.constant 0 : i32
    %61 = arith.cmpi slt, %54, %c0_i32_28 : i32
    %62 = vector.broadcast %61 : i1 to vector<128x32xi1>
    %63 = vector.broadcast %62 : vector<128x32xi1> to vector<128x32xi1>
    %64 = arith.xori %60, %63 : vector<128x32xi1>
    %65 = arith.andi %64, %58 : vector<128x32xi1>
    %66 = vector.broadcast %54 : i32 to vector<128x32xi32>
    %67 = arith.addi %56, %66 : vector<128x32xi32>
    %68 = arith.select %65, %67, %56 : vector<128x32xi1>, vector<128x32xi32>
    %69 = arith.cmpi eq, %68, %50 : vector<128x32xi32>
    %70 = arith.andi %52, %69 : vector<128x32xi1>
    %71 = arith.extui %70 : vector<128x32xi1> to vector<128x32xi32>
    %72 = arith.sitofp %71 : vector<128x32xi32> to vector<128x32xf32>
    %73 = arith.mulf %44, %48 : vector<128x128xf32>
    %cst_29 = arith.constant dense<0.000000e+00> : vector<128x32xf32>
    %74 = tpu.matmul %73, %72, %cst_29 {dimension_numbers = #tpu.dot_dimension_numbers<[1], [0], [0], [1], [0, 0, 1, 1], [], []>} : vector<128x128xf32>, vector<128x32xf32>, vector<128x32xf32> -> vector<128x32xf32>
    %c0_30 = arith.constant 0 : index
    %c0_31 = arith.constant 0 : index
    %75 = vector.load %arg7[%c0_30, %c0_31] : memref<1x32xf32, #tpu.memory_space<vmem>>, vector<1x32xf32>
    %76 = vector.broadcast %75 : vector<1x32xf32> to vector<128x32xf32>
    %77 = arith.addf %74, %76 : vector<128x32xf32>
    %cst_32 = arith.constant 0.000000e+00 : f32
    %78 = vector.broadcast %cst_32 : f32 to vector<128x32xf32>
    %79 = arith.maximumf %77, %78 : vector<128x32xf32>
    %cst_33 = arith.constant dense<0.000000e+00> : vector<32xf32>
    %80 = vector.multi_reduction <add>, %79, %cst_33 [0] : vector<128x32xf32> to vector<32xf32>
    %81 = vector.shape_cast %80 : vector<32xf32> to vector<1x32xf32>
    %cst_34 = arith.constant 1.280000e+02 : f32
    %82 = vector.broadcast %cst_34 : f32 to vector<1x32xf32>
    %83 = arith.divf %81, %82 : vector<1x32xf32>
    %84 = vector.broadcast %83 : vector<1x32xf32> to vector<128x32xf32>
    %85 = arith.subf %79, %84 : vector<128x32xf32>
    %86 = arith.mulf %85, %85 : vector<128x32xf32>
    %cst_35 = arith.constant dense<0.000000e+00> : vector<32xf32>
    %87 = vector.multi_reduction <add>, %86, %cst_35 [0] : vector<128x32xf32> to vector<32xf32>
    %88 = vector.shape_cast %87 : vector<32xf32> to vector<1x32xf32>
    %cst_36 = arith.constant 1.280000e+02 : f32
    %89 = vector.broadcast %cst_36 : f32 to vector<1x32xf32>
    %90 = arith.divf %88, %89 : vector<1x32xf32>
    %91 = vector.broadcast %83 : vector<1x32xf32> to vector<128x32xf32>
    %92 = arith.subf %79, %91 : vector<128x32xf32>
    %cst_37 = arith.constant 9.99999974E-6 : f32
    %93 = vector.broadcast %cst_37 : f32 to vector<1x32xf32>
    %94 = arith.addf %90, %93 : vector<1x32xf32>
    %95 = math.rsqrt %94 : vector<1x32xf32>
    %96 = vector.broadcast %95 : vector<1x32xf32> to vector<128x32xf32>
    %97 = arith.mulf %92, %96 : vector<128x32xf32>
    %c0_38 = arith.constant 0 : index
    %c0_39 = arith.constant 0 : index
    %98 = vector.load %arg8[%c0_38, %c0_39] : memref<1x32xf32, #tpu.memory_space<vmem>>, vector<1x32xf32>
    %99 = vector.broadcast %98 : vector<1x32xf32> to vector<128x32xf32>
    %100 = arith.mulf %97, %99 : vector<128x32xf32>
    %c0_40 = arith.constant 0 : index
    %c0_41 = arith.constant 0 : index
    %101 = vector.load %arg9[%c0_40, %c0_41] : memref<1x32xf32, #tpu.memory_space<vmem>>, vector<1x32xf32>
    %102 = vector.broadcast %101 : vector<1x32xf32> to vector<128x32xf32>
    %103 = arith.addf %100, %102 : vector<128x32xf32>
    %c0_42 = arith.constant 0 : index
    %c0_43 = arith.constant 0 : index
    %104 = vector.load %arg10[%c0_42, %c0_43] : memref<32x4xf32, #tpu.memory_space<vmem>>, vector<32x4xf32>
    %cst_44 = arith.constant dense<0.000000e+00> : vector<128x4xf32>
    %105 = tpu.matmul %103, %104, %cst_44 {dimension_numbers = #tpu.dot_dimension_numbers<[1], [0], [0], [1], [0, 0, 1, 1], [], []>} : vector<128x32xf32>, vector<32x4xf32>, vector<128x4xf32> -> vector<128x4xf32>
    %c0_45 = arith.constant 0 : index
    %c0_46 = arith.constant 0 : index
    %106 = vector.load %arg11[%c0_45, %c0_46] : memref<1x4xf32, #tpu.memory_space<vmem>>, vector<1x4xf32>
    %107 = vector.broadcast %106 : vector<1x4xf32> to vector<128x4xf32>
    %108 = arith.addf %105, %107 : vector<128x4xf32>
    %cst_47 = arith.constant dense<0xFF800000> : vector<128xf32>
    %109 = vector.multi_reduction <maximumf>, %108, %cst_47 [1] : vector<128x4xf32> to vector<128xf32>
    %110 = vector.shape_cast %109 : vector<128xf32> to vector<128x1xf32>
    %111 = vector.broadcast %110 : vector<128x1xf32> to vector<128x4xf32>
    %112 = arith.subf %108, %111 : vector<128x4xf32>
    %113 = math.exp %112 : vector<128x4xf32>
    %cst_48 = arith.constant dense<0x7F800000> : vector<128xf32>
    %114 = vector.multi_reduction <minimumf>, %105, %cst_48 [1] : vector<128x4xf32> to vector<128xf32>
    %115 = vector.shape_cast %114 : vector<128xf32> to vector<128x1xf32>
    %116 = vector.broadcast %115 : vector<128x1xf32> to vector<128x4xf32>
    %117 = arith.subf %116, %105 : vector<128x4xf32>
    %118 = math.exp %117 : vector<128x4xf32>
    %cst_49 = arith.constant dense<0.000000e+00> : vector<128x128xf32>
    %119 = tpu.matmul %113, %118, %cst_49 {dimension_numbers = #tpu.dot_dimension_numbers<[1], [1], [0], [0], [0, 0, 1, 0], [], []>} : vector<128x4xf32>, vector<128x4xf32>, vector<128x128xf32> -> vector<128x128xf32>
    %cst_50 = arith.constant 9.99999991E-38 : f32
    %120 = vector.broadcast %cst_50 : f32 to vector<128x128xf32>
    %121 = arith.maximumf %119, %120 : vector<128x128xf32>
    %cst_51 = arith.constant 1.000000e+00 : f32
    %122 = vector.broadcast %cst_51 : f32 to vector<128x128xf32>
    %123 = arith.divf %122, %121 : vector<128x128xf32>
    %c0_52 = arith.constant 0 : index
    %c0_53 = arith.constant 0 : index
    %c0_54 = arith.constant 0 : index
    %124 = vector.load %arg2[%c0_52, %c0_53, %c0_54] : memref<1x128x128xbf16, #tpu.memory_space<vmem>>, vector<1x128x128xbf16>
    %125 = vector.shape_cast %124 : vector<1x128x128xbf16> to vector<128x128xbf16>
    %126 = arith.extf %125 : vector<128x128xbf16> to vector<128x128xf32>
    %127 = arith.mulf %126, %123 : vector<128x128xf32>
    %128 = tpu.iota {dimensions = array<i32: 0>} : vector<4x128xi32>
    %129 = tpu.iota {dimensions = array<i32: 1>} : vector<4x128xi32>
    %c32_i32_55 = arith.constant 32 : i32
    %130 = vector.broadcast %c32_i32_55 : i32 to vector<4x128xi32>
    %131 = arith.muli %128, %130 : vector<4x128xi32>
    %132 = arith.cmpi sge, %129, %131 : vector<4x128xi32>
    %c1_i32_56 = arith.constant 1 : i32
    %133 = vector.broadcast %c1_i32_56 : i32 to vector<4x128xi32>
    %134 = arith.addi %128, %133 : vector<4x128xi32>
    %c32_i32_57 = arith.constant 32 : i32
    %135 = vector.broadcast %c32_i32_57 : i32 to vector<4x128xi32>
    %136 = arith.muli %134, %135 : vector<4x128xi32>
    %137 = arith.cmpi slt, %129, %136 : vector<4x128xi32>
    %138 = arith.andi %132, %137 : vector<4x128xi1>
    %139 = arith.extui %138 : vector<4x128xi1> to vector<4x128xi32>
    %140 = arith.sitofp %139 : vector<4x128xi32> to vector<4x128xf32>
    %cst_58 = arith.constant dense<0.000000e+00> : vector<128x128xf32>
    %141 = tpu.matmul %118, %140, %cst_58 {dimension_numbers = #tpu.dot_dimension_numbers<[1], [0], [0], [1], [0, 0, 1, 1], [], []>} : vector<128x4xf32>, vector<4x128xf32>, vector<128x128xf32> -> vector<128x128xf32>
    %142 = vector.broadcast %1 : vector<128x1xf32> to vector<128x4xf32>
    %143 = arith.mulf %113, %142 : vector<128x4xf32>
    %cst_59 = arith.constant dense<0.000000e+00> : vector<128x128xf32>
    %144 = tpu.matmul %143, %140, %cst_59 {dimension_numbers = #tpu.dot_dimension_numbers<[1], [0], [0], [1], [0, 0, 1, 1], [], []>} : vector<128x4xf32>, vector<4x128xf32>, vector<128x128xf32> -> vector<128x128xf32>
    %c0_60 = arith.constant 0 : index
    %c0_61 = arith.constant 0 : index
    %145 = vector.load %arg12[%c0_60, %c0_61] : memref<32x128xf32, #tpu.memory_space<vmem>>, vector<32x128xf32>
    %cst_62 = arith.constant dense<0.000000e+00> : vector<128x128xf32>
    %146 = tpu.matmul %103, %145, %cst_62 {dimension_numbers = #tpu.dot_dimension_numbers<[1], [0], [0], [1], [0, 0, 1, 1], [], []>} : vector<128x32xf32>, vector<32x128xf32>, vector<128x128xf32> -> vector<128x128xf32>
    %147 = arith.mulf %146, %141 : vector<128x128xf32>
    %cst_63 = arith.constant dense<0.000000e+00> : vector<128x128xf32>
    %148 = tpu.matmul %127, %147, %cst_63 {dimension_numbers = #tpu.dot_dimension_numbers<[1], [0], [0], [1], [0, 0, 1, 1], [], []>} : vector<128x128xf32>, vector<128x128xf32>, vector<128x128xf32> -> vector<128x128xf32>
    %149 = tpu.iota {dimensions = array<i32: 0>} : vector<128x32xi32>
    %150 = tpu.iota {dimensions = array<i32: 1>} : vector<128x32xi32>
    %c128_i32_64 = arith.constant 128 : i32
    %151 = vector.broadcast %c128_i32_64 : i32 to vector<128x32xi32>
    %152 = arith.cmpi slt, %149, %151 : vector<128x32xi32>
    %c32_i32_65 = arith.constant 32 : i32
    %c0_i32_66 = arith.constant 0 : i32
    %153 = arith.cmpi eq, %c32_i32_65, %c0_i32_66 : i32
    %c1_i32_67 = arith.constant 1 : i32
    %154 = arith.select %153, %c1_i32_67, %c32_i32_65 : i32
    %155 = vector.broadcast %154 : i32 to vector<128x32xi32>
    %156 = arith.remsi %149, %155 : vector<128x32xi32>
    %c0_i32_68 = arith.constant 0 : i32
    %157 = vector.broadcast %c0_i32_68 : i32 to vector<128x32xi32>
    %158 = arith.cmpi ne, %156, %157 : vector<128x32xi32>
    %c0_i32_69 = arith.constant 0 : i32
    %159 = vector.broadcast %c0_i32_69 : i32 to vector<128x32xi32>
    %160 = arith.cmpi slt, %156, %159 : vector<128x32xi32>
    %c0_i32_70 = arith.constant 0 : i32
    %161 = arith.cmpi slt, %154, %c0_i32_70 : i32
    %162 = vector.broadcast %161 : i1 to vector<128x32xi1>
    %163 = vector.broadcast %162 : vector<128x32xi1> to vector<128x32xi1>
    %164 = arith.xori %160, %163 : vector<128x32xi1>
    %165 = arith.andi %164, %158 : vector<128x32xi1>
    %166 = vector.broadcast %154 : i32 to vector<128x32xi32>
    %167 = arith.addi %156, %166 : vector<128x32xi32>
    %168 = arith.select %165, %167, %156 : vector<128x32xi1>, vector<128x32xi32>
    %169 = arith.cmpi eq, %168, %150 : vector<128x32xi32>
    %170 = arith.andi %152, %169 : vector<128x32xi1>
    %171 = arith.extui %170 : vector<128x32xi1> to vector<128x32xi32>
    %172 = arith.sitofp %171 : vector<128x32xi32> to vector<128x32xf32>
    %173 = arith.mulf %144, %148 : vector<128x128xf32>
    %cst_71 = arith.constant dense<0.000000e+00> : vector<128x32xf32>
    %174 = tpu.matmul %173, %172, %cst_71 {dimension_numbers = #tpu.dot_dimension_numbers<[1], [0], [0], [1], [0, 0, 1, 1], [], []>} : vector<128x128xf32>, vector<128x32xf32>, vector<128x32xf32> -> vector<128x32xf32>
    %c0_72 = arith.constant 0 : index
    %c0_73 = arith.constant 0 : index
    %175 = vector.load %arg13[%c0_72, %c0_73] : memref<1x32xf32, #tpu.memory_space<vmem>>, vector<1x32xf32>
    %176 = vector.broadcast %175 : vector<1x32xf32> to vector<128x32xf32>
    %177 = arith.addf %174, %176 : vector<128x32xf32>
    %cst_74 = arith.constant 0.000000e+00 : f32
    %178 = vector.broadcast %cst_74 : f32 to vector<128x32xf32>
    %179 = arith.maximumf %177, %178 : vector<128x32xf32>
    %cst_75 = arith.constant dense<0.000000e+00> : vector<32xf32>
    %180 = vector.multi_reduction <add>, %179, %cst_75 [0] : vector<128x32xf32> to vector<32xf32>
    %181 = vector.shape_cast %180 : vector<32xf32> to vector<1x32xf32>
    %cst_76 = arith.constant 1.280000e+02 : f32
    %182 = vector.broadcast %cst_76 : f32 to vector<1x32xf32>
    %183 = arith.divf %181, %182 : vector<1x32xf32>
    %184 = vector.broadcast %183 : vector<1x32xf32> to vector<128x32xf32>
    %185 = arith.subf %179, %184 : vector<128x32xf32>
    %186 = arith.mulf %185, %185 : vector<128x32xf32>
    %cst_77 = arith.constant dense<0.000000e+00> : vector<32xf32>
    %187 = vector.multi_reduction <add>, %186, %cst_77 [0] : vector<128x32xf32> to vector<32xf32>
    %188 = vector.shape_cast %187 : vector<32xf32> to vector<1x32xf32>
    %cst_78 = arith.constant 1.280000e+02 : f32
    %189 = vector.broadcast %cst_78 : f32 to vector<1x32xf32>
    %190 = arith.divf %188, %189 : vector<1x32xf32>
    %191 = vector.broadcast %183 : vector<1x32xf32> to vector<128x32xf32>
    %192 = arith.subf %179, %191 : vector<128x32xf32>
    %cst_79 = arith.constant 9.99999974E-6 : f32
    %193 = vector.broadcast %cst_79 : f32 to vector<1x32xf32>
    %194 = arith.addf %190, %193 : vector<1x32xf32>
    %195 = math.rsqrt %194 : vector<1x32xf32>
    %196 = vector.broadcast %195 : vector<1x32xf32> to vector<128x32xf32>
    %197 = arith.mulf %192, %196 : vector<128x32xf32>
    %c0_80 = arith.constant 0 : index
    %c0_81 = arith.constant 0 : index
    %198 = vector.load %arg14[%c0_80, %c0_81] : memref<1x32xf32, #tpu.memory_space<vmem>>, vector<1x32xf32>
    %199 = vector.broadcast %198 : vector<1x32xf32> to vector<128x32xf32>
    %200 = arith.mulf %197, %199 : vector<128x32xf32>
    %c0_82 = arith.constant 0 : index
    %c0_83 = arith.constant 0 : index
    %201 = vector.load %arg15[%c0_82, %c0_83] : memref<1x32xf32, #tpu.memory_space<vmem>>, vector<1x32xf32>
    %202 = vector.broadcast %201 : vector<1x32xf32> to vector<128x32xf32>
    %203 = arith.addf %200, %202 : vector<128x32xf32>
    %c0_84 = arith.constant 0 : index
    %c0_85 = arith.constant 0 : index
    %204 = vector.load %arg16[%c0_84, %c0_85] : memref<32x4xf32, #tpu.memory_space<vmem>>, vector<32x4xf32>
    %cst_86 = arith.constant dense<0.000000e+00> : vector<128x4xf32>
    %205 = tpu.matmul %203, %204, %cst_86 {dimension_numbers = #tpu.dot_dimension_numbers<[1], [0], [0], [1], [0, 0, 1, 1], [], []>} : vector<128x32xf32>, vector<32x4xf32>, vector<128x4xf32> -> vector<128x4xf32>
    %c0_87 = arith.constant 0 : index
    %c0_88 = arith.constant 0 : index
    %206 = vector.load %arg17[%c0_87, %c0_88] : memref<1x4xf32, #tpu.memory_space<vmem>>, vector<1x4xf32>
    %207 = vector.broadcast %206 : vector<1x4xf32> to vector<128x4xf32>
    %208 = arith.addf %205, %207 : vector<128x4xf32>
    %cst_89 = arith.constant dense<0xFF800000> : vector<128xf32>
    %209 = vector.multi_reduction <maximumf>, %208, %cst_89 [1] : vector<128x4xf32> to vector<128xf32>
    %210 = vector.shape_cast %209 : vector<128xf32> to vector<128x1xf32>
    %211 = vector.broadcast %210 : vector<128x1xf32> to vector<128x4xf32>
    %212 = arith.subf %208, %211 : vector<128x4xf32>
    %213 = math.exp %212 : vector<128x4xf32>
    %cst_90 = arith.constant dense<0x7F800000> : vector<128xf32>
    %214 = vector.multi_reduction <minimumf>, %205, %cst_90 [1] : vector<128x4xf32> to vector<128xf32>
    %215 = vector.shape_cast %214 : vector<128xf32> to vector<128x1xf32>
    %216 = vector.broadcast %215 : vector<128x1xf32> to vector<128x4xf32>
    %217 = arith.subf %216, %205 : vector<128x4xf32>
    %218 = math.exp %217 : vector<128x4xf32>
    %cst_91 = arith.constant dense<0.000000e+00> : vector<128x128xf32>
    %219 = tpu.matmul %213, %218, %cst_91 {dimension_numbers = #tpu.dot_dimension_numbers<[1], [1], [0], [0], [0, 0, 1, 0], [], []>} : vector<128x4xf32>, vector<128x4xf32>, vector<128x128xf32> -> vector<128x128xf32>
    %cst_92 = arith.constant 9.99999991E-38 : f32
    %220 = vector.broadcast %cst_92 : f32 to vector<128x128xf32>
    %221 = arith.maximumf %219, %220 : vector<128x128xf32>
    %cst_93 = arith.constant 1.000000e+00 : f32
    %222 = vector.broadcast %cst_93 : f32 to vector<128x128xf32>
    %223 = arith.divf %222, %221 : vector<128x128xf32>
    %c0_94 = arith.constant 0 : index
    %c0_95 = arith.constant 0 : index
    %c0_96 = arith.constant 0 : index
    %224 = vector.load %arg2[%c0_94, %c0_95, %c0_96] : memref<1x128x128xbf16, #tpu.memory_space<vmem>>, vector<1x128x128xbf16>
    %225 = vector.shape_cast %224 : vector<1x128x128xbf16> to vector<128x128xbf16>
    %226 = arith.extf %225 : vector<128x128xbf16> to vector<128x128xf32>
    %227 = arith.mulf %226, %223 : vector<128x128xf32>
    %228 = tpu.iota {dimensions = array<i32: 0>} : vector<4x128xi32>
    %229 = tpu.iota {dimensions = array<i32: 1>} : vector<4x128xi32>
    %c8_i32 = arith.constant 8 : i32
    %230 = vector.broadcast %c8_i32 : i32 to vector<4x128xi32>
    %231 = arith.muli %228, %230 : vector<4x128xi32>
    %232 = arith.cmpi sge, %229, %231 : vector<4x128xi32>
    %c1_i32_97 = arith.constant 1 : i32
    %233 = vector.broadcast %c1_i32_97 : i32 to vector<4x128xi32>
    %234 = arith.addi %228, %233 : vector<4x128xi32>
    %c8_i32_98 = arith.constant 8 : i32
    %235 = vector.broadcast %c8_i32_98 : i32 to vector<4x128xi32>
    %236 = arith.muli %234, %235 : vector<4x128xi32>
    %237 = arith.cmpi slt, %229, %236 : vector<4x128xi32>
    %238 = arith.andi %232, %237 : vector<4x128xi1>
    %239 = arith.extui %238 : vector<4x128xi1> to vector<4x128xi32>
    %240 = arith.sitofp %239 : vector<4x128xi32> to vector<4x128xf32>
    %cst_99 = arith.constant dense<0.000000e+00> : vector<128x128xf32>
    %241 = tpu.matmul %218, %240, %cst_99 {dimension_numbers = #tpu.dot_dimension_numbers<[1], [0], [0], [1], [0, 0, 1, 1], [], []>} : vector<128x4xf32>, vector<4x128xf32>, vector<128x128xf32> -> vector<128x128xf32>
    %242 = vector.broadcast %1 : vector<128x1xf32> to vector<128x4xf32>
    %243 = arith.mulf %213, %242 : vector<128x4xf32>
    %cst_100 = arith.constant dense<0.000000e+00> : vector<128x128xf32>
    %244 = tpu.matmul %243, %240, %cst_100 {dimension_numbers = #tpu.dot_dimension_numbers<[1], [0], [0], [1], [0, 0, 1, 1], [], []>} : vector<128x4xf32>, vector<4x128xf32>, vector<128x128xf32> -> vector<128x128xf32>
    %c0_101 = arith.constant 0 : index
    %c0_102 = arith.constant 0 : index
    %245 = vector.load %arg18[%c0_101, %c0_102] : memref<32x128xf32, #tpu.memory_space<vmem>>, vector<32x128xf32>
    %cst_103 = arith.constant dense<0.000000e+00> : vector<128x128xf32>
    %246 = tpu.matmul %203, %245, %cst_103 {dimension_numbers = #tpu.dot_dimension_numbers<[1], [0], [0], [1], [0, 0, 1, 1], [], []>} : vector<128x32xf32>, vector<32x128xf32>, vector<128x128xf32> -> vector<128x128xf32>
    %247 = arith.mulf %246, %241 : vector<128x128xf32>
    %cst_104 = arith.constant dense<0.000000e+00> : vector<128x128xf32>
    %248 = tpu.matmul %227, %247, %cst_104 {dimension_numbers = #tpu.dot_dimension_numbers<[1], [0], [0], [1], [0, 0, 1, 1], [], []>} : vector<128x128xf32>, vector<128x128xf32>, vector<128x128xf32> -> vector<128x128xf32>
    %249 = tpu.iota {dimensions = array<i32: 0>} : vector<128x128xi32>
    %250 = tpu.iota {dimensions = array<i32: 1>} : vector<128x128xi32>
    %c32_i32_105 = arith.constant 32 : i32
    %251 = vector.broadcast %c32_i32_105 : i32 to vector<128x128xi32>
    %252 = arith.cmpi slt, %249, %251 : vector<128x128xi32>
    %c8_i32_106 = arith.constant 8 : i32
    %c0_i32_107 = arith.constant 0 : i32
    %253 = arith.cmpi eq, %c8_i32_106, %c0_i32_107 : i32
    %c1_i32_108 = arith.constant 1 : i32
    %254 = arith.select %253, %c1_i32_108, %c8_i32_106 : i32
    %255 = vector.broadcast %254 : i32 to vector<128x128xi32>
    %256 = arith.remsi %249, %255 : vector<128x128xi32>
    %c0_i32_109 = arith.constant 0 : i32
    %257 = vector.broadcast %c0_i32_109 : i32 to vector<128x128xi32>
    %258 = arith.cmpi ne, %256, %257 : vector<128x128xi32>
    %c0_i32_110 = arith.constant 0 : i32
    %259 = vector.broadcast %c0_i32_110 : i32 to vector<128x128xi32>
    %260 = arith.cmpi slt, %256, %259 : vector<128x128xi32>
    %c0_i32_111 = arith.constant 0 : i32
    %261 = arith.cmpi slt, %254, %c0_i32_111 : i32
    %262 = vector.broadcast %261 : i1 to vector<128x128xi1>
    %263 = vector.broadcast %262 : vector<128x128xi1> to vector<128x128xi1>
    %264 = arith.xori %260, %263 : vector<128x128xi1>
    %265 = arith.andi %264, %258 : vector<128x128xi1>
    %266 = vector.broadcast %254 : i32 to vector<128x128xi32>
    %267 = arith.addi %256, %266 : vector<128x128xi32>
    %268 = arith.select %265, %267, %256 : vector<128x128xi1>, vector<128x128xi32>
    %269 = arith.cmpi eq, %268, %250 : vector<128x128xi32>
    %270 = arith.andi %252, %269 : vector<128x128xi1>
    %271 = arith.extui %270 : vector<128x128xi1> to vector<128x128xi32>
    %272 = arith.sitofp %271 : vector<128x128xi32> to vector<128x128xf32>
    %273 = arith.mulf %244, %248 : vector<128x128xf32>
    %cst_112 = arith.constant dense<0.000000e+00> : vector<128x128xf32>
    %274 = tpu.matmul %273, %272, %cst_112 {dimension_numbers = #tpu.dot_dimension_numbers<[1], [0], [0], [1], [0, 0, 1, 1], [], []>} : vector<128x128xf32>, vector<128x128xf32>, vector<128x128xf32> -> vector<128x128xf32>
    %c0_113 = arith.constant 0 : index
    %c0_114 = arith.constant 0 : index
    %275 = vector.load %arg19[%c0_113, %c0_114] : memref<1x128xf32, #tpu.memory_space<vmem>>, vector<1x128xf32>
    %276 = vector.broadcast %275 : vector<1x128xf32> to vector<128x128xf32>
    %277 = arith.addf %274, %276 : vector<128x128xf32>
    %c0_115 = arith.constant 0 : index
    %c0_116 = arith.constant 0 : index
    %c0_117 = arith.constant 0 : index
    %278 = vector.load %arg22[%c0_115, %c0_116, %c0_117] : memref<1x128x128xf32, #tpu.memory_space<vmem>>, vector<1x128x128xf32>
    %279 = vector.shape_cast %278 : vector<1x128x128xf32> to vector<128x128xf32>
    %280 = vector.shape_cast %277 : vector<128x128xf32> to vector<1x128x128xf32>
    tpu.vector_store %arg22[%c0_115, %c0_116, %c0_117], %280 {strides = array<i32>} : memref<1x128x128xf32, #tpu.memory_space<vmem>>, vector<1x128x128xf32>,
    return
  }
  func.func @transform_0(%arg0: i32) -> (i32, i32, i32) {
    %c0_i32 = arith.constant 0 : i32
    %c0_i32_0 = arith.constant 0 : i32
    %c0_i32_1 = arith.constant 0 : i32
    return %arg0, %c0_i32, %c0_i32_0 : i32, i32, i32
  }
  func.func @transform_1(%arg0: i32) -> (i32, i32, i32) {
    %c0_i32 = arith.constant 0 : i32
    %c0_i32_0 = arith.constant 0 : i32
    %c0_i32_1 = arith.constant 0 : i32
    return %arg0, %c0_i32, %c0_i32_0 : i32, i32, i32
  }
  func.func @transform_2(%arg0: i32) -> (i32, i32, i32) {
    %c0_i32 = arith.constant 0 : i32
    %c0_i32_0 = arith.constant 0 : i32
    %c0_i32_1 = arith.constant 0 : i32
    return %arg0, %c0_i32, %c0_i32_0 : i32, i32, i32
  }
  func.func @transform_3(%arg0: i32) -> (i32, i32) {
    %c0_i32 = arith.constant 0 : i32
    %c0_i32_0 = arith.constant 0 : i32
    %c0_i32_1 = arith.constant 0 : i32
    return %c0_i32, %c0_i32_0 : i32, i32
  }
  func.func @transform_4(%arg0: i32) -> (i32, i32) {
    %c0_i32 = arith.constant 0 : i32
    %c0_i32_0 = arith.constant 0 : i32
    %c0_i32_1 = arith.constant 0 : i32
    return %c0_i32, %c0_i32_0 : i32, i32
  }
  func.func @transform_5(%arg0: i32) -> (i32, i32) {
    %c0_i32 = arith.constant 0 : i32
    %c0_i32_0 = arith.constant 0 : i32
    %c0_i32_1 = arith.constant 0 : i32
    return %c0_i32, %c0_i32_0 : i32, i32
  }
  func.func @transform_6(%arg0: i32) -> (i32, i32) {
    %c0_i32 = arith.constant 0 : i32
    %c0_i32_0 = arith.constant 0 : i32
    %c0_i32_1 = arith.constant 0 : i32
    return %c0_i32, %c0_i32_0 : i32, i32
  }
  func.func @transform_7(%arg0: i32) -> (i32, i32) {
    %c0_i32 = arith.constant 0 : i32
    %c0_i32_0 = arith.constant 0 : i32
    %c0_i32_1 = arith.constant 0 : i32
    return %c0_i32, %c0_i32_0 : i32, i32
  }
  func.func @transform_8(%arg0: i32) -> (i32, i32) {
    %c0_i32 = arith.constant 0 : i32
    %c0_i32_0 = arith.constant 0 : i32
    %c0_i32_1 = arith.constant 0 : i32
    return %c0_i32, %c0_i32_0 : i32, i32
  }
  func.func @transform_9(%arg0: i32) -> (i32, i32) {
    %c0_i32 = arith.constant 0 : i32
    %c0_i32_0 = arith.constant 0 : i32
    %c0_i32_1 = arith.constant 0 : i32
    return %c0_i32, %c0_i32_0 : i32, i32
  }
  func.func @transform_10(%arg0: i32) -> (i32, i32) {
    %c0_i32 = arith.constant 0 : i32
    %c0_i32_0 = arith.constant 0 : i32
    %c0_i32_1 = arith.constant 0 : i32
    return %c0_i32, %c0_i32_0 : i32, i32
  }
  func.func @transform_11(%arg0: i32) -> (i32, i32) {
    %c0_i32 = arith.constant 0 : i32
    %c0_i32_0 = arith.constant 0 : i32
    %c0_i32_1 = arith.constant 0 : i32
    return %c0_i32, %c0_i32_0 : i32, i32
  }
  func.func @transform_12(%arg0: i32) -> (i32, i32) {
    %c0_i32 = arith.constant 0 : i32
    %c0_i32_0 = arith.constant 0 : i32
    %c0_i32_1 = arith.constant 0 : i32
    return %c0_i32, %c0_i32_0 : i32, i32
  }
  func.func @transform_13(%arg0: i32) -> (i32, i32) {
    %c0_i32 = arith.constant 0 : i32
    %c0_i32_0 = arith.constant 0 : i32
    %c0_i32_1 = arith.constant 0 : i32
    return %c0_i32, %c0_i32_0 : i32, i32
  }
  func.func @transform_14(%arg0: i32) -> (i32, i32) {
    %c0_i32 = arith.constant 0 : i32
    %c0_i32_0 = arith.constant 0 : i32
    %c0_i32_1 = arith.constant 0 : i32
    return %c0_i32, %c0_i32_0 : i32, i32
  }
  func.func @transform_15(%arg0: i32) -> (i32, i32) {
    %c0_i32 = arith.constant 0 : i32
    %c0_i32_0 = arith.constant 0 : i32
    %c0_i32_1 = arith.constant 0 : i32
    return %c0_i32, %c0_i32_0 : i32, i32
  }
  func.func @transform_16(%arg0: i32) -> (i32, i32) {
    %c0_i32 = arith.constant 0 : i32
    %c0_i32_0 = arith.constant 0 : i32
    %c0_i32_1 = arith.constant 0 : i32
    return %c0_i32, %c0_i32_0 : i32, i32
  }
  func.func @transform_17(%arg0: i32) -> (i32, i32) {
    %c0_i32 = arith.constant 0 : i32
    %c0_i32_0 = arith.constant 0 : i32
    %c0_i32_1 = arith.constant 0 : i32
    return %c0_i32, %c0_i32_0 : i32, i32
  }
  func.func @transform_18(%arg0: i32) -> (i32, i32) {
    %c0_i32 = arith.constant 0 : i32
    %c0_i32_0 = arith.constant 0 : i32
    %c0_i32_1 = arith.constant 0 : i32
    return %c0_i32, %c0_i32_0 : i32, i32
  }
  func.func @transform_19(%arg0: i32) -> (i32, i32) {
    %c0_i32 = arith.constant 0 : i32
    %c0_i32_0 = arith.constant 0 : i32
    %c0_i32_1 = arith.constant 0 : i32
    return %c0_i32, %c0_i32_0 : i32, i32
  }
  func.func @transform_20(%arg0: i32) -> (i32, i32) {
    %c0_i32 = arith.constant 0 : i32
    %c0_i32_0 = arith.constant 0 : i32
    %c0_i32_1 = arith.constant 0 : i32
    return %c0_i32, %c0_i32_0 : i32, i32
  }
  func.func @transform_21(%arg0: i32) -> (i32, i32, i32) {
    %c0_i32 = arith.constant 0 : i32
    %c0_i32_0 = arith.constant 0 : i32
    %c0_i32_1 = arith.constant 0 : i32
    return %arg0, %c0_i32, %c0_i32_0 : i32, i32, i32
  }
}

</mosaic_0001>

<bundles_post_ra>
// kernel: graph_feature_encoder.1
= control target key start
LH: loop header
LB: loop body
LE: loop exit
PB: predicated region body
PF: predicated region fallthrough
CT: control target
= control target key end

     0   :  { %s9048_s0 = inlined_call_operand.vmem [shape: f32[2,128,16], index: 0, kind: input, shape index: {}]   ;;  %s9049_s1 = inlined_call_operand.vmem [shape: bf16[2,128,128], index: 1, kind: input, shape index: {}]   ;;  %s9050_s2 = inlined_call_operand.vmem [shape: f32[2,128,1], index: 2, kind: input, shape index: {}]   ;;  %s9051_s3 = inlined_call_operand.vmem [shape: f32[16,4], index: 3, kind: input, shape index: {}]   ;;  %s9052_s4 = inlined_call_operand.vmem [shape: f32[1,4], index: 4, kind: input, shape index: {}]   ;;  %s9053_s5 = inlined_call_operand.vmem [shape: f32[16,128], index: 5, kind: input, shape index: {}]   ;;  %s9054_s6 = inlined_call_operand.vmem [shape: f32[1,32], index: 6, kind: input, shape index: {}]   ;;  %s9055_s7 = inlined_call_operand.vmem [shape: f32[1,32], index: 7, kind: input, shape index: {}]   ;;  %s9056_s8 = inlined_call_operand.vmem [shape: f32[1,32], index: 8, kind: input, shape index: {}]   ;;  %s9057_s9 = inlined_call_operand.vmem [shape: f32[32,4], index: 9, kind: input, shape index: {}]   ;;  %s9058_s10 = inlined_call_operand.vmem [shape: f32[1,4], index: 10, kind: input, shape index: {}]   ;;  %s9059_s11 = inlined_call_operand.vmem [shape: f32[32,128], index: 11, kind: input, shape index: {}]   ;;  %s9060_s12 = inlined_call_operand.vmem [shape: f32[1,32], index: 12, kind: input, shape index: {}]   ;;  %s9061_s13 = inlined_call_operand.vmem [shape: f32[1,32], index: 13, kind: input, shape index: {}]   ;;  %s9062_s14 = inlined_call_operand.vmem [shape: f32[1,32], index: 14, kind: input, shape index: {}]   ;;  %s9063_s15 = inlined_call_operand.vmem [shape: f32[32,4], index: 15, kind: input, shape index: {}]   ;;  %s9064_s16 = inlined_call_operand.vmem [shape: f32[1,4], index: 16, kind: input, shape index: {}]   ;;  %s9065_s17 = inlined_call_operand.vmem [shape: f32[32,128], index: 17, kind: input, shape index: {}]   ;;  %s9066_s18 = inlined_call_operand.vmem [shape: f32[1,128], index: 18, kind: input, shape index: {}]   ;;  %s9067_s19 = inlined_call_operand.vmem [shape: f32[1,8], index: 19, kind: input, shape index: {}]   ;;  %s9068_s20 = inlined_call_operand.vmem [shape: f32[1,8], index: 20, kind: input, shape index: {}]   ;;  %s9069_s21 = inlined_call_operand.vmem [shape: f32[2,128,128], index: 21, kind: output, shape index: {}]  }
   0x1   :  { %9171 = sst [smem:[#allocation34_spill]] %s9048_s0 }
   0x2   :  { %9172 = sst [smem:[#allocation35_spill]] %s9049_s1 }
   0x3   :  { %9173 = sst [smem:[#allocation36_spill]] %s9050_s2  ;;  %s6356_s2 = smov 0  }
   0x4   :  { %9174 = sst [smem:[#allocation37_spill]] %s9051_s3 }
   0x5   :  { %9175 = sst [smem:[#allocation38_spill]] %s9052_s4 }
   0x6   :  { %9176 = sst [smem:[#allocation39_spill]] %s9053_s5 }
   0x7 LB: > { %s5482_s25 = sadd.s32 4294967295, %s6240_s2   ;;  %p5486_p0 = scmp.ge.s32.totalorder %s6240_s2, 1  ;;  %s6240_s2 = sphi %s6356_s2, %s31_s2  }
   0x8   : > { %p607_p1 = scmp.lt.s32.totalorder %s6240_s2, 3 }
   0xa   : > { %p608_p2 = pnand %p5486_p0, %p607_p1 }
   0xc   : > { %611 = sbr.rel (%p608_p2) target bundleno = 3336 (0xd08), region = 104 }
  0x11   : > { %s9177_s26 = sld [smem:[#allocation37_spill]]  ;;  %p677_p3 = scmp.lt.s32.totalorder %s5482_s25, 1  ;;  %vm731_vm0 = vcmask 130048   ;;  %v6242_v10 = vmov 0   ;;  %vm865_vm1 = vcmask 31744   ;;  %vm1535_vm5 = vcmask 1043456  }
  0x12   : > { %s9178_s4 = sld [smem:[#allocation34_spill]]  ;;  %5928 = vset.pattern.permute.xlu2 %v6242_v10  ;;  %5929 = vset.pattern.permute.xlu0 %v6242_v10 }
  0x13   : > { %s9315_s25 = smov (!%p677_p3, %s5482_s25), 1  ;;  %s9179_s23 = sld [smem:[#allocation36_spill]]  ;;  %5927 = vset.pattern.permute.xlu1 %v6242_v10 }
  0x14   : > { %s6373_s28 = sshll.u32 %s9315_s25, 7  ;;  %s9182_s20 = sld [smem:[#allocation38_spill]] }
  0x15   : > { %s9195_s29 = sld [smem:[#allocation39_spill]] }
  0x17   : > { %v730_v0 = vld [vmem:[%s9177_s26 + $0x8] sm:$0xff]  ;;  %v729_v1 = vld [vmem:[%s9177_s26] sm:$0xff] }
  0x18   : > { %794 = vmatpush.msra.mxu0 %v730_v0  ;;  %s6379_s30 = scalar_lea.vmem %s9178_s4, %s6373_s28 }
  0x19   : > { %v6382_v2 = vld [vmem:[%s6379_s30] sm:$0xff]  ;;  %v6387_v3 = vld [vmem:[%s6379_s30 + $0x8] sm:$0xff]  ;;  %v6392_v4 = vld [vmem:[%s6379_s30 + $0x10] sm:$0xff]  ;;  %s6408_s1 = scalar_lea.vmem %s9179_s23, %s6373_s28  ;;  %s9202_s23 = sld [smem:[#allocation35_spill]] }
  0x1a   : > { %795 = vmatpush.msra.mxu0 %v729_v1  ;;  %v6397_v5 = vld [vmem:[%s6379_s30 + $0x18] sm:$0xff]  ;;  %v6402_v6 = vld [vmem:[%s6379_s30 + $0x20] sm:$0xff]  ;;  %v698_v7 = vld [vmem:[%s6408_s1 + $0x8] sm:$0xff] }
  0x1b   : > { %5495 = vmatmul.msk.f32.vlgmr.msra.gmra.mxu0 %vm731_vm0, %v6382_v2  ;;  %v699_v8 = vld [vmem:[%s6408_s1 + $0x10] sm:$0xff]  ;;  %v697_v9 = vld [vmem:[%s6408_s1] sm:$0xff]  ;;  %1611 = vperm.xlu2 %5928, %v698_v7   ;;  %v6416_v11 = vld [vmem:[%s6379_s30 + $0x28] sm:$0xff] }
  0x1c   : > { %1616 = vperm.xlu0 %5929, %v699_v8   ;;  %1606 = vperm.xlu1 %5927, %v697_v9   ;;  %v701_v12 = vld [vmem:[%s6408_s1 + $0x20] sm:$0xff]  ;;  %v702_v13 = vld [vmem:[%s6408_s1 + $0x28] sm:$0xff]  ;;  %v700_v14 = vld [vmem:[%s6408_s1 + $0x18] sm:$0xff] }
  0x1d   : > { %v6424_v15 = vld [vmem:[%s6379_s30 + $0x30] sm:$0xff]  ;;  %v704_v16 = vld [vmem:[%s6408_s1 + $0x38] sm:$0xff]  ;;  %v705_v18 = vld [vmem:[%s6408_s1 + $0x40] sm:$0xff] }
  0x1e   : > { %9180 = vst [vmem:[#allocation2_spill] sm:$0xff] %v6424_v15  ;;  %v703_v17 = vld [vmem:[%s6408_s1 + $0x30] sm:$0xff]  ;;  %v6432_v19 = vld [vmem:[%s6379_s30 + $0x38] sm:$0xff]  ;;  %v706_v20 = vld [vmem:[%s6408_s1 + $0x48] sm:$0xff] }
  0x1f   : > { %9181 = vst [vmem:[#allocation3_spill] sm:$0xff] %v6432_v19  ;;  %v6438_v21 = vld [vmem:[%s6379_s30 + $0x40] sm:$0xff]  ;;  %v6443_v22 = vld [vmem:[%s6379_s30 + $0x48] sm:$0xff]  ;;  %v6448_v23 = vld [vmem:[%s6379_s30 + $0x50] sm:$0xff] }
  0x20   : > { %v6453_v24 = vld [vmem:[%s6379_s30 + $0x58] sm:$0xff]  ;;  %v6458_v25 = vld [vmem:[%s6379_s30 + $0x60] sm:$0xff]  ;;  %v6463_v26 = vld [vmem:[%s6379_s30 + $0x68] sm:$0xff] }
  0x21   : > { %v6468_v27 = vld [vmem:[%s6379_s30 + $0x70] sm:$0xff]  ;;  %v6475_v28 = vld [vmem:[%s9182_s20] ss:$0 sm:$0xff]  ;;  %v6490_v34 = vld [vmem:[%s6379_s30 + $0x78] sm:$0xff]  ;;  %s5850_s30 = sshll.u32 %s9315_s25, 6  ;;  %s9027_s25 = scalar_lea.vmem %s9069_s21, %s6373_s28 }
  0x22   : > { %9183 = vst [vmem:[#allocation4_spill] sm:$0xff] %v6490_v34 }
  0x23   : > { %5496 = vmatmul.msk.f32.gmra.mxu0 %vm731_vm0, %v6387_v3  ;;  %1626 = vperm.xlu2 %5928, %v701_v12  }
  0x24   : > { %1631 = vperm.xlu0 %5929, %v702_v13   ;;  %1621 = vperm.xlu1 %5927, %v700_v14   ;;  %v707_v13 = vld [vmem:[%s6408_s1 + $0x50] sm:$0xff] }
  0x2b   : > { %5497 = vmatmul.msk.f32.gmra.mxu0 %vm731_vm0, %v6392_v4  ;;  %1641 = vperm.xlu2 %5928, %v704_v16   ;;  %v1523_v16 = vlaneseq }
  0x2c   : > { %1636 = vperm.xlu0 %5929, %v703_v17   ;;  %1646 = vperm.xlu1 %5927, %v705_v18  }
  0x2d   : > { %v6589_v17 = vshrl.u32 %v1523_v16, 7 }
  0x2f   : > { %9184 = vst [vmem:[#allocation5_spill] sm:$0xff] %v6589_v17 }
  0x33   : > { %5498 = vmatmul.msk.f32.gmra.mxu0 %vm731_vm0, %v6397_v5 }
  0x34   : > { %1651 = vperm.xlu1 %5927, %v706_v20  }
  0x3b   : > { %5499 = vmatmul.msk.f32.gmra.mxu0 %vm731_vm0, %v6402_v6 }
  0x43   : > { %5500 = vmatmul.msk.f32.gmra.mxu0 %vm731_vm0, %v6416_v11 }
  0x4b   : > { %5501 = vmatmul.msk.f32.gmra.mxu0 %vm731_vm0, %v6424_v15 }
  0x53   : > { %5502 = vmatmul.msk.f32.gmra.mxu0 %vm731_vm0, %v6432_v19 }
  0x5b   : > { %5503 = vmatmul.msk.f32.gmra.mxu0 %vm731_vm0, %v6438_v21 }
  0x63   : > { %5504 = vmatmul.msk.f32.gmra.mxu0 %vm731_vm0, %v6443_v22 }
  0x6b   : > { %5505 = vmatmul.msk.f32.gmra.mxu0 %vm731_vm0, %v6448_v23 }
  0x73   : > { %5506 = vmatmul.msk.f32.gmra.mxu0 %vm731_vm0, %v6453_v24 }
  0x75   : > { %v6593_v20 = vpop.permute.xlu2 %1611 }
  0x7b   : > { %5507 = vmatmul.msk.f32.gmra.mxu0 %vm731_vm0, %v6458_v25 }
  0x83   : > { %5508 = vmatmul.msk.f32.gmra.mxu0 %vm731_vm0, %v6463_v26 }
  0x8b   : > { %5509 = vmatmul.msk.f32.gmra.mxu0 %vm731_vm0, %v6468_v27 }
  0x93   : > { %5510 = vmatmul.msk.f32.gmra.mxu0 %vm731_vm0, %v6490_v34 }
  0x98   : > { %v6477_v29 = vpop.f32.mrf.mxu0 }
  0x99   : > { %v962_v30 = vsel %vm865_vm1, %v6477_v29, inf  ;;  %v6483_v31 = vadd.f32 %v6475_v28, %v6477_v29 }
  0x9a   : > { %963 = vmin.xlane.f32.xlu2 %v962_v30 }
  0x9b   : > { %v866_v32 = vsel %vm865_vm1, %v6483_v31, -inf }
  0x9c   : > { %867 = vmax.xlane.f32.xlu0 %v866_v32  ;;  %v6598_v32 = vadd.s32 1, %v6589_v17 }
  0x9e   : > { %9185 = vst [vmem:[#allocation6_spill] sm:$0xff] %v6598_v32 }
  0xa0   : > { %v6487_v33 = vpop.f32.mrf.mxu0 }
  0xa1   : > { %v965_v35 = vsel %vm865_vm1, %v6487_v33, inf  ;;  %v6498_v36 = vadd.f32 %v6475_v28, %v6487_v33 }
  0xa3   : > { %v869_v39 = vsel %vm865_vm1, %v6498_v36, -inf }
  0xa4   : > { %966 = vmin.xlane.f32.xlu0 %v965_v35  ;;  %v6600_v35 = vpop.permute.xlu0 %1616 }
  0xa8   : > { %v6500_v37 = vpop.f32.mrf.mxu0 }
  0xa9   : > { %v968_v38 = vsel %vm865_vm1, %v6500_v37, inf  ;;  %v6508_v40 = vadd.f32 %v6475_v28, %v6500_v37 }
  0xaa   : > { %969 = vmin.xlane.f32.xlu1 %v968_v38 }
  0xab   : > { %v872_v42 = vsel %vm865_vm1, %v6508_v40, -inf }
  0xac   : > { %870 = vmax.xlane.f32.xlu0 %v869_v39  ;;  %v708_v39 = vld [vmem:[%s6408_s1 + $0x58] sm:$0xff] }
  0xb0   : > { %v6510_v41 = vpop.f32.mrf.mxu0 }
  0xb1   : > { %v971_v43 = vsel %vm865_vm1, %v6510_v41, inf  ;;  %v6518_v44 = vadd.f32 %v6475_v28, %v6510_v41 }
  0xb2   : > { %873 = vmax.xlane.f32.xlu1 %v872_v42  ;;  %972 = vmin.xlane.f32.xlu2 %v971_v43  ;;  %v6605_v42 = vand.u32 127, %v1523_v16  ;;  %v1527_v43 = vmul.u32 32, %v6589_v17 }
  0xb3   : > { %v875_v45 = vsel %vm865_vm1, %v6518_v44, -inf }
  0xb4   : > { %876 = vmax.xlane.f32.xlu0 %v875_v45  ;;  %9186 = vst [vmem:[#allocation7_spill] sm:$0xff] %v6605_v42  ;;  %v1530_v45 = vmul.u32 32, %v6598_v32  ;;  %vm1528_vm2 = vcmp.ge.s32.totalorder %v6605_v42, %v1527_v43 }
  0xb6   : > { %vm1531_vm3 = vcmp.lt.s32.totalorder %v6605_v42, %v1530_v45 }
  0xb7   : > { %vm1532_vm4 = vmand %vm1528_vm2, %vm1531_vm3 }
  0xb8   : > { %v6522_v46 = vpop.f32.mrf.mxu0 }
  0xb9   : > { %v974_v47 = vsel %vm865_vm1, %v6522_v46, inf  ;;  %v6528_v48 = vadd.f32 %v6475_v28, %v6522_v46 }
  0xba   : > { %975 = vmin.xlane.f32.xlu2 %v974_v47  ;;  %v6611_v47 = vpop.permute.xlu1 %1606 }
  0xbb   : > { %v878_v50 = vsel %vm865_vm1, %v6528_v48, -inf  ;;  %9187 = vst [vmem:[#allocation8_spill] sm:$0xff] %v6611_v47 }
  0xc0   : > { %v6530_v49 = vpop.f32.mrf.mxu0 }
  0xc1   : > { %v977_v51 = vsel %vm865_vm1, %v6530_v49, inf  ;;  %v6538_v52 = vadd.f32 %v6475_v28, %v6530_v49 }
  0xc2   : > { %879 = vmax.xlane.f32.xlu2 %v878_v50  ;;  %978 = vmin.xlane.f32.xlu1 %v977_v51  ;;  %v9072_v50 = vmov 0.0  }
  0xc3   : > { %v881_v53 = vsel %vm865_vm1, %v6538_v52, -inf  ;;  %v6614_v51 = vsel %vm1532_vm4, 1.0, %v9072_v50 }
  0xc4   : > { %882 = vmax.xlane.f32.xlu0 %v881_v53  ;;  %9188 = vst [vmem:[#allocation9_spill] sm:$0xff] %v6614_v51  ;;  %5544 = vmatpush.msk.msra.mxu2 %vm1535_vm5, %v6614_v51 }
  0xc5   : > { %5561 = vmatpush.msk.msra.mxu3 %vm1535_vm5, %v6614_v51 }
  0xc8   : > { %v6542_v54 = vpop.f32.mrf.mxu0 }
  0xc9   : > { %v6546_v55 = vadd.f32 %v6475_v28, %v6542_v54  ;;  %v980_v56 = vsel %vm865_vm1, %v6542_v54, inf }
  0xcb   : > { %v884_v57 = vsel %vm865_vm1, %v6546_v55, -inf }
  0xcc   : > { %981 = vmin.xlane.f32.xlu0 %v980_v56  ;;  %885 = vmax.xlane.f32.xlu1 %v884_v57  ;;  %v6626_v57 = vpop.permute.xlu2 %1626 }
  0xd0   : > { %v6552_v58 = vpop.f32.mrf.mxu0 }
  0xd1   : > { %v983_v59 = vsel %vm865_vm1, %v6552_v58, inf  ;;  %v6558_v60 = vadd.f32 %v6475_v28, %v6552_v58 }
  0xd3   : > { %v887_v63 = vsel %vm865_vm1, %v6558_v60, -inf }
  0xd4   : > { %984 = vmin.xlane.f32.xlu1 %v983_v59  ;;  %v6644_v16 = vpop.permute.xlu2 %1641 }
  0xd5   : > { %9190 = vst [vmem:[#allocation11_spill] sm:$0xff] %v6644_v16 }
  0xd8   : > { %v6560_v61 = vpop.f32.mrf.mxu0 }
  0xd9   : > { %v986_v62 = vsel %vm865_vm1, %v6560_v61, inf  ;;  %v6568_v0 = vadd.f32 %v6475_v28, %v6560_v61 }
  0xda   : > { %987 = vmin.xlane.f32.xlu0 %v986_v62 }
  0xdb   : > { %v890_v7 = vsel %vm865_vm1, %v6568_v0, -inf }
  0xdc   : > { %888 = vmax.xlane.f32.xlu1 %v887_v63  ;;  %v6632_v63 = vpop.permute.xlu0 %1631 }
  0xdd   : > { %9189 = vst [vmem:[#allocation10_spill] sm:$0xff] %v6632_v63 }
  0xe0   : > { %v6570_v1 = vpop.f32.mrf.mxu0 }
  0xe1   : > { %v6576_v8 = vadd.f32 %v6475_v28, %v6570_v1  ;;  %v989_v38 = vsel %vm865_vm1, %v6570_v1, inf }
  0xe3   : > { %v893_v12 = vsel %vm865_vm1, %v6576_v8, -inf }
  0xe4   : > { %891 = vmax.xlane.f32.xlu1 %v890_v7 }
  0xe8   : > { %v6578_v9 = vpop.f32.mrf.mxu0 }
  0xe9   : > { %v992_v10 = vsel %vm865_vm1, %v6578_v9, inf  ;;  %v6587_v14 = vadd.f32 %v6475_v28, %v6578_v9 }
  0xea   : > { %993 = vmin.xlane.f32.xlu2 %v992_v10  ;;  %v6636_v10 = vpop.permute.xlu1 %1621 }
  0xeb   : > { %v896_v30 = vsel %vm865_vm1, %v6587_v14, -inf }
  0xec   : > { %894 = vmax.xlane.f32.xlu1 %v893_v12 }
  0xee   : > { %1656 = vperm.xlu0 %5929, %v707_v13  }
  0xf0   : > { %v6591_v18 = vpop.f32.mrf.mxu0 }
  0xf2   : > { %897 = vmax.xlane.f32.xlu2 %v896_v30  ;;  %v6646_v30 = vpop.permute.xlu0 %1636  ;;  %v6654_v43 = vpop.permute.xlu1 %1646 }
  0xf3   : > { %9191 = vst [vmem:[#allocation12_spill] sm:$0xff] %v6646_v30 }
  0xf4   : > { %990 = vmin.xlane.f32.xlu1 %v989_v38  ;;  %9192 = vst [vmem:[#allocation13_spill] sm:$0xff] %v6654_v43 }
  0xf6   : > { %1661 = vperm.xlu0 %5929, %v708_v39  }
  0xf8   : > { %v6616_v53 = vpop.f32.mrf.mxu0 }
  0xf9   : > { %v6624_v56 = vadd.f32 %v6475_v28, %v6616_v53  ;;  %v998_v59 = vsel %vm865_vm1, %v6616_v53, inf }
  0xfa   : > { %v6660_v17 = vpop.permute.xlu1 %1651 }
  0xfb   : > { %v902_v62 = vsel %vm865_vm1, %v6624_v56, -inf  ;;  %9193 = vst [vmem:[#allocation14_spill] sm:$0xff] %v6660_v17 }
  0xfc   : > { %999 = vmin.xlane.f32.xlu1 %v998_v59  ;;  %903 = vmax.xlane.f32.xlu2 %v902_v62 }
 0x100   : > { %v6634_v7 = vpop.f32.mrf.mxu0 }
 0x101   : > { %v6640_v12 = vadd.f32 %v6475_v28, %v6634_v7 }
 0x103   : > { %v905_v13 = vsel %vm865_vm1, %v6640_v12, -inf }
 0x104   : > { %906 = vmax.xlane.f32.xlu2 %v905_v13 }
 0x108   : > { %v6648_v38 = vpop.f32.mrf.mxu0 }
 0x109   : > { %v6652_v39 = vadd.f32 %v6475_v28, %v6648_v38 }
 0x10b   : > { %v908_v45 = vsel %vm865_vm1, %v6652_v39, -inf }
 0x10c   : > { %909 = vmax.xlane.f32.xlu1 %v908_v45  ;;  %v709_v45 = vld [vmem:[%s6408_s1 + $0x60] sm:$0xff] }
 0x10d   : > { %v964_v59 = vpop.xlane.xlu2 %963 }
 0x10e   : > { %v1010_v62 = vsub.f32 %v964_v59, %v6477_v29 }
 0x10f   : > { %v868_v13 = vpop.xlane.xlu0 %867 }
 0x110   : > { %v1026_v50 = vmul.f32 1.442695, %v1010_v62  ;;  %v914_v32 = vsub.f32 %v6483_v31, %v868_v13 }
 0x112   : > { %5940 = vpow2.f32 %v1026_v50  ;;  %v930_v42 = vmul.f32 1.442695, %v914_v32  ;;  %v6674_v32 = vadd.f32 %v6475_v28, %v6591_v18 }
 0x114   : > { %5942 = vpow2.f32 %v930_v42 }
 0x117   : > { %v967_v51 = vpop.xlane.xlu0 %966 }
 0x118   : > { %v6662_v19 = vpop.eup %5940  ;;  %v1011_v15 = vsub.f32 %v967_v51, %v6487_v33  ;;  %v899_v51 = vsel %vm865_vm1, %v6674_v32, -inf }
 0x119   : > { %5545 = vmatmul.msk.f32.vlgmr.msra.gmra.mxu2 %vm865_vm1, %v6662_v19 }
 0x11a   : > { %v6668_v34 = vpop.eup %5942  ;;  %v1028_v29 = vmul.f32 1.442695, %v1011_v15 }
 0x11b   : > { %v1684_v31 = vmul.f32 %v6668_v34, %v6611_v47  ;;  %v710_v47 = vld [vmem:[%s6408_s1 + $0x68] sm:$0xff] }
 0x11c   : > { %5944 = vpow2.f32 %v1028_v29  ;;  %1666 = vperm.xlu2 %5928, %v709_v45  }
 0x11d   : > { %5562 = vmatmul.msk.f32.vlgmr.msra.gmra.mxu3 %vm865_vm1, %v1684_v31  ;;  %v970_v33 = vpop.xlane.xlu1 %969 }
 0x11e   : > { %v1012_v42 = vsub.f32 %v970_v33, %v6500_v37 }
 0x11f   : > { %v871_v50 = vpop.xlane.xlu0 %870 }
 0x120   : > { %v1030_v59 = vmul.f32 1.442695, %v1012_v42  ;;  %v915_v15 = vsub.f32 %v6498_v36, %v871_v50  ;;  %900 = vmax.xlane.f32.xlu0 %v899_v51  ;;  %v995_v36 = vsel %vm865_vm1, %v6591_v18, inf }
 0x122   : > { %v6681_v62 = vpop.eup %5944  ;;  %v932_v13 = vmul.f32 1.442695, %v915_v15  ;;  %5946 = vpow2.f32 %v1030_v59 }
 0x123   : > { %5546 = vmatmul.msk.f32.gmra.mxu2 %vm865_vm1, %v6681_v62 }
 0x124   : > { %5948 = vpow2.f32 %v932_v13 }
 0x125   : > { %v874_v45 = vpop.xlane.xlu1 %873  ;;  %v973_v29 = vpop.xlane.xlu2 %972  ;;  %1671 = vperm.xlu1 %5927, %v710_v47  }
 0x126   : > { %v916_v37 = vsub.f32 %v6508_v40, %v874_v45  ;;  %v1013_v31 = vsub.f32 %v973_v29, %v6510_v41  ;;  %v1001_v45 = vsel %vm865_vm1, %v6634_v7, inf }
 0x127   : > { %v877_v33 = vpop.xlane.xlu0 %876 }
 0x128   : > { %v934_v42 = vmul.f32 1.442695, %v916_v37  ;;  %v1032_v50 = vmul.f32 1.442695, %v1013_v31  ;;  %996 = vmin.xlane.f32.xlu0 %v995_v36  ;;  %v6690_v51 = vpop.eup %5946  ;;  %v917_v15 = vsub.f32 %v6518_v44, %v877_v33 }
 0x12a   : > { %v6692_v59 = vpop.eup %5948  ;;  %5950 = vpow2.f32 %v934_v42  ;;  %v936_v47 = vmul.f32 1.442695, %v917_v15 }
 0x12b   : > { %5547 = vmatmul.msk.f32.gmra.mxu2 %vm865_vm1, %v6690_v51  ;;  %v1685_v40 = vmul.f32 %v6692_v59, %v6593_v20  ;;  %5952 = vpow2.f32 %v1032_v50 }
 0x12c   : > { %5954 = vpow2.f32 %v936_v47 }
 0x12d   : > { %5563 = vmatmul.msk.f32.gmra.mxu3 %vm865_vm1, %v1685_v40  ;;  %v976_v41 = vpop.xlane.xlu2 %975 }
 0x12e   : > { %v1014_v13 = vsub.f32 %v976_v41, %v6522_v46 }
 0x130   : > { %v6703_v29 = vpop.eup %5950  ;;  %v1034_v37 = vmul.f32 1.442695, %v1014_v13  ;;  %1002 = vmin.xlane.f32.xlu0 %v1001_v45 }
 0x131   : > { %v6705_v44 = vpop.eup %5952  ;;  %v1686_v31 = vmul.f32 %v6703_v29, %v6600_v35 }
 0x132   : > { %5956 = vpow2.f32 %v1034_v37  ;;  %v6714_v15 = vpop.eup %5954 }
 0x133   : > { %5548 = vmatmul.msk.f32.gmra.mxu2 %vm865_vm1, %v6705_v44  ;;  %v1687_v45 = vmul.f32 %v6714_v15, %v6636_v10 }
 0x135   : > { %5564 = vmatmul.msk.f32.gmra.mxu3 %vm865_vm1, %v1686_v31  ;;  %v880_v46 = vpop.xlane.xlu2 %879  ;;  %v979_v33 = vpop.xlane.xlu1 %978 }
 0x136   : > { %v918_v36 = vsub.f32 %v6528_v48, %v880_v46  ;;  %v1015_v42 = vsub.f32 %v979_v33, %v6530_v49  ;;  %v6723_v48 = vpop.f32.mrf.mxu0 }
 0x137   : > { %v883_v50 = vpop.xlane.xlu0 %882  ;;  %v6728_v37 = vadd.f32 %v6475_v28, %v6723_v48 }
 0x138   : > { %v938_v40 = vmul.f32 1.442695, %v918_v36  ;;  %v1036_v41 = vmul.f32 1.442695, %v1015_v42  ;;  %v6716_v47 = vpop.eup %5956  ;;  %v919_v13 = vsub.f32 %v6538_v52, %v883_v50  ;;  %v711_v36 = vld [vmem:[%s6408_s1 + $0x70] sm:$0xff] }
 0x13a   : > { %5958 = vpow2.f32 %v938_v40  ;;  %v940_v49 = vmul.f32 1.442695, %v919_v13 }
 0x13b   : > { %5549 = vmatmul.msk.f32.gmra.mxu2 %vm865_vm1, %v6716_v47  ;;  %5960 = vpow2.f32 %v1036_v41  ;;  %v911_v41 = vsel %vm865_vm1, %v6728_v37, -inf }
 0x13c   : > { %5962 = vpow2.f32 %v940_v49  ;;  %v712_v49 = vld [vmem:[%s6408_s1 + $0x78] sm:$0xff]  ;;  %s7034_s1 = scalar_lea.vmem %s9202_s23, %s5850_s30 }
 0x13d   : > { %5565 = vmatmul.msk.f32.gmra.mxu3 %vm865_vm1, %v1687_v45 }
 0x13f   : > { %v982_v31 = vpop.xlane.xlu0 %981  ;;  %v886_v46 = vpop.xlane.xlu1 %885 }
 0x140   : > { %v6730_v33 = vpop.eup %5958  ;;  %v1016_v52 = vsub.f32 %v982_v31, %v6542_v54  ;;  %v920_v40 = vsub.f32 %v6546_v55, %v886_v46 }
 0x141   : > { %v6734_v42 = vpop.eup %5960  ;;  %v1688_v28 = vmul.f32 %v6730_v33, %v6626_v57 }
 0x142   : > { %v1038_v50 = vmul.f32 1.442695, %v1016_v52  ;;  %v942_v54 = vmul.f32 1.442695, %v920_v40  ;;  %v6744_v45 = vpop.eup %5962  ;;  %v1004_v40 = vsel %vm865_vm1, %v6648_v38, inf }
 0x143   : > { %5550 = vmatmul.msk.f32.gmra.mxu2 %vm865_vm1, %v6734_v42  ;;  %v1689_v52 = vmul.f32 %v6744_v45, %v6632_v63 }
 0x144   : > { %5964 = vpow2.f32 %v1038_v50  ;;  %1676 = vperm.xlu0 %5929, %v711_v36   ;;  %v1007_v36 = vsel %vm865_vm1, %v6723_v48, inf }
 0x145   : > { %5566 = vmatmul.msk.f32.gmra.mxu3 %vm865_vm1, %v1688_v28  ;;  %912 = vmax.xlane.f32.xlu2 %v911_v41  ;;  %5966 = vpow2.f32 %v942_v54 }
 0x147   : > { %v985_v13 = vpop.xlane.xlu1 %984 }
 0x148   : > { %v1017_v55 = vsub.f32 %v985_v13, %v6552_v58 }
 0x14a   : > { %v6748_v31 = vpop.eup %5964  ;;  %v1040_v46 = vmul.f32 1.442695, %v1017_v55 }
 0x14b   : > { %5551 = vmatmul.msk.f32.gmra.mxu2 %vm865_vm1, %v6748_v31  ;;  %v6760_v28 = vpop.eup %5966 }
 0x14c   : > { %5968 = vpow2.f32 %v1040_v46  ;;  %1681 = vperm.xlu0 %5929, %v712_v49  }
 0x14d   : > { %5567 = vmatmul.msk.f32.gmra.mxu3 %vm865_vm1, %v1689_v52  ;;  %v988_v50 = vpop.xlane.xlu0 %987  ;;  %1008 = vmin.xlane.f32.xlu2 %v1007_v36 }
 0x14e   : > { %v1018_v58 = vsub.f32 %v988_v50, %v6560_v61  ;;  %v1690_v61 = vmul.f32 %v6760_v28, %v6646_v30 }
 0x14f   : > { %v889_v41 = vpop.xlane.xlu1 %888  ;;  %1005 = vmin.xlane.f32.xlu1 %v1004_v40 }
 0x150   : > { %v1042_v54 = vmul.f32 1.442695, %v1018_v58  ;;  %v921_v13 = vsub.f32 %v6558_v60, %v889_v41 }
 0x152   : > { %v6763_v55 = vpop.eup %5968  ;;  %v944_v49 = vmul.f32 1.442695, %v921_v13  ;;  %5970 = vpow2.f32 %v1042_v54 }
 0x153   : > { %5552 = vmatmul.msk.f32.gmra.mxu2 %vm865_vm1, %v6763_v55 }
 0x154   : > { %5972 = vpow2.f32 %v944_v49 }
 0x155   : > { %5568 = vmatmul.msk.f32.gmra.mxu3 %vm865_vm1, %v1690_v61 }
 0x157   : > { %v892_v46 = vpop.xlane.xlu1 %891 }
 0x158   : > { %v922_v52 = vsub.f32 %v6568_v0, %v892_v46  ;;  %v6771_v36 = vpop.eup %5970 }
 0x15a   : > { %v6773_v50 = vpop.eup %5972  ;;  %v946_v60 = vmul.f32 1.442695, %v922_v52 }
 0x15b   : > { %5553 = vmatmul.msk.f32.gmra.mxu2 %vm865_vm1, %v6771_v36  ;;  %v1691_v58 = vmul.f32 %v6773_v50, %v6644_v16 }
 0x15c   : > { %5974 = vpow2.f32 %v946_v60 }
 0x15d   : > { %5569 = vmatmul.msk.f32.gmra.mxu3 %vm865_vm1, %v1691_v58  ;;  %v994_v40 = vpop.xlane.xlu2 %993 }
 0x15f   : > { %v895_v41 = vpop.xlane.xlu1 %894 }
 0x160   : > { %v923_v54 = vsub.f32 %v6576_v8, %v895_v41 }
 0x162   : > { %v6781_v13 = vpop.eup %5974  ;;  %v948_v0 = vmul.f32 1.442695, %v923_v54  ;;  %v1020_v54 = vsub.f32 %v994_v40, %v6578_v9  ;;  %v1814_v9 = vld [vmem:[%s9195_s29 + $0x8] sm:$0xff] }
 0x163   : > { %v1692_v49 = vmul.f32 %v6781_v13, %v6654_v43  ;;  %5892 = vmatpush.msrb.mxu3 %v1814_v9  ;;  %1829 = vmatpush.msrb.mxu2 %v1814_v9 }
 0x164   : > { %5976 = vpow2.f32 %v948_v0 }
 0x165   : > { %5570 = vmatmul.msk.f32.gmra.mxu3 %vm865_vm1, %v1692_v49  ;;  %v898_v61 = vpop.xlane.xlu2 %897  ;;  %v1046_v49 = vmul.f32 1.442695, %v1020_v54 }
 0x166   : > { %v924_v46 = vsub.f32 %v6587_v14, %v898_v61  ;;  %v6798_v61 = vpop.permute.xlu0 %1656 }
 0x167   : > { %v991_v52 = vpop.xlane.xlu1 %990  ;;  %9194 = vst [vmem:[#allocation15_spill] sm:$0xff] %v6798_v61 }
 0x168   : > { %v950_v60 = vmul.f32 1.442695, %v924_v46  ;;  %v1019_v58 = vsub.f32 %v991_v52, %v6570_v1 }
 0x16a   : > { %v6788_v16 = vpop.eup %5976  ;;  %5978 = vpow2.f32 %v950_v60  ;;  %v1044_v8 = vmul.f32 1.442695, %v1019_v58 }
 0x16b   : > { %v1693_v41 = vmul.f32 %v6788_v16, %v6660_v17 }
 0x16c   : > { %5980 = vpow2.f32 %v1044_v8 }
 0x16d   : > { %5571 = vmatmul.msk.f32.gmra.mxu3 %vm865_vm1, %v1693_v41  ;;  %5982 = vpow2.f32 %v1046_v49 }
 0x16e   : > { %v6812_v46 = vpop.permute.xlu0 %1661 }
 0x16f   : > { %v904_v52 = vpop.xlane.xlu2 %903 }
 0x170   : > { %v6794_v0 = vpop.eup %5978  ;;  %v926_v41 = vsub.f32 %v6624_v56, %v904_v52 }
 0x171   : > { %v1694_v1 = vmul.f32 %v6794_v0, %v6798_v61  ;;  %v1000_v61 = vpop.xlane.xlu1 %999 }
 0x172   : > { %v6796_v14 = vpop.eup %5980  ;;  %v954_v49 = vmul.f32 1.442695, %v926_v41  ;;  %v1022_v30 = vsub.f32 %v1000_v61, %v6616_v53 }
 0x173   : > { %5554 = vmatmul.msk.f32.gmra.mxu2 %vm865_vm1, %v6796_v14  ;;  %v6808_v40 = vpop.eup %5982 }
 0x174   : > { %v1050_v56 = vmul.f32 1.442695, %v1022_v30 }
 0x175   : > { %5572 = vmatmul.msk.f32.gmra.mxu3 %vm865_vm1, %v1694_v1 }
 0x177   : > { %v907_v54 = vpop.xlane.xlu2 %906 }
 0x17b   : > { %5555 = vmatmul.msk.f32.gmra.mxu2 %vm865_vm1, %v6808_v40 }
 0x193   : > { %v901_v60 = vpop.xlane.xlu0 %900 }
 0x194   : > { %v925_v58 = vsub.f32 %v6674_v32, %v901_v60  ;;  %v927_v32 = vsub.f32 %v6640_v12, %v907_v54  ;;  %v6824_v60 = vpop.permute.xlu2 %1666  ;;  %v1813_v54 = vld [vmem:[%s9195_s29] sm:$0xff] }
 0x195   : > { %5893 = vmatpush.msrb.mxu3 %v1813_v54  ;;  %1830 = vmatpush.msrb.mxu2 %v1813_v54 }
 0x196   : > { %v952_v8 = vmul.f32 1.442695, %v925_v58  ;;  %v956_v52 = vmul.f32 1.442695, %v927_v32  ;;  %v910_v58 = vpop.xlane.xlu1 %909 }
 0x197   : > { %v928_v61 = vsub.f32 %v6652_v39, %v910_v58 }
 0x198   : > { %5984 = vpow2.f32 %v952_v8 }
 0x199   : > { %5986 = vpow2.f32 %v954_v49  ;;  %v958_v12 = vmul.f32 1.442695, %v928_v61 }
 0x19b   : > { %v997_v1 = vpop.xlane.xlu0 %996 }
 0x19c   : > { %v1021_v9 = vsub.f32 %v997_v1, %v6591_v18 }
 0x19e   : > { %v6817_v17 = vpop.eup %5984  ;;  %v1048_v43 = vmul.f32 1.442695, %v1021_v9  ;;  %v6834_v30 = vpop.permute.xlu1 %1671 }
 0x19f   : > { %v1695_v63 = vmul.f32 %v6817_v17, %v6812_v46  ;;  %v6826_v18 = vpop.eup %5986  ;;  %9196 = vst [vmem:[#allocation16_spill] sm:$0xff] %v6834_v30 }
 0x1a0   : > { %5988 = vpow2.f32 %v1048_v43  ;;  %v1696_v53 = vmul.f32 %v6826_v18, %v6824_v60 }
 0x1a1   : > { %5573 = vmatmul.msk.f32.gmra.mxu3 %vm865_vm1, %v1695_v63  ;;  %5990 = vpow2.f32 %v1050_v56 }
 0x1a2   : > { %5992 = vpow2.f32 %v956_v52 }
 0x1a3   : > { %v1003_v8 = vpop.xlane.xlu0 %1002  ;;  %5994 = vpow2.f32 %v958_v12 }
 0x1a4   : > { %v1023_v63 = vsub.f32 %v1003_v8, %v6634_v7  ;;  %v6854_v8 = vpop.f32.mrf.mxu3 }
 0x1a6   : > { %v5989_v41 = vpop.eup %5988  ;;  %v1052_v43 = vmul.f32 1.442695, %v1023_v63 }
 0x1a7   : > { %5556 = vmatmul.msk.f32.gmra.mxu2 %vm865_vm1, %v5989_v41  ;;  %v5991_v49 = vpop.eup %5990 }
 0x1a8   : > { %v6839_v1 = vpop.eup %5992  ;;  %5996 = vpow2.f32 %v1052_v43 }
 0x1a9   : > { %5574 = vmatmul.msk.f32.gmra.mxu3 %vm865_vm1, %v1696_v53  ;;  %v1697_v39 = vmul.f32 %v6839_v1, %v6834_v30  ;;  %v6845_v7 = vpop.eup %5994 }
 0x1ae   : > { %v5997_v9 = vpop.eup %5996 }
 0x1af   : > { %5557 = vmatmul.msk.f32.gmra.mxu2 %vm865_vm1, %v5991_v49 }
 0x1b0   : > { %v6857_v12 = vpop.f32.mrf.mxu3 }
 0x1b1   : > { %5575 = vmatmul.msk.f32.gmra.mxu3 %vm865_vm1, %v1697_v39 }
 0x1b6   : > { %v6847_v32 = vpop.permute.xlu0 %1676 }
 0x1b7   : > { %9197 = vst [vmem:[#allocation17_spill] sm:$0xff] %v6847_v32  ;;  %v1698_v56 = vmul.f32 %v6845_v7, %v6847_v32  ;;  %5558 = vmatmul.msk.f32.gmra.mxu2 %vm865_vm1, %v5997_v9 }
 0x1b8   : > { %v913_v52 = vpop.xlane.xlu2 %912 }
 0x1b9   : > { %v929_v58 = vsub.f32 %v6728_v37, %v913_v52  ;;  %5576 = vmatmul.msk.f32.gmra.mxu3 %vm865_vm1, %v1698_v56 }
 0x1bb   : > { %v960_v53 = vmul.f32 1.442695, %v929_v58 }
 0x1bd   : > { %5998 = vpow2.f32 %v960_v53  ;;  %v6870_v53 = vpop.f32.mrf.mxu2 }
 0x1be   : > { %v6861_v39 = vpop.permute.xlu0 %1681 }
 0x1bf   : > { %9198 = vst [vmem:[#allocation18_spill] sm:$0xff] %v6861_v39 }
 0x1c0   : > { %v1009_v61 = vpop.xlane.xlu2 %1008 }
 0x1c1   : > { %v1025_v63 = vsub.f32 %v1009_v61, %v6723_v48  ;;  %v6867_v48 = vpop.f32.mrf.mxu3 }
 0x1c2   : > { %v1006_v43 = vpop.xlane.xlu1 %1005 }
 0x1c3   : > { %v6859_v54 = vpop.eup %5998  ;;  %v1056_v32 = vmul.f32 1.442695, %v1025_v63  ;;  %v1024_v30 = vsub.f32 %v1006_v43, %v6648_v38 }
 0x1c4   : > { %v1699_v37 = vmul.f32 %v6859_v54, %v6861_v39 }
 0x1c5   : > { %6000 = vpow2.f32 %v1056_v32  ;;  %v1054_v56 = vmul.f32 1.442695, %v1024_v30  ;;  %v6877_v38 = vpop.f32.mrf.mxu2 }
 0x1c6   : > { %5577 = vmatmul.msk.f32.gmra.mxu3 %vm865_vm1, %v1699_v37 }
 0x1c7   : > { %6002 = vpow2.f32 %v1054_v56 }
 0x1c9   : > { %v6879_v30 = vpop.f32.mrf.mxu3 }
 0x1cb   : > { %v6001_v52 = vpop.eup %6000 }
 0x1cc   : > { %5511 = vmatpush.xpose.msk.msra.mxu1 %vm865_vm1, %v6001_v52 }
 0x1cd   : > { %v6003_v58 = vpop.eup %6002 }
 0x1ce   : > { %5559 = vmatmul.msk.f32.gmra.mxu2 %vm865_vm1, %v6003_v58  ;;  %5586 = vmatmul.msk.f32.vlgmr.msrb.gmra.mxu3 %vm731_vm0, %v6438_v21  ;;  %v6890_v21 = vpop.f32.mrf.mxu2 }
 0x1d0   : > { %5512 = vmatpush.xpose.msk.msra.mxu1 %vm865_vm1, %v6003_v58 }
 0x1d4   : > { %5513 = vmatpush.xpose.msk.msra.mxu1 %vm865_vm1, %v5997_v9  ;;  %v6892_v9 = vpop.f32.mrf.mxu3 }
 0x1d6   : > { %5560 = vmatmul.msk.f32.gmra.mxu2 %vm865_vm1, %v6001_v52  ;;  %5587 = vmatmul.msk.f32.gmra.mxu3 %vm731_vm0, %v6443_v22 }
 0x1d8   : > { %5514 = vmatpush.xpose.msk.msra.mxu1 %vm865_vm1, %v5991_v49 }
 0x1dc   : > { %5515 = vmatpush.xpose.msk.msra.mxu1 %vm865_vm1, %v5989_v41  ;;  %v6906_v22 = vpop.f32.mrf.mxu3 }
 0x1de   : > { %5578 = vmatmul.msk.f32.vlgmr.msrb.gmra.mxu2 %vm731_vm0, %v6382_v2  ;;  %5588 = vmatmul.msk.f32.gmra.mxu3 %vm731_vm0, %v6448_v23  ;;  %v6904_v2 = vpop.f32.mrf.mxu2 }
 0x1e0   : > { %5516 = vmatpush.xpose.msk.msra.mxu1 %vm865_vm1, %v6808_v40 }
 0x1e4   : > { %5517 = vmatpush.xpose.msk.msra.mxu1 %vm865_vm1, %v6796_v14  ;;  %v6918_v23 = vpop.f32.mrf.mxu3 }
 0x1e6   : > { %5579 = vmatmul.msk.f32.gmra.mxu2 %vm731_vm0, %v6387_v3  ;;  %5589 = vmatmul.msk.f32.gmra.mxu3 %vm731_vm0, %v6453_v24  ;;  %v6916_v3 = vpop.f32.mrf.mxu2 }
 0x1e8   : > { %5518 = vmatpush.xpose.msk.msra.mxu1 %vm865_vm1, %v6771_v36 }
 0x1ec   : > { %5519 = vmatpush.xpose.msk.msra.mxu1 %vm865_vm1, %v6763_v55  ;;  %v6932_v24 = vpop.f32.mrf.mxu3 }
 0x1ee   : > { %5580 = vmatmul.msk.f32.gmra.mxu2 %vm731_vm0, %v6392_v4  ;;  %5590 = vmatmul.msk.f32.gmra.mxu3 %vm731_vm0, %v6458_v25  ;;  %v6930_v4 = vpop.f32.mrf.mxu2 }
 0x1f0   : > { %5520 = vmatpush.xpose.msk.msra.mxu1 %vm865_vm1, %v6748_v31 }
 0x1f4   : > { %5521 = vmatpush.xpose.msk.msra.mxu1 %vm865_vm1, %v6734_v42 }
 0x1f6   : > { %5581 = vmatmul.msk.f32.gmra.mxu2 %vm731_vm0, %v6397_v5  ;;  %5591 = vmatmul.msk.f32.gmra.mxu3 %vm731_vm0, %v6463_v26  ;;  %v9199_v5 = vld [vmem:[#allocation4_spill] sm:$0xff]  ;;  %v6946_v25 = vpop.f32.mrf.mxu2  ;;  %v6948_v26 = vpop.f32.mrf.mxu3 }
 0x1f8   : > { %5522 = vmatpush.xpose.msk.msra.mxu1 %vm865_vm1, %v6716_v47 }
 0x1fc   : > { %5523 = vmatpush.xpose.msk.msra.mxu1 %vm865_vm1, %v6705_v44 }
 0x1fe   : > { %5582 = vmatmul.msk.f32.gmra.mxu2 %vm731_vm0, %v6402_v6  ;;  %5592 = vmatmul.msk.f32.gmra.mxu3 %vm731_vm0, %v6468_v27  ;;  %v9200_v6 = vld [vmem:[#allocation2_spill] sm:$0xff]  ;;  %v6956_v27 = vpop.f32.mrf.mxu2 }
 0x200   : > { %5524 = vmatpush.xpose.msk.msra.mxu1 %vm865_vm1, %v6690_v51 }
 0x204   : > { %5525 = vmatpush.xpose.msk.msra.mxu1 %vm865_vm1, %v6681_v62  ;;  %v6958_v62 = vpop.f32.mrf.mxu3 }
 0x206   : > { %5583 = vmatmul.msk.f32.gmra.mxu2 %vm731_vm0, %v6416_v11  ;;  %5593 = vmatmul.msk.f32.gmra.mxu3 %vm731_vm0, %v9199_v5  ;;  %v9201_v11 = vld [vmem:[#allocation3_spill] sm:$0xff]  ;;  %v6964_v51 = vpop.f32.mrf.mxu2 }
 0x208   : > { %5526 = vmatpush.xpose.msk.msra.mxu1 %vm865_vm1, %v6662_v19 }
 0x20b   : > { %5527 = vmatmul.msk.f32.vlgmr.msra.gmra.mxu1 %vm865_vm1, %v6668_v34 }
 0x20c   : > { %v6968_v19 = vpop.f32.mrf.mxu3 }
 0x20e   : > { %5584 = vmatmul.msk.f32.gmra.mxu2 %vm731_vm0, %v9200_v6  ;;  %v1583_v34 = vpop.f32.mrf.mxu2 }
 0x213   : > { %5528 = vmatmul.msk.f32.gmra.mxu1 %vm865_vm1, %v6692_v59 }
 0x216   : > { %5585 = vmatmul.msk.f32.gmra.mxu2 %vm731_vm0, %v9201_v11  ;;  %v1586_v59 = vpop.f32.mrf.mxu2 }
 0x21b   : > { %5529 = vmatmul.msk.f32.gmra.mxu1 %vm865_vm1, %v6703_v29 }
 0x223   : > { %5530 = vmatmul.msk.f32.gmra.mxu1 %vm865_vm1, %v6714_v15 }
 0x224   : > { %v6972_v44 = vpop.f32.mrf.mxu3 }
 0x22a   : > { %v1589_v42 = vpop.f32.mrf.mxu2 }
 0x22b   : > { %5531 = vmatmul.msk.f32.gmra.mxu1 %vm865_vm1, %v6730_v33 }
 0x22c   : > { %v6976_v47 = vpop.f32.mrf.mxu3 }
 0x232   : > { %v1592_v29 = vpop.f32.mrf.mxu2 }
 0x233   : > { %5532 = vmatmul.msk.f32.gmra.mxu1 %vm865_vm1, %v6744_v45 }
 0x234   : > { %v6980_v31 = vpop.f32.mrf.mxu3 }
 0x23a   : > { %v1595_v15 = vpop.f32.mrf.mxu2 }
 0x23b   : > { %5533 = vmatmul.msk.f32.gmra.mxu1 %vm865_vm1, %v6760_v28 }
 0x23c   : > { %v6984_v55 = vpop.f32.mrf.mxu3 }
 0x243   : > { %5534 = vmatmul.msk.f32.gmra.mxu1 %vm865_vm1, %v6773_v50 }
 0x249   : > { %v6988_v33 = vpop.f32.mrf.mxu3 }
 0x24b   : > { %5535 = vmatmul.msk.f32.gmra.mxu1 %vm865_vm1, %v6781_v13 }
 0x251   : > { %v1598_v36 = vpop.f32.mrf.mxu2  ;;  %v1856_v45 = vpop.f32.mrf.mxu3 }
 0x253   : > { %5536 = vmatmul.msk.f32.gmra.mxu1 %vm865_vm1, %v6788_v16 }
 0x259   : > { %v1601_v14 = vpop.f32.mrf.mxu2  ;;  %v1859_v40 = vpop.f32.mrf.mxu3 }
 0x25b   : > { %5537 = vmatmul.msk.f32.gmra.mxu1 %vm865_vm1, %v6794_v0 }
 0x261   : > { %v6996_v28 = vpop.f32.mrf.mxu2  ;;  %v1862_v41 = vpop.f32.mrf.mxu3 }
 0x263   : > { %5538 = vmatmul.msk.f32.gmra.mxu1 %vm865_vm1, %v6817_v17 }
 0x269   : > { %v7000_v50 = vpop.f32.mrf.mxu2  ;;  %v1865_v49 = vpop.f32.mrf.mxu3 }
 0x26b   : > { %5539 = vmatmul.msk.f32.gmra.mxu1 %vm865_vm1, %v6826_v18 }
 0x271   : > { %v7004_v13 = vpop.f32.mrf.mxu2  ;;  %v1868_v16 = vpop.f32.mrf.mxu3 }
 0x272   : > { %v1892_v58 = vmul.f32 %v1868_v16, %v1592_v29  ;;  %v1888_v29 = vmul.f32 %v1856_v45, %v6964_v51 }
 0x273   : > { %5540 = vmatmul.msk.f32.gmra.mxu1 %vm865_vm1, %v6839_v1 }
 0x279   : > { %v1841_v32 = vpop.f32.mrf.mxu2  ;;  %v1871_v0 = vpop.f32.mrf.mxu3 }
 0x27a   : > { %v1893_v1 = vmul.f32 %v1871_v0, %v1595_v15 }
 0x27b   : > { %5541 = vmatmul.msk.f32.gmra.mxu1 %vm865_vm1, %v6845_v7 }
 0x281   : > { %v1844_v61 = vpop.f32.mrf.mxu2  ;;  %v1874_v63 = vpop.f32.mrf.mxu3 }
 0x282   : > { %v1894_v52 = vmul.f32 %v1874_v63, %v1598_v36 }
 0x283   : > { %5542 = vmatmul.msk.f32.gmra.mxu1 %vm865_vm1, %v6859_v54  ;;  %v1891_v54 = vmul.f32 %v1865_v49, %v1589_v42 }
 0x288   : > { %v1171_v17 = vpop.f32.mrf.mxu1 }
 0x289   : > { %v7012_v43 = vmax.f32 %v1171_v17, 1e-37  ;;  %v1847_v18 = vpop.f32.mrf.mxu2  ;;  %v1877_v37 = vpop.f32.mrf.mxu3 }
 0x28a   : > { %v1895_v56 = vmul.f32 %v1877_v37, %v1601_v14  ;;  %v1890_v14 = vmul.f32 %v1862_v41, %v1586_v59  ;;  %v1889_v37 = vmul.f32 %v1859_v40, %v1583_v34  ;;  %v1885_v51 = vmul.f32 %v1847_v18, %v6930_v4 }
 0x28b   : > { %6004 = vrcp.f32 %v7012_v43  ;;  %v1246_v41 = vand.u32 2147483648, %v7012_v43  ;;  %vm1240_vm7 = vweird.f32 %v7012_v43  ;;  %v1244_v4 = vand.u32 2147483647, %v7012_v43 }
 0x28c   : > { %1896 = vmatpush.msra.mxu3 %v1895_v56 }
 0x28d   : > { %vm1245_vm9 = vcmp.eq.f32.partialorder %v1244_v4, 8.507059e+37 }
 0x28e   : > { %1897 = vmatpush.msra.mxu3 %v1894_v52  ;;  %v1883_v52 = vmul.f32 %v1841_v32, %v6904_v2  ;;  %v1881_v2 = vmul.f32 %v7000_v50, %v6877_v38 }
 0x290   : > { %v1174_v5 = vpop.f32.mrf.mxu1  ;;  %1898 = vmatpush.msra.mxu3 %v1893_v1  ;;  %v5854_v1 = vld [vmem:[%s7034_s1] sm:$0xff]  }
 0x291   : > { %v6005_v7 = vpop.eup %6004  ;;  %v7015_v6 = vmax.f32 %v1174_v5, 1e-37  ;;  %v1850_v11 = vpop.f32.mrf.mxu2  ;;  %v1882_v5 = vmul.f32 %v7004_v13, %v6890_v21 }
 0x292   : > { %1899 = vmatpush.msra.mxu3 %v1892_v58  ;;  %v1236_v17 = vmul.f32 %v6005_v7, %v7012_v43  ;;  %v1886_v34 = vmul.f32 %v1850_v11, %v6946_v25  ;;  %vm1241_vm6 = vweird.f32 %v6005_v7  ;;  %v1247_v11 = vor.u32 1.1754944e-38, %v1246_v41 }
 0x293   : > { %6006 = vrcp.f32 %v7015_v6  ;;  %vm1242_vm8 = vmor %vm1240_vm7, %vm1241_vm6  ;;  %v7052_v43 = vunpack.c.l.bf16 %v5854_v1  ;;  %v1261_v21 = vand.u32 2147483648, %v7015_v6  ;;  %vm1255_vm11 = vweird.f32 %v7015_v6 }
 0x294   : > { %1900 = vmatpush.msra.mxu3 %v1891_v54  ;;  %v1237_v15 = vsub.f32 1.0, %v1236_v17  ;;  %v1259_v38 = vand.u32 2147483647, %v7015_v6 }
 0x296   : > { %1901 = vmatpush.msra.mxu3 %v1890_v14  ;;  %v1238_v63 = vmul.f32 %v6005_v7, %v1237_v15  ;;  %vm1260_vm13 = vcmp.eq.f32.partialorder %v1259_v38, 8.507059e+37 }
 0x298   : > { %v1177_v36 = vpop.f32.mrf.mxu1  ;;  %1902 = vmatpush.msra.mxu3 %v1889_v37  ;;  %v1239_v45 = vadd.f32 %v6005_v7, %v1238_v63 }
 0x299   : > { %v7020_v16 = vpop.eup %6006  ;;  %v7022_v0 = vmax.f32 %v1177_v36, 1e-37  ;;  %v1853_v42 = vpop.f32.mrf.mxu2  ;;  %v9203_v36 = vld [vmem:[#allocation9_spill] sm:$0xff] }
 0x29a   : > { %v1887_v49 = vmul.f32 %v1853_v42, %v6956_v27  ;;  %1903 = vmatpush.msra.mxu3 %v1888_v29  ;;  %v1251_v59 = vmul.f32 %v7020_v16, %v7015_v6  ;;  %v1884_v27 = vmul.f32 %v1844_v61, %v6916_v3  ;;  %v1243_v61 = vsel %vm1242_vm8, %v6005_v7, %v1239_v45 }
 0x29b   : > { %6008 = vrcp.f32 %v7022_v0  ;;  %v1248_v32 = vsel %vm1245_vm9, %v1247_v11, %v1243_v61  ;;  %vm1256_vm10 = vweird.f32 %v7020_v16  ;;  %v1880_v7 = vmul.f32 %v6996_v28, %v6870_v53 }
 0x29c   : > { %1904 = vmatpush.msra.mxu3 %v1887_v49  ;;  %v1252_v40 = vsub.f32 1.0, %v1251_v59  ;;  %v1507_v15 = vmul.f32 %v7052_v43, %v1248_v32  ;;  %vm1257_vm12 = vmor %vm1255_vm11, %vm1256_vm10  ;;  %v1262_v29 = vor.u32 1.1754944e-38, %v1261_v21  ;;  %v7072_v42 = vunpack.c.h.bf16 %v5854_v1 }
 0x29d   : > { %vm1270_vm15 = vweird.f32 %v7022_v0 }
 0x29e   : > { %1905 = vmatpush.msra.mxu3 %v1886_v34  ;;  %v1253_v58 = vmul.f32 %v7020_v16, %v1252_v40  ;;  %9204 = vst [vmem:[#allocation4_spill] sm:$0xff] %v7072_v42  ;;  %v1276_v34 = vand.u32 2147483648, %v7022_v0  ;;  %v1274_v40 = vand.u32 2147483647, %v7022_v0 }
 0x2a0   : > { %v1180_v56 = vpop.f32.mrf.mxu1  ;;  %1906 = vmatpush.msra.mxu3 %v1885_v51  ;;  %v1254_v17 = vadd.f32 %v7020_v16, %v1253_v58  ;;  %vm1275_vm2 = vcmp.eq.f32.partialorder %v1274_v40, 8.507059e+37 }
 0x2a1   : > { %v7038_v25 = vpop.eup %6008  ;;  %v7042_v18 = vmax.f32 %v1180_v56, 1e-37 }
 0x2a2   : > { %1907 = vmatpush.msra.mxu3 %v1884_v27  ;;  %v1266_v3 = vmul.f32 %v7038_v25, %v7022_v0  ;;  %v1258_v53 = vsel %vm1257_vm12, %v7020_v16, %v1254_v17  ;;  %vm1271_vm14 = vweird.f32 %v7038_v25  ;;  %v5885_v27 = vld [vmem:[%s7034_s1 + $0x8] sm:$0xff]  }
 0x2a3   : > { %6010 = vrcp.f32 %v7042_v18  ;;  %v1263_v6 = vsel %vm1260_vm13, %v1262_v29, %v1258_v53  ;;  %vm1272_vm0 = vmor %vm1270_vm15, %vm1271_vm14  ;;  %v7086_v1 = vunpack.c.l.bf16 %v5885_v27  ;;  %v1291_v0 = vand.u32 2147483648, %v7042_v18 }
 0x2a4   : > { %1908 = vmatpush.msra.mxu3 %v1883_v52  ;;  %v1267_v54 = vsub.f32 1.0, %v1266_v3  ;;  %v1508_v45 = vmul.f32 %v7072_v42, %v1263_v6  ;;  %v1277_v52 = vor.u32 1.1754944e-38, %v1276_v34  ;;  %vm1285_vm4 = vweird.f32 %v7042_v18 }
 0x2a5   : > { %9205 = vst [vmem:[#allocation2_spill] sm:$0xff] %v7086_v1  ;;  %v7096_v21 = vunpack.c.h.bf16 %v5885_v27 }
 0x2a6   : > { %1909 = vmatpush.msra.mxu3 %v1882_v5  ;;  %v1268_v28 = vmul.f32 %v7038_v25, %v1267_v54 }
 0x2a7   : > { %9206 = vst [vmem:[#allocation3_spill] sm:$0xff] %v7096_v21 }
 0x2a8   : > { %v1183_v14 = vpop.f32.mrf.mxu1  ;;  %1910 = vmatpush.msra.mxu3 %v1881_v2  ;;  %v1269_v63 = vadd.f32 %v7038_v25, %v1268_v28 }
 0x2a9   : > { %v6011_v13 = vpop.eup %6010  ;;  %v7061_v37 = vmax.f32 %v1183_v14, 1e-37  ;;  %v1292_v14 = vor.u32 1.1754944e-38, %v1291_v0 }
 0x2aa   : > { %1911 = vmatpush.msra.mxu3 %v1880_v7  ;;  %v1281_v50 = vmul.f32 %v6011_v13, %v7042_v18  ;;  %v1273_v56 = vsel %vm1272_vm0, %v7038_v25, %v1269_v63  ;;  %vm1286_vm3 = vweird.f32 %v6011_v13  ;;  %v1289_v25 = vand.u32 2147483647, %v7042_v18 }
 0x2ab   : > { %6012 = vrcp.f32 %v7061_v37  ;;  %1912 = vmatmul.f32.vlgmr.msra.gmra.mxu3 %v1507_v15  ;;  %v1278_v3 = vsel %vm1275_vm2, %v1277_v52, %v1273_v56  ;;  %vm1287_vm6 = vmor %vm1285_vm4, %vm1286_vm3  ;;  %v1306_v18 = vand.u32 2147483648, %v7061_v37  ;;  %vm1300_vm9 = vweird.f32 %v7061_v37 }
 0x2ac   : > { %5910 = vmatpush.msk.msrb.mxu3 %vm1535_vm5, %v9203_v36  ;;  %v1282_v49 = vsub.f32 1.0, %v1281_v50  ;;  %v1509_v32 = vmul.f32 %v7086_v1, %v1278_v3  ;;  %vm1290_vm7 = vcmp.eq.f32.partialorder %v1289_v25, 8.507059e+37 }
 0x2ae   : > { %v1283_v4 = vmul.f32 %v6011_v13, %v1282_v49  ;;  %v5886_v49 = vld [vmem:[%s7034_s1 + $0x10] sm:$0xff]  }
 0x2af   : > { %v7107_v40 = vunpack.c.l.bf16 %v5886_v49  ;;  %v7117_v25 = vunpack.c.h.bf16 %v5886_v49 }
 0x2b0   : > { %v1186_v59 = vpop.f32.mrf.mxu1  ;;  %v1284_v58 = vadd.f32 %v6011_v13, %v1283_v4 }
 0x2b1   : > { %v6013_v16 = vpop.eup %6012  ;;  %v7077_v51 = vmax.f32 %v1186_v59, 1e-37  ;;  %9207 = vst [vmem:[#allocation9_spill] sm:$0xff] %v7107_v40 }
 0x2b2   : > { %v1296_v41 = vmul.f32 %v6013_v16, %v7061_v37  ;;  %v1288_v17 = vsel %vm1287_vm6, %v6011_v13, %v1284_v58  ;;  %vm1301_vm8 = vweird.f32 %v6013_v16  ;;  %v1304_v13 = vand.u32 2147483647, %v7061_v37  ;;  %9208 = vst [vmem:[#allocation19_spill] sm:$0xff] %v7117_v25 }
 0x2b3   : > { %6014 = vrcp.f32 %v7077_v51  ;;  %1915 = vmatmul.f32.gmra.mxu3 %v1508_v45  ;;  %v1293_v15 = vsel %vm1290_vm7, %v1292_v14, %v1288_v17  ;;  %vm1302_vm10 = vmor %vm1300_vm9, %vm1301_vm8  ;;  %v1307_v45 = vor.u32 1.1754944e-38, %v1306_v18  ;;  %v1321_v37 = vand.u32 2147483648, %v7077_v51 }
 0x2b4   : > { %v1297_v61 = vsub.f32 1.0, %v1296_v41  ;;  %v1510_v6 = vmul.f32 %v7096_v21, %v1293_v15  ;;  %vm1305_vm11 = vcmp.eq.f32.partialorder %v1304_v13, 8.507059e+37  ;;  %vm1315_vm13 = vweird.f32 %v7077_v51 }
 0x2b6   : > { %v1298_v7 = vmul.f32 %v6013_v16, %v1297_v61 }
 0x2b8   : > { %v1189_v5 = vpop.f32.mrf.mxu1  ;;  %v1299_v50 = vadd.f32 %v6013_v16, %v1298_v7 }
 0x2b9   : > { %v6015_v11 = vpop.eup %6014  ;;  %v7089_v2 = vmax.f32 %v1189_v5, 1e-37 }
 0x2ba   : > { %v1311_v54 = vmul.f32 %v6015_v11, %v7077_v51  ;;  %v1303_v59 = vsel %vm1302_vm10, %v6013_v16, %v1299_v50  ;;  %vm1316_vm12 = vweird.f32 %v6015_v11  ;;  %v1319_v16 = vand.u32 2147483647, %v7077_v51 }
 0x2bb   : > { %6016 = vrcp.f32 %v7089_v2  ;;  %1918 = vmatmul.f32.gmra.mxu3 %v1509_v32  ;;  %v1308_v27 = vsel %vm1305_vm11, %v1307_v45, %v1303_v59  ;;  %vm1317_vm14 = vmor %vm1315_vm13, %vm1316_vm12  ;;  %v1322_v32 = vor.u32 1.1754944e-38, %v1321_v37  ;;  %v1336_v51 = vand.u32 2147483648, %v7089_v2 }
 0x2bc   : > { %v1312_v38 = vsub.f32 1.0, %v1311_v54  ;;  %v1511_v61 = vmul.f32 %v7107_v40, %v1308_v27  ;;  %vm1320_vm15 = vcmp.eq.f32.partialorder %v1319_v16, 8.507059e+37  ;;  %vm1330_vm2 = vweird.f32 %v7089_v2 }
 0x2bd   : > { %v1337_v49 = vor.u32 1.1754944e-38, %v1336_v51 }
 0x2be   : > { %v1313_v34 = vmul.f32 %v6015_v11, %v1312_v38 }
 0x2c0   : > { %v1192_v53 = vpop.f32.mrf.mxu1  ;;  %v1314_v56 = vadd.f32 %v6015_v11, %v1313_v34 }
 0x2c1   : > { %v6017_v28 = vpop.eup %6016  ;;  %v7099_v29 = vmax.f32 %v1192_v53, 1e-37  ;;  %v5887_v53 = vld [vmem:[%s7034_s1 + $0x18] sm:$0xff]  }
 0x2c2   : > { %v1326_v63 = vmul.f32 %v6017_v28, %v7089_v2  ;;  %v1318_v5 = vsel %vm1317_vm14, %v6015_v11, %v1314_v56  ;;  %vm1331_vm0 = vweird.f32 %v6017_v28  ;;  %v1334_v11 = vand.u32 2147483647, %v7089_v2 }
 0x2c3   : > { %6018 = vrcp.f32 %v7099_v29  ;;  %1921 = vmatmul.f32.gmra.mxu3 %v1510_v6  ;;  %v1323_v54 = vsel %vm1320_vm15, %v1322_v32, %v1318_v5  ;;  %vm1332_vm3 = vmor %vm1330_vm2, %vm1331_vm0  ;;  %v1351_v2 = vand.u32 2147483648, %v7099_v29  ;;  %vm1345_vm7 = vweird.f32 %v7099_v29 }
 0x2c4   : > { %v1327_v41 = vsub.f32 1.0, %v1326_v63  ;;  %v1512_v50 = vmul.f32 %v7117_v25, %v1323_v54  ;;  %vm1335_vm4 = vcmp.eq.f32.partialorder %v1334_v11, 8.507059e+37  ;;  %v7128_v63 = vunpack.c.l.bf16 %v5887_v53 }
 0x2c5   : > { %v7141_v5 = vunpack.c.h.bf16 %v5887_v53 }
 0x2c6   : > { %v1328_v0 = vmul.f32 %v6017_v28, %v1327_v41  ;;  %9209 = vst [vmem:[#allocation20_spill] sm:$0xff] %v7128_v63 }
 0x2c7   : > { %9210 = vst [vmem:[#allocation21_spill] sm:$0xff] %v7141_v5 }
 0x2c8   : > { %v1195_v4 = vpop.f32.mrf.mxu1  ;;  %v1329_v7 = vadd.f32 %v6017_v28, %v1328_v0 }
 0x2c9   : > { %v6019_v52 = vpop.eup %6018  ;;  %v7110_v3 = vmax.f32 %v1195_v4, 1e-37 }
 0x2ca   : > { %v1341_v58 = vmul.f32 %v6019_v52, %v7099_v29  ;;  %v1333_v6 = vsel %vm1332_vm3, %v6017_v28, %v1329_v7  ;;  %vm1346_vm6 = vweird.f32 %v6019_v52  ;;  %v1349_v28 = vand.u32 2147483647, %v7099_v29 }
 0x2cb   : > { %6020 = vrcp.f32 %v7110_v3  ;;  %1924 = vmatmul.f32.gmra.mxu3 %v1511_v61  ;;  %v1338_v59 = vsel %vm1335_vm4, %v1337_v49, %v1333_v6  ;;  %vm1347_vm8 = vmor %vm1345_vm7, %vm1346_vm6  ;;  %v1366_v29 = vand.u32 2147483648, %v7110_v3  ;;  %vm1360_vm11 = vweird.f32 %v7110_v3 }
 0x2cc   : > { %v1342_v17 = vsub.f32 1.0, %v1341_v58  ;;  %v1513_v4 = vmul.f32 %v7128_v63, %v1338_v59  ;;  %v1352_v58 = vor.u32 1.1754944e-38, %v1351_v2  ;;  %vm1350_vm9 = vcmp.eq.f32.partialorder %v1349_v28, 8.507059e+37  ;;  %v9213_v28 = vld [vmem:[#allocation7_spill] sm:$0xff] }
 0x2cd   : > { %v1367_v6 = vor.u32 1.1754944e-38, %v1366_v29 }
 0x2ce   : > { %v1343_v13 = vmul.f32 %v6019_v52, %v1342_v17 }
 0x2d0   : > { %v1198_v14 = vpop.f32.mrf.mxu1  ;;  %v1344_v45 = vadd.f32 %v6019_v52, %v1343_v13  ;;  %v9211_v13 = vld [vmem:[#allocation5_spill] sm:$0xff] }
 0x2d1   : > { %v6021_v15 = vpop.eup %6020  ;;  %v7120_v38 = vmax.f32 %v1198_v14, 1e-37  ;;  %v1975_v49 = vadd.s32 120, %v9211_v13  ;;  %v1974_v29 = vadd.s32 112, %v9211_v13 }
 0x2d2   : > { %v1356_v18 = vmul.f32 %v6021_v15, %v7110_v3  ;;  %v1348_v61 = vsel %vm1347_vm8, %v6019_v52, %v1344_v45  ;;  %vm1361_vm10 = vweird.f32 %v6021_v15  ;;  %v1364_v52 = vand.u32 2147483647, %v7110_v3 }
 0x2d3   : > { %6022 = vrcp.f32 %v7120_v38  ;;  %1927 = vmatmul.f32.gmra.mxu3 %v1512_v50  ;;  %v1353_v0 = vsel %vm1350_vm9, %v1352_v58, %v1348_v61  ;;  %vm1362_vm12 = vmor %vm1360_vm11, %vm1361_vm10  ;;  %v5888_v50 = vld [vmem:[%s7034_s1 + $0x20] sm:$0xff]   ;;  %v2101_v45 = vand.u32 31, %v1975_v49  ;;  %vm1375_vm0 = vweird.f32 %v7120_v38 }
 0x2d4   : > { %v1357_v34 = vsub.f32 1.0, %v1356_v18  ;;  %v1514_v51 = vmul.f32 %v7141_v5, %v1353_v0  ;;  %vm1365_vm13 = vcmp.eq.f32.partialorder %v1364_v52, 8.507059e+37  ;;  %v7157_v59 = vunpack.c.l.bf16 %v5888_v50 }
 0x2d5   : > { %vm2199_vm15 = vcmp.eq.s32.totalorder %v2101_v45, %v9213_v28  ;;  %v9101_v58 = vmov 1.0  }
 0x2d6   : > { %v1358_v16 = vmul.f32 %v6021_v15, %v1357_v34  ;;  %9212 = vst [vmem:[#allocation22_spill] sm:$0xff] %v7157_v59  ;;  %5610 = vmatpush.msk.msrb.mxu0 %vm2199_vm15, %v9101_v58  ;;  %5724 = vmatpush.msk.msra.mxu3 %vm2199_vm15, %v9101_v58 }
 0x2d8   : > { %v1201_v27 = vpop.f32.mrf.mxu1  ;;  %v1359_v54 = vadd.f32 %v6021_v15, %v1358_v16  ;;  %v1379_v16 = vand.u32 2147483647, %v7120_v38 }
 0x2d9   : > { %v7131_v41 = vpop.eup %6022  ;;  %v7133_v56 = vmax.f32 %v1201_v27, 1e-37 }
 0x2da   : > { %v1371_v37 = vmul.f32 %v7131_v41, %v7120_v38  ;;  %v1363_v53 = vsel %vm1362_vm12, %v6021_v15, %v1359_v54  ;;  %vm1376_vm14 = vweird.f32 %v7131_v41  ;;  %vm1380_vm3 = vcmp.eq.f32.partialorder %v1379_v16, 8.507059e+37 }
 0x2db   : > { %6024 = vrcp.f32 %v7133_v56  ;;  %1930 = vmatmul.f32.gmra.mxu3 %v1513_v4  ;;  %v1368_v34 = vsel %vm1365_vm13, %v1367_v6, %v1363_v53  ;;  %v1381_v4 = vand.u32 2147483648, %v7120_v38  ;;  %vm1377_vm2 = vmor %vm1375_vm0, %vm1376_vm14  ;;  %v7178_v38 = vunpack.c.h.bf16 %v5888_v50 }
 0x2dc   : > { %v1372_v32 = vsub.f32 1.0, %v1371_v37  ;;  %v1515_v61 = vmul.f32 %v7157_v59, %v1368_v34  ;;  %vm1390_vm6 = vweird.f32 %v7133_v56  ;;  %v1396_v49 = vand.u32 2147483648, %v7133_v56 }
 0x2dd   : > { %9214 = vst [vmem:[#allocation23_spill] sm:$0xff] %v7178_v38  ;;  %v1972_v16 = vadd.s32 96, %v9211_v13 }
 0x2de   : > { %v1373_v18 = vmul.f32 %v7131_v41, %v1372_v32 }
 0x2e0   : > { %v1204_v17 = vpop.f32.mrf.mxu1  ;;  %v1374_v27 = vadd.f32 %v7131_v41, %v1373_v18 }
 0x2e1   : > { %v7144_v7 = vpop.eup %6024  ;;  %v7146_v14 = vmax.f32 %v1204_v17, 1e-37  ;;  %v1382_v17 = vor.u32 1.1754944e-38, %v1381_v4 }
 0x2e2   : > { %v1386_v11 = vmul.f32 %v7144_v7, %v7133_v56  ;;  %v1378_v32 = vsel %vm1377_vm2, %v7131_v41, %v1374_v27  ;;  %vm1391_vm4 = vweird.f32 %v7144_v7  ;;  %v5889_v27 = vld [vmem:[%s7034_s1 + $0x28] sm:$0xff]  }
 0x2e3   : > { %6026 = vrcp.f32 %v7146_v14  ;;  %1933 = vmatmul.f32.gmra.mxu3 %v1514_v51  ;;  %v1973_v51 = vadd.s32 104, %v9211_v13  ;;  %v1383_v52 = vsel %vm1380_vm3, %v1382_v17, %v1378_v32  ;;  %vm1392_vm9 = vmor %vm1390_vm6, %vm1391_vm4  ;;  %v1971_v32 = vadd.s32 88, %v9211_v13 }
 0x2e4   : > { %v1387_v3 = vsub.f32 1.0, %v1386_v11  ;;  %v2094_v11 = vand.u32 31, %v1974_v29  ;;  %v1516_v45 = vmul.f32 %v7178_v38, %v1383_v52  ;;  %v2080_v17 = vand.u32 31, %v1972_v16 }
 0x2e5   : > { %v2087_v6 = vand.u32 31, %v1973_v51  ;;  %vm1405_vm12 = vweird.f32 %v7146_v14  ;;  %v1969_v16 = vadd.s32 72, %v9211_v13 }
 0x2e6   : > { %v1388_v54 = vmul.f32 %v7144_v7, %v1387_v3  ;;  %vm2198_vm7 = vcmp.eq.s32.totalorder %v2094_v11, %v9213_v28  ;;  %v1394_v3 = vand.u32 2147483647, %v7133_v56  ;;  %v1397_v56 = vor.u32 1.1754944e-38, %v1396_v49 }
 0x2e7   : > { %5611 = vmatpush.msk.msrb.mxu0 %vm2198_vm7, %v9101_v58  ;;  %vm2197_vm8 = vcmp.eq.s32.totalorder %v2087_v6, %v9213_v28  ;;  %5725 = vmatpush.msk.msra.mxu3 %vm2198_vm7, %v9101_v58  ;;  %v1409_v11 = vand.u32 2147483647, %v7146_v14  ;;  %vm2196_vm13 = vcmp.eq.s32.totalorder %v2080_v17, %v9213_v28  ;;  %v1970_v49 = vadd.s32 80, %v9211_v13 }
 0x2e8   : > { %v1207_v2 = vpop.f32.mrf.mxu1  ;;  %v1389_v18 = vadd.f32 %v7144_v7, %v1388_v54  ;;  %vm1395_vm10 = vcmp.eq.f32.partialorder %v1394_v3, 8.507059e+37 }
 0x2e9   : > { %v7163_v15 = vpop.eup %6026  ;;  %v7165_v37 = vmax.f32 %v1207_v2, 1e-37  ;;  %5612 = vmatpush.msk.msrb.mxu0 %vm2197_vm8, %v9101_v58  ;;  %5726 = vmatpush.msk.msra.mxu3 %vm2197_vm8, %v9101_v58  ;;  %vm1410_vm0 = vcmp.eq.f32.partialorder %v1409_v11, 8.507059e+37 }
 0x2ea   : > { %v1401_v0 = vmul.f32 %v7163_v15, %v7146_v14  ;;  %v1393_v4 = vsel %vm1392_vm9, %v7144_v7, %v1389_v18  ;;  %vm1406_vm11 = vweird.f32 %v7163_v15  ;;  %v2073_v7 = vand.u32 31, %v1971_v32 }
 0x2eb   : > { %6028 = vrcp.f32 %v7165_v37  ;;  %1936 = vmatmul.f32.gmra.mxu3 %v1515_v61  ;;  %v1398_v54 = vsel %vm1395_vm10, %v1397_v56, %v1393_v4  ;;  %5613 = vmatpush.msk.msrb.mxu0 %vm2196_vm13, %v9101_v58  ;;  %vm7226_vm15 = vmor %vm1405_vm12, %vm1406_vm11  ;;  %v2066_v56 = vand.u32 31, %v1970_v49  ;;  %v1968_v32 = vadd.s32 64, %v9211_v13 }
 0x2ec   : > { %v1402_v53 = vsub.f32 1.0, %v1401_v0  ;;  %v7204_v0 = vunpack.c.l.bf16 %v5889_v27  ;;  %vm2195_vm14 = vcmp.eq.s32.totalorder %v2073_v7, %v9213_v28  ;;  %5727 = vmatpush.msk.msra.mxu3 %vm2196_vm13, %v9101_v58  ;;  %vm1420_vm4 = vweird.f32 %v7165_v37 }
 0x2ed   : > { %5614 = vmatpush.msk.msrb.mxu0 %vm2195_vm14, %v9101_v58  ;;  %vm2194_vm3 = vcmp.eq.s32.totalorder %v2066_v56, %v9213_v28  ;;  %v1424_v11 = vand.u32 2147483647, %v7165_v37 }
 0x2ee   : > { %v1403_v61 = vmul.f32 %v7163_v15, %v1402_v53  ;;  %9215 = vst [vmem:[#allocation24_spill] sm:$0xff] %v7204_v0  ;;  %v1411_v53 = vand.u32 2147483648, %v7146_v14  ;;  %5728 = vmatpush.msk.msra.mxu3 %vm2195_vm14, %v9101_v58  ;;  %v5890_v14 = vld [vmem:[%s7034_s1 + $0x30] sm:$0xff]  }
 0x2ef   : > { %5615 = vmatpush.msk.msrb.mxu0 %vm2194_vm3, %v9101_v58  ;;  %vm1425_vm10 = vcmp.eq.f32.partialorder %v1424_v11, 8.507059e+37 }
 0x2f0   : > { %v1210_v41 = vpop.f32.mrf.mxu1  ;;  %v1404_v51 = vadd.f32 %v7163_v15, %v1403_v61  ;;  %v1412_v4 = vor.u32 1.1754944e-38, %v1411_v53  ;;  %v7236_v61 = vunpack.c.h.bf16 %v5889_v27  ;;  %v2059_v27 = vand.u32 31, %v1969_v16  ;;  %5729 = vmatpush.msk.msra.mxu3 %vm2194_vm3, %v9101_v58 }
 0x2f1   : > { %v7186_v50 = vpop.eup %6028  ;;  %v7188_v34 = vmax.f32 %v1210_v41, 1e-37  ;;  %v1517_v41 = vmul.f32 %v7204_v0, %v1398_v54  ;;  %v1967_v54 = vadd.s32 56, %v9211_v13  ;;  %v1426_v53 = vand.u32 2147483648, %v7165_v37 }
 0x2f2   : > { %v1416_v2 = vmul.f32 %v7186_v50, %v7165_v37  ;;  %v1408_v3 = vsel %vm7226_vm15, %v7163_v15, %v1404_v51  ;;  %9218 = vst [vmem:[#allocation25_spill] sm:$0xff] %v7236_v61  ;;  %vm1421_vm2 = vweird.f32 %v7186_v50  ;;  %vm2193_vm6 = vcmp.eq.s32.totalorder %v2059_v27, %v9213_v28 }
 0x2f3   : > { %6030 = vrcp.f32 %v7188_v34  ;;  %1939 = vmatmul.f32.gmra.mxu3 %v1516_v45  ;;  %v1413_v7 = vsel %vm1410_vm0, %v1412_v4, %v1408_v3  ;;  %v2045_v51 = vand.u32 31, %v1967_v54  ;;  %vm7264_vm8 = vmor %vm1420_vm4, %vm1421_vm2  ;;  %5616 = vmatpush.msk.msrb.mxu0 %vm2193_vm6, %v9101_v58  ;;  %v1966_v4 = vadd.s32 48, %v9211_v13 }
 0x2f4   : > { %v1417_v29 = vsub.f32 1.0, %v1416_v2  ;;  %5730 = vmatpush.msk.msra.mxu3 %vm2193_vm6, %v9101_v58  ;;  %v1427_v54 = vor.u32 1.1754944e-38, %v1426_v53  ;;  %v7295_v27 = vadd.s32 24, %v9211_v13  ;;  %vm1435_vm13 = vweird.f32 %v7188_v34 }
 0x2f5   : > { %vm7279_vm9 = vcmp.eq.s32.totalorder %v2045_v51, %v9213_v28 }
 0x2f6   : > { %v1418_v2 = vmul.f32 %v7186_v50, %v1417_v29  ;;  %v2052_v29 = vand.u32 31, %v1968_v32  ;;  %9226 = vst [vmem:[#allocation27_spill] sm:$0xff] %v7295_v27  ;;  %v2017_v3 = vand.u32 31, %v7295_v27 }
 0x2f8   : > { %v1213_v52 = vpop.f32.mrf.mxu1  ;;  %v1419_v15 = vadd.f32 %v7186_v50, %v1418_v2  ;;  %vm7258_vm7 = vcmp.eq.s32.totalorder %v2052_v29, %v9213_v28  ;;  %v1439_v2 = vand.u32 2147483647, %v7188_v34  ;;  %vm2187_vm2 = vcmp.eq.s32.totalorder %v2017_v3, %v9213_v28 }
 0x2f9   : > { %v7213_v18 = vpop.eup %6030  ;;  %v7215_v6 = vmax.f32 %v1213_v52, 1e-37  ;;  %5617 = vmatpush.msk.msrb.mxu0 %vm7258_vm7, %v9101_v58  ;;  %5731 = vmatpush.msk.msra.mxu3 %vm7258_vm7, %v9101_v58 }
 0x2fa   : > { %v1431_v45 = vmul.f32 %v7213_v18, %v7188_v34  ;;  %v1423_v16 = vsel %vm7264_vm8, %v7186_v50, %v1419_v15  ;;  %vm1436_vm11 = vweird.f32 %v7213_v18  ;;  %v1965_v50 = vadd.s32 40, %v9211_v13 }
 0x2fb   : > { %6032 = vrcp.f32 %v7215_v6  ;;  %1942 = vmatmul.f32.gmra.mxu3 %v1517_v41  ;;  %v1964_v15 = vadd.s32 32, %v9211_v13  ;;  %v1428_v29 = vsel %vm1425_vm10, %v1427_v54, %v1423_v16  ;;  %5618 = vmatpush.msk.msrb.mxu0 %vm7279_vm9, %v9101_v58  ;;  %vm7319_vm14 = vmor %vm1435_vm13, %vm1436_vm11  ;;  %vm1440_vm3 = vcmp.eq.f32.partialorder %v1439_v2, 8.507059e+37 }
 0x2fc   : > { %v1432_v17 = vsub.f32 1.0, %v1431_v45  ;;  %v1518_v45 = vmul.f32 %v7236_v61, %v1413_v7  ;;  %v2038_v7 = vand.u32 31, %v1966_v4  ;;  %5732 = vmatpush.msk.msra.mxu3 %vm7279_vm9, %v9101_v58  ;;  %v2031_v53 = vand.u32 31, %v1965_v50 }
 0x2fd   : > { %v7336_v50 = vadd.s32 8, %v9211_v13  ;;  %vm1450_vm8 = vweird.f32 %v7215_v6  ;;  %v1454_v2 = vand.u32 2147483647, %v7215_v6 }
 0x2fe   : > { %v1433_v37 = vmul.f32 %v7213_v18, %v1432_v17  ;;  %v7283_v17 = vunpack.c.l.bf16 %v5890_v14  ;;  %vm2190_vm12 = vcmp.eq.s32.totalorder %v2038_v7, %v9213_v28  ;;  %vm2189_vm15 = vcmp.eq.s32.totalorder %v2031_v53, %v9213_v28 }
 0x2ff   : > { %5619 = vmatpush.msk.msrb.mxu0 %vm2190_vm12, %v9101_v58  ;;  %5733 = vmatpush.msk.msra.mxu3 %vm2190_vm12, %v9101_v58  ;;  %9230 = vst [vmem:[#allocation29_spill] sm:$0xff] %v7336_v50  ;;  %vm1455_vm11 = vcmp.eq.f32.partialorder %v1454_v2, 8.507059e+37 }
 0x300   : > { %v1216_v52 = vpop.f32.mrf.mxu1  ;;  %9225 = vst [vmem:[#allocation26_spill] sm:$0xff] %v7283_v17  ;;  %v1434_v51 = vadd.f32 %v7213_v18, %v1433_v37  ;;  %v1441_v37 = vand.u32 2147483648, %v7188_v34  ;;  %v1519_v16 = vmul.f32 %v7283_v17, %v1428_v29  ;;  %v2003_v29 = vand.u32 31, %v7336_v50 }
 0x301   : > { %v7250_v41 = vpop.eup %6032  ;;  %v7252_v49 = vmax.f32 %v1216_v52, 1e-37  ;;  %v7303_v52 = vadd.s32 16, %v9211_v13  ;;  %5620 = vmatpush.msk.msrb.mxu0 %vm2189_vm15, %v9101_v58  ;;  %5734 = vmatpush.msk.msra.mxu3 %vm2189_vm15, %v9101_v58 }
 0x302   : > { %v1446_v56 = vmul.f32 %v7250_v41, %v7215_v6  ;;  %v1438_v32 = vsel %vm7319_vm14, %v7213_v18, %v1434_v51  ;;  %v7340_v18 = vunpack.c.h.bf16 %v5890_v14  ;;  %vm1451_vm6 = vweird.f32 %v7250_v41 }
 0x303   : > { %6034 = vrcp.f32 %v7252_v49  ;;  %1945 = vmatmul.f32.gmra.mxu3 %v1518_v45  ;;  %9227 = vst [vmem:[#allocation28_spill] sm:$0xff] %v7303_v52  ;;  %v2024_v45 = vand.u32 31, %v1964_v15  ;;  %v2010_v34 = vand.u32 31, %v7303_v52  ;;  %v1442_v15 = vor.u32 1.1754944e-38, %v1441_v37  ;;  %vm1452_vm10 = vmor %vm1450_vm8, %vm1451_vm6  ;;  %v5891_v37 = vld [vmem:[%s7034_s1 + $0x38] sm:$0xff]  }
 0x304   : > { %v1447_v11 = vsub.f32 1.0, %v1446_v56  ;;  %9231 = vst [vmem:[#allocation30_spill] sm:$0xff] %v7340_v18  ;;  %vm2185_vm7 = vcmp.eq.s32.totalorder %v2003_v29, %v9213_v28  ;;  %v1996_v14 = vand.u32 31, %v9211_v13  ;;  %vm1465_vm13 = vweird.f32 %v7252_v49 }
 0x305   : > { %vm2188_vm0 = vcmp.eq.s32.totalorder %v2024_v45, %v9213_v28  ;;  %vm2186_vm4 = vcmp.eq.s32.totalorder %v2010_v34, %v9213_v28  ;;  %v1443_v51 = vsel %vm1440_vm3, %v1442_v15, %v1438_v32  ;;  %v1456_v45 = vand.u32 2147483648, %v7215_v6 }
 0x306   : > { %v1448_v7 = vmul.f32 %v7250_v41, %v1447_v11  ;;  %5621 = vmatpush.msk.msrb.mxu0 %vm2188_vm0, %v9101_v58  ;;  %5735 = vmatpush.msk.msra.mxu3 %vm2188_vm0, %v9101_v58  ;;  %v1520_v3 = vmul.f32 %v7340_v18, %v1443_v51  ;;  %vm2184_vm9 = vcmp.eq.s32.totalorder %v1996_v14, %v9213_v28  ;;  %v7364_v6 = vunpack.c.l.bf16 %v5891_v37 }
 0x307   : > { %v1457_v34 = vor.u32 1.1754944e-38, %v1456_v45  ;;  %vm2349_vm0 = vcmask 261120  }
 0x308   : > { %5622 = vmatpush.msk.msrb.mxu0 %vm2187_vm2, %v9101_v58  ;;  %5736 = vmatpush.msk.msra.mxu3 %vm2187_vm2, %v9101_v58  ;;  %v1449_v53 = vadd.f32 %v7250_v41, %v1448_v7  ;;  %9232 = vst [vmem:[#allocation31_spill] sm:$0xff] %v7364_v6  ;;  %v1471_v7 = vand.u32 2147483648, %v7252_v49 }
 0x309   : > { %v7314_v4 = vpop.eup %6034 }
 0x30a   : > { %v1461_v54 = vmul.f32 %v7314_v4, %v7252_v49  ;;  %5623 = vmatpush.msk.msrb.mxu0 %vm2186_vm4, %v9101_v58  ;;  %5737 = vmatpush.msk.msra.mxu3 %vm2186_vm4, %v9101_v58  ;;  %vm1466_vm12 = vweird.f32 %v7314_v4  ;;  %v1472_v51 = vor.u32 1.1754944e-38, %v1471_v7 }
 0x30b   : > { %1948 = vmatmul.f32.gmra.mxu3 %v1519_v16  ;;  %v1453_v16 = vsel %vm1452_vm10, %v7250_v41, %v1449_v53  ;;  %v1469_v41 = vand.u32 2147483647, %v7252_v49  ;;  %vm1467_vm14 = vmor %vm1465_vm13, %vm1466_vm12 }
 0x30c   : > { %v1462_v11 = vsub.f32 1.0, %v1461_v54  ;;  %5624 = vmatpush.msk.msrb.mxu0 %vm2185_vm7, %v9101_v58  ;;  %5738 = vmatpush.msk.msra.mxu3 %vm2185_vm7, %v9101_v58  ;;  %v1458_v32 = vsel %vm1455_vm11, %v1457_v34, %v1453_v16 }
 0x30d   : > { %v1521_v15 = vmul.f32 %v7364_v6, %v1458_v32  ;;  %vm1470_vm15 = vcmp.eq.f32.partialorder %v1469_v41, 8.507059e+37 }
 0x30e   : > { %v1463_v56 = vmul.f32 %v7314_v4, %v1462_v11  ;;  %5625 = vmatpush.msk.msrb.mxu0 %vm2184_vm9, %v9101_v58  ;;  %5739 = vmatpush.msk.msra.mxu3 %vm2184_vm9, %v9101_v58  ;;  %v7373_v11 = vunpack.c.h.bf16 %v5891_v37 }
 0x310   : > { %v1464_v54 = vadd.f32 %v7314_v4, %v1463_v56  ;;  %9233 = vst [vmem:[#allocation32_spill] sm:$0xff] %v7373_v11 }
 0x312   : > { %v1468_v29 = vsel %vm1467_vm14, %v7314_v4, %v1464_v54 }
 0x313   : > { %1951 = vmatmul.f32.gmra.mxu3 %v1520_v3  ;;  %v1473_v53 = vsel %vm1470_vm15, %v1472_v51, %v1468_v29 }
 0x314   : > { %v1522_v14 = vmul.f32 %v7373_v11, %v1473_v53 }
 0x31b   : > { %1954 = vmatmul.f32.gmra.mxu3 %v1521_v15 }
 0x323   : > { %1957 = vmatmul.f32.gmra.mxu3 %v1522_v14 }
 0x32e   : > { %v1913_v45 = vpop.f32.mrf.mxu3 }
 0x32f   : > { %v2248_v3 = vmul.f32 %v1913_v45, %v6854_v8 }
 0x331   : > { %2284 = vmatmul.f32.vlgmr.msrb.gmra.mxu0 %v2248_v3 }
 0x336   : > { %v1916_v2 = vpop.f32.mrf.mxu3 }
 0x337   : > { %v2249_v16 = vmul.f32 %v1916_v2, %v6857_v12 }
 0x339   : > { %2287 = vmatmul.f32.gmra.mxu0 %v2249_v16 }
 0x33e   : > { %v1919_v49 = vpop.f32.mrf.mxu3 }
 0x33f   : > { %v2250_v56 = vmul.f32 %v1919_v49, %v6867_v48 }
 0x341   : > { %2290 = vmatmul.f32.gmra.mxu0 %v2250_v56 }
 0x346   : > { %v1922_v4 = vpop.f32.mrf.mxu3 }
 0x347   : > { %v2251_v37 = vmul.f32 %v1922_v4, %v6879_v30 }
 0x349   : > { %2293 = vmatmul.f32.gmra.mxu0 %v2251_v37 }
 0x34e   : > { %v1925_v34 = vpop.f32.mrf.mxu3 }
 0x34f   : > { %v2252_v32 = vmul.f32 %v1925_v34, %v6892_v9 }
 0x351   : > { %2296 = vmatmul.f32.gmra.mxu0 %v2252_v32 }
 0x356   : > { %v1928_v54 = vpop.f32.mrf.mxu3 }
 0x357   : > { %v2253_v8 = vmul.f32 %v1928_v54, %v6906_v22 }
 0x359   : > { %2299 = vmatmul.f32.gmra.mxu0 %v2253_v8 }
 0x35e   : > { %v1931_v7 = vpop.f32.mrf.mxu3 }
 0x35f   : > { %v2254_v12 = vmul.f32 %v1931_v7, %v6918_v23 }
 0x361   : > { %2302 = vmatmul.f32.gmra.mxu0 %v2254_v12 }
 0x366   : > { %v1934_v15 = vpop.f32.mrf.mxu3 }
 0x367   : > { %v2255_v48 = vmul.f32 %v1934_v15, %v6932_v24 }
 0x369   : > { %2305 = vmatmul.f32.gmra.mxu0 %v2255_v48 }
 0x36e   : > { %v1937_v41 = vpop.f32.mrf.mxu3 }
 0x36f   : > { %v2256_v30 = vmul.f32 %v1937_v41, %v6948_v26 }
 0x371   : > { %2308 = vmatmul.f32.gmra.mxu0 %v2256_v30 }
 0x376   : > { %v1940_v29 = vpop.f32.mrf.mxu3 }
 0x377   : > { %v2257_v9 = vmul.f32 %v1940_v29, %v6958_v62 }
 0x379   : > { %2311 = vmatmul.f32.gmra.mxu0 %v2257_v9 }
 0x37e   : > { %v1943_v51 = vpop.f32.mrf.mxu3 }
 0x37f   : > { %v2258_v22 = vmul.f32 %v1943_v51, %v6968_v19 }
 0x381   : > { %2314 = vmatmul.f32.gmra.mxu0 %v2258_v22 }
 0x386   : > { %v1946_v53 = vpop.f32.mrf.mxu3 }
 0x387   : > { %v2259_v23 = vmul.f32 %v1946_v53, %v6972_v44 }
 0x389   : > { %2317 = vmatmul.f32.gmra.mxu0 %v2259_v23 }
 0x38e   : > { %v1949_v14 = vpop.f32.mrf.mxu3 }
 0x38f   : > { %v2260_v24 = vmul.f32 %v1949_v14, %v6976_v47 }
 0x391   : > { %2320 = vmatmul.f32.gmra.mxu0 %v2260_v24 }
 0x396   : > { %v1952_v45 = vpop.f32.mrf.mxu3 }
 0x397   : > { %v2261_v26 = vmul.f32 %v1952_v45, %v6980_v31 }
 0x399   : > { %2323 = vmatmul.f32.gmra.mxu0 %v2261_v26 }
 0x39e   : > { %v1955_v3 = vpop.f32.mrf.mxu3 }
 0x39f   : > { %v2262_v62 = vmul.f32 %v1955_v3, %v6984_v55  ;;  %v7395_v55 = vld [vmem:[%s9054_s6] ss:$0 sm:$0xff] }
 0x3a1   : > { %2326 = vmatmul.f32.gmra.mxu0 %v2262_v62 }
 0x3a6   : > { %v1958_v2 = vpop.f32.mrf.mxu3 }
 0x3a7   : > { %v2263_v19 = vmul.f32 %v1958_v2, %v6988_v33 }
 0x3a9   : > { %2329 = vmatmul.f32.gmra.mxu0 %v2263_v19 }
 0x3ae   : > { %v2285_v16 = vpop.f32.mrf.mxu0 }
 0x3af   : > { %v7401_v7 = vadd.f32 %v7395_v55, %v2285_v16 }
 0x3b1   : > { %v9116_v41 = vmax.f32 %v7401_v7, 0.0 }
 0x3b3   : > { %v2350_v23 = vsel %vm2349_vm0, %v9116_v41, 0.0 }
 0x3b6   : > { %v2288_v49 = vpop.f32.mrf.mxu0 }
 0x3b7   : > { %v7398_v8 = vadd.f32 %v7395_v55, %v2288_v49 }
 0x3b9   : > { %v9115_v15 = vmax.f32 %v7398_v8, 0.0 }
 0x3bb   : > { %v2351_v9 = vsel %vm2349_vm0, %v9115_v15, 0.0 }
 0x3bc   : > { %v2352_v26 = vadd.f32 %v2351_v9, %v2350_v23 }
 0x3be   : > { %v2291_v44 = vpop.f32.mrf.mxu0 }
 0x3bf   : > { %v7404_v12 = vadd.f32 %v7395_v55, %v2291_v44 }
 0x3c1   : > { %v9114_v30 = vmax.f32 %v7404_v12, 0.0 }
 0x3c3   : > { %v2353_v14 = vsel %vm2349_vm0, %v9114_v30, 0.0 }
 0x3c4   : > { %v2354_v19 = vadd.f32 %v2353_v14, %v2352_v26 }
 0x3c6   : > { %v2294_v56 = vpop.f32.mrf.mxu0 }
 0x3c7   : > { %v7408_v48 = vadd.f32 %v7395_v55, %v2294_v56 }
 0x3c9   : > { %v9112_v51 = vmax.f32 %v7408_v48, 0.0 }
 0x3cb   : > { %v2355_v3 = vsel %vm2349_vm0, %v9112_v51, 0.0 }
 0x3cc   : > { %v2356_v56 = vadd.f32 %v2355_v3, %v2354_v19 }
 0x3ce   : > { %v2297_v4 = vpop.f32.mrf.mxu0 }
 0x3cf   : > { %v7413_v29 = vadd.f32 %v7395_v55, %v2297_v4 }
 0x3d1   : > { %v9110_v24 = vmax.f32 %v7413_v29, 0.0 }
 0x3d3   : > { %v2357_v16 = vsel %vm2349_vm0, %v9110_v24, 0.0 }
 0x3d6   : > { %v2300_v37 = vpop.f32.mrf.mxu0 }
 0x3d7   : > { %v7420_v22 = vadd.f32 %v7395_v55, %v2300_v37 }
 0x3d9   : > { %v9108_v62 = vmax.f32 %v7420_v22, 0.0 }
 0x3db   : > { %v2359_v4 = vsel %vm2349_vm0, %v9108_v62, 0.0 }
 0x3de   : > { %v2303_v47 = vpop.f32.mrf.mxu0 }
 0x3df   : > { %v7430_v45 = vadd.f32 %v7395_v55, %v2303_v47 }
 0x3e1   : > { %v9104_v49 = vmax.f32 %v7430_v45, 0.0 }
 0x3e3   : > { %v2361_v23 = vsel %vm2349_vm0, %v9104_v49, 0.0  ;;  %v6245_v49 = vmov 128.0  }
 0x3e4   : > { %6036 = vrcp.f32 %v6245_v49 }
 0x3e6   : > { %v2306_v34 = vpop.f32.mrf.mxu0 }
 0x3e7   : > { %v7437_v2 = vadd.f32 %v7395_v55, %v2306_v34  ;;  %v2358_v34 = vadd.f32 %v2357_v16, %v2356_v56 }
 0x3e9   : > { %v9103_v37 = vmax.f32 %v7437_v2, 0.0  ;;  %v2360_v26 = vadd.f32 %v2359_v4, %v2358_v34 }
 0x3eb   : > { %v2363_v3 = vsel %vm2349_vm0, %v9103_v37, 0.0  ;;  %v2362_v16 = vadd.f32 %v2361_v23, %v2360_v26 }
 0x3ed   : > { %v2364_v4 = vadd.f32 %v2363_v3, %v2362_v16 }
 0x3ee   : > { %v2309_v32 = vpop.f32.mrf.mxu0 }
 0x3ef   : > { %v7444_v44 = vadd.f32 %v7395_v55, %v2309_v32 }
 0x3f1   : > { %v9105_v14 = vmax.f32 %v7444_v44, 0.0 }
 0x3f3   : > { %v2365_v56 = vsel %vm2349_vm0, %v9105_v14, 0.0 }
 0x3f4   : > { %v2366_v23 = vadd.f32 %v2365_v56, %v2364_v4 }
 0x3f6   : > { %v2312_v54 = vpop.f32.mrf.mxu0 }
 0x3f7   : > { %v7451_v47 = vadd.f32 %v7395_v55, %v2312_v54 }
 0x3f9   : > { %v9106_v19 = vmax.f32 %v7451_v47, 0.0 }
 0x3fb   : > { %v2367_v34 = vsel %vm2349_vm0, %v9106_v19, 0.0 }
 0x3fc   : > { %v2368_v16 = vadd.f32 %v2367_v34, %v2366_v23 }
 0x3fe   : > { %v2315_v31 = vpop.f32.mrf.mxu0 }
 0x3ff   : > { %v7458_v32 = vadd.f32 %v7395_v55, %v2315_v31 }
 0x401   : > { %v9107_v58 = vmax.f32 %v7458_v32, 0.0 }
 0x403   : > { %v2369_v14 = vsel %vm2349_vm0, %v9107_v58, 0.0  ;;  %v6037_v58 = vpop.eup %6036 }
 0x404   : > { %v2370_v56 = vadd.f32 %v2369_v14, %v2368_v16  ;;  %v2388_v16 = vmul.f32 128.0, %v6037_v58  ;;  %vm2392_vm2 = vweird.f32 %v6037_v58 }
 0x406   : > { %v2318_v33 = vpop.f32.mrf.mxu0 }
 0x407   : > { %v7465_v54 = vadd.f32 %v7395_v55, %v2318_v33 }
 0x409   : > { %v9109_v37 = vmax.f32 %v7465_v54, 0.0 }
 0x40b   : > { %v2371_v19 = vsel %vm2349_vm0, %v9109_v37, 0.0 }
 0x40c   : > { %v2372_v62 = vadd.f32 %v2371_v19, %v2370_v56  ;;  %v2389_v56 = vsub.f32 1.0, %v2388_v16  ;;  %v9236_v16 = vmax.f32 %v7398_v8, 0.0 }
 0x40e   : > { %v2321_v53 = vpop.f32.mrf.mxu0 }
 0x40f   : > { %v7472_v31 = vadd.f32 %v7395_v55, %v2321_v53 }
 0x411   : > { %v9111_v53 = vmax.f32 %v7472_v31, 0.0 }
 0x413   : > { %v2373_v49 = vsel %vm2349_vm0, %v9111_v53, 0.0 }
 0x414   : > { %v2374_v34 = vadd.f32 %v2373_v49, %v2372_v62  ;;  %v2390_v49 = vmul.f32 %v6037_v58, %v2389_v56 }
 0x416   : > { %v2324_v9 = vpop.f32.mrf.mxu0  ;;  %v2391_v41 = vadd.f32 %v6037_v58, %v2390_v49 }
 0x417   : > { %v7479_v33 = vadd.f32 %v7395_v55, %v2324_v9 }
 0x419   : > { %v9113_v9 = vmax.f32 %v7479_v33, 0.0 }
 0x41e   : > { %v2327_v26 = vpop.f32.mrf.mxu0 }
 0x41f   : > { %v7486_v3 = vadd.f32 %v7395_v55, %v2327_v26  ;;  %v2375_v26 = vsel %vm2349_vm0, %v9113_v9, 0.0 }
 0x420   : > { %v2376_v24 = vadd.f32 %v2375_v26, %v2374_v34 }
 0x421   : > { %v9117_v4 = vmax.f32 %v7486_v3, 0.0 }
 0x423   : > { %v2377_v37 = vsel %vm2349_vm0, %v9117_v4, 0.0 }
 0x424   : > { %v2378_v51 = vadd.f32 %v2377_v37, %v2376_v24  ;;  %v9235_v24 = vmax.f32 %v7401_v7, 0.0 }
 0x426   : > { %v2330_v23 = vpop.f32.mrf.mxu0 }
 0x427   : > { %v7503_v14 = vadd.f32 %v7395_v55, %v2330_v23  ;;  %v7509_v23 = vsel %vm2392_vm2, %v6037_v58, %v2391_v41  ;;  %v9239_v41 = vmax.f32 %v7413_v29, 0.0 }
 0x428   : > { %9234 = vst [vmem:[#allocation33_spill] sm:$0xff] %v7509_v23 }
 0x429   : > { %v2348_v53 = vmax.f32 %v7503_v14, 0.0 }
 0x42b   : > { %v2379_v19 = vsel %vm2349_vm0, %v2348_v53, 0.0 }
 0x42c   : > { %v2380_v9 = vadd.f32 %v2379_v19, %v2378_v51 }
 0x42e   : > { %v2381_v62 = vrot.slane %v2380_v9, 4 }
 0x430   : > { %v2382_v30 = vadd.f32 %v2381_v62, %v2380_v9  ;;  %v9237_v9 = vmax.f32 %v7404_v12, 0.0  ;;  %v9240_v12 = vmax.f32 %v7420_v22, 0.0 }
 0x432   : > { %v2383_v15 = vrot.slane %v2382_v30, 2 }
 0x434   : > { %v2384_v4 = vadd.f32 %v2383_v15, %v2382_v30  ;;  %v9238_v15 = vmax.f32 %v7408_v48, 0.0 }
 0x436   : > { %v2385_v55 = vrot.slane %v2384_v4, 1 }
 0x438   : > { %v2386_v26 = vadd.f32 %v2385_v55, %v2384_v4 }
 0x43a   : > { %v2394_v34 = vmul.f32 %v7509_v23, %v2386_v26  ;;  %v9241_v26 = vmax.f32 %v7430_v45, 0.0  ;;  %v9243_v45 = vmax.f32 %v7444_v44, 0.0  ;;  %v9245_v44 = vmax.f32 %v7458_v32, 0.0 }
 0x43b   : > { %v9247_v32 = vmax.f32 %v7472_v31, 0.0  ;;  %v9249_v31 = vmax.f32 %v7486_v3, 0.0 }
 0x43c   : > { %v7514_v37 = vsub.f32 %v9235_v24, %v2394_v34  ;;  %v7518_v51 = vsub.f32 %v9236_v16, %v2394_v34  ;;  %v7522_v19 = vsub.f32 %v9237_v9, %v2394_v34  ;;  %v7526_v30 = vsub.f32 %v9238_v15, %v2394_v34 }
 0x43d   : > { %v7534_v4 = vsub.f32 %v9239_v41, %v2394_v34  ;;  %v7540_v56 = vsub.f32 %v9240_v12, %v2394_v34  ;;  %v7548_v29 = vsub.f32 %v9241_v26, %v2394_v34  ;;  %v9242_v9 = vmax.f32 %v7437_v2, 0.0 }
 0x43e   : > { %v2411_v58 = vmul.f32 %v7514_v37, %v7514_v37  ;;  %v2412_v7 = vmul.f32 %v7518_v51, %v7518_v51  ;;  %v2413_v8 = vmul.f32 %v7522_v19, %v7522_v19  ;;  %v2414_v48 = vmul.f32 %v7526_v30, %v7526_v30 }
 0x43f   : > { %v2415_v24 = vmul.f32 %v7534_v4, %v7534_v4  ;;  %v7555_v15 = vsub.f32 %v9242_v9, %v2394_v34  ;;  %v7562_v12 = vsub.f32 %v9243_v45, %v2394_v34  ;;  %v9244_v2 = vmax.f32 %v7451_v47, 0.0 }
 0x440   : > { %v2427_v62 = vsel %vm2349_vm0, %v2411_v58, 0.0  ;;  %v2428_v49 = vsel %vm2349_vm0, %v2412_v7, 0.0  ;;  %v2430_v16 = vsel %vm2349_vm0, %v2413_v8, 0.0  ;;  %v2416_v58 = vmul.f32 %v7540_v56, %v7540_v56 }
 0x441   : > { %v2429_v55 = vadd.f32 %v2428_v49, %v2427_v62  ;;  %v2432_v7 = vsel %vm2349_vm0, %v2414_v48, 0.0  ;;  %v2417_v62 = vmul.f32 %v7548_v29, %v7548_v29  ;;  %v2434_v8 = vsel %vm2349_vm0, %v2415_v24, 0.0 }
 0x442   : > { %v2418_v26 = vmul.f32 %v7555_v15, %v7555_v15  ;;  %v2436_v48 = vsel %vm2349_vm0, %v2416_v58, 0.0  ;;  %v2419_v9 = vmul.f32 %v7562_v12, %v7562_v12  ;;  %v9246_v47 = vmax.f32 %v7465_v54, 0.0 }
 0x443   : > { %v2431_v22 = vadd.f32 %v2430_v16, %v2429_v55  ;;  %v7569_v55 = vsub.f32 %v9244_v2, %v2394_v34  ;;  %v2438_v24 = vsel %vm2349_vm0, %v2417_v62, 0.0  ;;  %v9248_v54 = vmax.f32 %v7479_v33, 0.0 }
 0x444   : > { %v2440_v58 = vsel %vm2349_vm0, %v2418_v26, 0.0  ;;  %v2442_v62 = vsel %vm2349_vm0, %v2419_v9, 0.0  ;;  %v2410_v33 = vsub.f32 %v2348_v53, %v2394_v34 }
 0x445   : > { %v2433_v41 = vadd.f32 %v2432_v7, %v2431_v22  ;;  %v7576_v22 = vsub.f32 %v9245_v44, %v2394_v34  ;;  %v2420_v45 = vmul.f32 %v7569_v55, %v7569_v55 }
 0x447   : > { %v2435_v49 = vadd.f32 %v2434_v8, %v2433_v41  ;;  %v7583_v41 = vsub.f32 %v9246_v47, %v2394_v34  ;;  %v2421_v2 = vmul.f32 %v7576_v22, %v7576_v22  ;;  %v2444_v26 = vsel %vm2349_vm0, %v2420_v45, 0.0 }
 0x449   : > { %v2437_v16 = vadd.f32 %v2436_v48, %v2435_v49  ;;  %v7590_v49 = vsub.f32 %v9247_v32, %v2394_v34  ;;  %v2422_v44 = vmul.f32 %v7583_v41, %v7583_v41 }
 0x44b   : > { %v2439_v7 = vadd.f32 %v2438_v24, %v2437_v16  ;;  %v7597_v16 = vsub.f32 %v9248_v54, %v2394_v34  ;;  %v2423_v47 = vmul.f32 %v7590_v49, %v7590_v49  ;;  %v2448_v32 = vsel %vm2349_vm0, %v2422_v44, 0.0  ;;  %v2535_v44 = vld [vmem:[%s9057_s9 + $0x18] sm:$0xff] }
 0x44c   : > { %v2426_v54 = vmul.f32 %v2410_v33, %v2410_v33  ;;  %2596 = vmatpush.msrb.mxu1 %v2535_v44  ;;  %v5933_v44 = vld [vmem:[%s9056_s8] ss:$0 sm:$0xff] }
 0x44d   : > { %v2441_v8 = vadd.f32 %v2440_v58, %v2439_v7  ;;  %v2409_v7 = vsub.f32 %v9249_v31, %v2394_v34  ;;  %v2446_v58 = vsel %vm2349_vm0, %v2421_v2, 0.0 }
 0x44e   : > { %v2456_v14 = vsel %vm2349_vm0, %v2426_v54, 0.0 }
 0x44f   : > { %v2443_v48 = vadd.f32 %v2442_v62, %v2441_v8  ;;  %v2424_v8 = vmul.f32 %v7597_v16, %v7597_v16  ;;  %v2425_v45 = vmul.f32 %v2409_v7, %v2409_v7 }
 0x451   : > { %v2445_v24 = vadd.f32 %v2444_v26, %v2443_v48  ;;  %v2450_v48 = vsel %vm2349_vm0, %v2423_v47, 0.0  ;;  %v2452_v26 = vsel %vm2349_vm0, %v2424_v8, 0.0  ;;  %v2454_v2 = vsel %vm2349_vm0, %v2425_v45, 0.0  ;;  %v2534_v47 = vld [vmem:[%s9057_s9 + $0x10] sm:$0xff]  ;;  %v2533_v8 = vld [vmem:[%s9057_s9 + $0x8] sm:$0xff] }
 0x452   : > { %2597 = vmatpush.msrb.mxu1 %v2534_v47 }
 0x453   : > { %v2447_v9 = vadd.f32 %v2446_v58, %v2445_v24 }
 0x454   : > { %2598 = vmatpush.msrb.mxu1 %v2533_v8 }
 0x455   : > { %v2449_v62 = vadd.f32 %v2448_v32, %v2447_v9 }
 0x457   : > { %v2451_v3 = vadd.f32 %v2450_v48, %v2449_v62  ;;  %v2532_v62 = vld [vmem:[%s9057_s9] sm:$0xff] }
 0x458   : > { %2599 = vmatpush.msrb.mxu1 %v2532_v62 }
 0x459   : > { %v2453_v31 = vadd.f32 %v2452_v26, %v2451_v3 }
 0x45b   : > { %v2455_v24 = vadd.f32 %v2454_v2, %v2453_v31 }
 0x45d   : > { %v2457_v53 = vadd.f32 %v2456_v14, %v2455_v24  ;;  %v5932_v14 = vld [vmem:[%s9055_s7] ss:$0 sm:$0xff] }
 0x45f   : > { %v2458_v34 = vrot.slane %v2457_v53, 4 }
 0x461   : > { %v2459_v58 = vadd.f32 %v2458_v34, %v2457_v53 }
 0x463   : > { %v2460_v50 = vrot.slane %v2459_v58, 2 }
 0x465   : > { %v2461_v9 = vadd.f32 %v2460_v50, %v2459_v58 }
 0x467   : > { %v2462_v32 = vrot.slane %v2461_v9, 1 }
 0x469   : > { %v2463_v45 = vadd.f32 %v2462_v32, %v2461_v9 }
 0x46b   : > { %v2464_v48 = vmul.f32 %v2463_v45, %v7509_v23 }
 0x46d   : > { %v2465_v3 = vadd.f32 1e-05, %v2464_v48 }
 0x46f   : > { %6038 = vrsqrt.f32 %v2465_v3  ;;  %vm2472_vm4 = vweird.f32 %v2465_v3 }
 0x475   : > { %v6039_v54 = vpop.eup %6038 }
 0x476   : > { %v2467_v26 = vmul.f32 %v6039_v54, %v2465_v3  ;;  %vm2473_vm3 = vweird.f32 %v6039_v54 }
 0x477   : > { %vm2474_vm6 = vmor %vm2472_vm4, %vm2473_vm3 }
 0x478   : > { %v2468_v50 = vmul.f32 %v6039_v54, %v2467_v26 }
 0x47a   : > { %v2469_v31 = vmul.f32 0.5, %v2468_v50 }
 0x47c   : > { %v2470_v2 = vsub.f32 1.5, %v2469_v31 }
 0x47e   : > { %v2471_v24 = vmul.f32 %v6039_v54, %v2470_v2 }
 0x480   : > { %v2475_v53 = vsel %vm2474_vm6, %v6039_v54, %v2471_v24 }
 0x481   : > { %v2491_v34 = vmul.f32 %v2475_v53, %v2410_v33  ;;  %v2476_v58 = vmul.f32 %v2475_v53, %v7514_v37  ;;  %v2477_v32 = vmul.f32 %v2475_v53, %v7518_v51  ;;  %v2484_v62 = vmul.f32 %v2475_v53, %v7562_v12 }
 0x482   : > { %v2485_v45 = vmul.f32 %v2475_v53, %v7569_v55  ;;  %v2486_v33 = vmul.f32 %v2475_v53, %v7576_v22  ;;  %v2487_v37 = vmul.f32 %v2475_v53, %v7583_v41  ;;  %v2488_v48 = vmul.f32 %v2475_v53, %v7590_v49 }
 0x483   : > { %v2511_v47 = vmul.f32 %v5932_v14, %v2491_v34  ;;  %v2496_v9 = vmul.f32 %v5932_v14, %v2476_v58  ;;  %v2489_v3 = vmul.f32 %v2475_v53, %v7597_v16  ;;  %v2490_v54 = vmul.f32 %v2475_v53, %v2409_v7 }
 0x484   : > { %v2497_v26 = vmul.f32 %v5932_v14, %v2477_v32  ;;  %v2504_v50 = vmul.f32 %v5932_v14, %v2484_v62  ;;  %v2505_v31 = vmul.f32 %v5932_v14, %v2485_v45  ;;  %v2506_v51 = vmul.f32 %v5932_v14, %v2486_v33 }
 0x485   : > { %v7636_v8 = vadd.f32 %v5933_v44, %v2496_v9  ;;  %v2507_v2 = vmul.f32 %v5932_v14, %v2487_v37  ;;  %v2508_v24 = vmul.f32 %v5932_v14, %v2488_v48  ;;  %v2509_v34 = vmul.f32 %v5932_v14, %v2489_v3 }
 0x486   : > { %v2510_v58 = vmul.f32 %v5932_v14, %v2490_v54  ;;  %v7647_v12 = vadd.f32 %v5933_v44, %v2504_v50  ;;  %v7649_v55 = vadd.f32 %v5933_v44, %v2505_v31  ;;  %v7651_v22 = vadd.f32 %v5933_v44, %v2506_v51 }
 0x487   : > { %5626 = vmatmul.msk.f32.vlgmr.msrb.gmra.mxu1 %vm2349_vm0, %v7636_v8  ;;  %v7653_v41 = vadd.f32 %v5933_v44, %v2511_v47  ;;  %v7655_v49 = vadd.f32 %v5933_v44, %v2507_v2  ;;  %v7657_v16 = vadd.f32 %v5933_v44, %v2508_v24  ;;  %v7659_v7 = vadd.f32 %v5933_v44, %v2509_v34 }
 0x488   : > { %v7661_v9 = vadd.f32 %v5933_v44, %v2510_v58  ;;  %v2517_v32 = vadd.f32 %v5933_v44, %v2497_v26  ;;  %v2478_v62 = vmul.f32 %v2475_v53, %v7522_v19  ;;  %v2479_v37 = vmul.f32 %v2475_v53, %v7526_v30 }
 0x489   : > { %v2480_v3 = vmul.f32 %v2475_v53, %v7534_v4  ;;  %v2481_v26 = vmul.f32 %v2475_v53, %v7540_v56  ;;  %v2482_v51 = vmul.f32 %v2475_v53, %v7548_v29  ;;  %v2483_v24 = vmul.f32 %v2475_v53, %v7555_v15  ;;  %v7687_v56 = vld [vmem:[%s9059_s11 + $0x18] sm:$0xff]  ;;  %v7692_v29 = vld [vmem:[%s9059_s11 + $0x10] sm:$0xff]  ;;  %v7699_v15 = vld [vmem:[%s9059_s11 + $0x8] sm:$0xff] }
 0x48a   : > { %v2498_v45 = vmul.f32 %v5932_v14, %v2478_v62  ;;  %v2499_v47 = vmul.f32 %v5932_v14, %v2479_v37  ;;  %5911 = vmatpush.msra.mxu1 %v7687_v56 }
 0x48b   : > { %v2500_v54 = vmul.f32 %v5932_v14, %v2480_v3  ;;  %v2501_v19 = vmul.f32 %v5932_v14, %v2481_v26  ;;  %v2502_v30 = vmul.f32 %v5932_v14, %v2482_v51  ;;  %v2503_v4 = vmul.f32 %v5932_v14, %v2483_v24  ;;  %v7705_v14 = vld [vmem:[%s9059_s11] sm:$0xff] }
 0x48c   : > { %v2518_v33 = vadd.f32 %v5933_v44, %v2498_v45  ;;  %v2519_v48 = vadd.f32 %v5933_v44, %v2499_v47  ;;  %5912 = vmatpush.msra.mxu1 %v7692_v29 }
 0x48d   : > { %v2520_v50 = vadd.f32 %v5933_v44, %v2500_v54  ;;  %v2521_v31 = vadd.f32 %v5933_v44, %v2501_v19  ;;  %v2522_v2 = vadd.f32 %v5933_v44, %v2502_v30  ;;  %v2523_v34 = vadd.f32 %v5933_v44, %v2503_v4 }
 0x48e   : > { %5913 = vmatpush.msra.mxu1 %v7699_v15 }
 0x48f   : > { %5627 = vmatmul.msk.f32.gmra.mxu1 %vm2349_vm0, %v2517_v32 }
 0x490   : > { %5914 = vmatpush.msra.mxu1 %v7705_v14 }
 0x497   : > { %5628 = vmatmul.msk.f32.gmra.mxu1 %vm2349_vm0, %v2518_v33 }
 0x49f   : > { %5629 = vmatmul.msk.f32.gmra.mxu1 %vm2349_vm0, %v2519_v48 }
 0x4a7   : > { %5630 = vmatmul.msk.f32.gmra.mxu1 %vm2349_vm0, %v2520_v50 }
 0x4af   : > { %5631 = vmatmul.msk.f32.gmra.mxu1 %vm2349_vm0, %v2521_v31 }
 0x4b7   : > { %5632 = vmatmul.msk.f32.gmra.mxu1 %vm2349_vm0, %v2522_v2 }
 0x4bf   : > { %5633 = vmatmul.msk.f32.gmra.mxu1 %vm2349_vm0, %v2523_v34 }
 0x4c7   : > { %5634 = vmatmul.msk.f32.gmra.mxu1 %vm2349_vm0, %v7647_v12 }
 0x4cf   : > { %5635 = vmatmul.msk.f32.gmra.mxu1 %vm2349_vm0, %v7649_v55 }
 0x4d7   : > { %5636 = vmatmul.msk.f32.gmra.mxu1 %vm2349_vm0, %v7651_v22 }
 0x4df   : > { %5637 = vmatmul.msk.f32.gmra.mxu1 %vm2349_vm0, %v7655_v49 }
 0x4e7   : > { %5638 = vmatmul.msk.f32.gmra.mxu1 %vm2349_vm0, %v7657_v16 }
 0x4ef   : > { %5639 = vmatmul.msk.f32.gmra.mxu1 %vm2349_vm0, %v7659_v7 }
 0x4f7   : > { %5640 = vmatmul.msk.f32.gmra.mxu1 %vm2349_vm0, %v7661_v9 }
 0x4ff   : > { %5641 = vmatmul.msk.f32.gmra.mxu1 %vm2349_vm0, %v7653_v41 }
 0x504   : > { %v7716_v53 = vpop.f32.mrf.mxu1 }
 0x507   : > { %5709 = vmatmul.msk.f32.vlgmr.msra.gmra.mxu1 %vm2349_vm0, %v2517_v32 }
 0x50c   : > { %v7719_v44 = vpop.f32.mrf.mxu1 }
 0x50f   : > { %5710 = vmatmul.msk.f32.gmra.mxu1 %vm2349_vm0, %v2518_v33 }
 0x514   : > { %v7722_v58 = vpop.f32.mrf.mxu1 }
 0x515   : > { %v2771_v4 = vsel %vm865_vm1, %v7722_v58, inf }
 0x517   : > { %5711 = vmatmul.msk.f32.gmra.mxu1 %vm2349_vm0, %v2519_v48 }
 0x51c   : > { %v7725_v62 = vpop.f32.mrf.mxu1 }
 0x51d   : > { %v2774_v51 = vsel %vm865_vm1, %v7725_v62, inf }
 0x51f   : > { %5712 = vmatmul.msk.f32.gmra.mxu1 %vm2349_vm0, %v2520_v50 }
 0x524   : > { %v7728_v45 = vpop.f32.mrf.mxu1 }
 0x527   : > { %5713 = vmatmul.msk.f32.gmra.mxu1 %vm2349_vm0, %v2521_v31 }
 0x52c   : > { %v7731_v37 = vpop.f32.mrf.mxu1 }
 0x52d   : > { %v2780_v30 = vsel %vm865_vm1, %v7731_v37, inf }
 0x52f   : > { %5714 = vmatmul.msk.f32.gmra.mxu1 %vm2349_vm0, %v2522_v2  ;;  %v2765_v2 = vsel %vm865_vm1, %v7716_v53, inf }
 0x534   : > { %v7734_v32 = vpop.f32.mrf.mxu1 }
 0x535   : > { %v2783_v19 = vsel %vm865_vm1, %v7734_v32, inf }
 0x537   : > { %5715 = vmatmul.msk.f32.gmra.mxu1 %vm2349_vm0, %v2523_v34  ;;  %v5934_v34 = vld [vmem:[%s9058_s10] ss:$0 sm:$0xff] }
 0x53c   : > { %v7737_v33 = vpop.f32.mrf.mxu1 }
 0x53f   : > { %5716 = vmatmul.msk.f32.gmra.mxu1 %vm2349_vm0, %v7647_v12 }
 0x544   : > { %v7741_v47 = vpop.f32.mrf.mxu1 }
 0x547   : > { %5717 = vmatmul.msk.f32.gmra.mxu1 %vm2349_vm0, %v7649_v55 }
 0x54c   : > { %v7745_v48 = vpop.f32.mrf.mxu1 }
 0x54d   : > { %v2792_v24 = vsel %vm865_vm1, %v7745_v48, inf }
 0x54f   : > { %5718 = vmatmul.msk.f32.gmra.mxu1 %vm2349_vm0, %v7651_v22 }
 0x554   : > { %v7749_v3 = vpop.f32.mrf.mxu1 }
 0x555   : > { %v2795_v50 = vsel %vm865_vm1, %v7749_v3, inf }
 0x557   : > { %5719 = vmatmul.msk.f32.gmra.mxu1 %vm2349_vm0, %v7655_v49 }
 0x55c   : > { %v7753_v54 = vpop.f32.mrf.mxu1 }
 0x55f   : > { %5720 = vmatmul.msk.f32.gmra.mxu1 %vm2349_vm0, %v7657_v16  ;;  %v2789_v16 = vsel %vm865_vm1, %v7741_v47, inf }
 0x564   : > { %v7757_v12 = vpop.f32.mrf.mxu1 }
 0x565   : > { %v2801_v55 = vsel %vm865_vm1, %v7757_v12, inf  ;;  %v7858_v27 = vadd.f32 %v5934_v34, %v7757_v12 }
 0x566   : > { %2802 = vmin.xlane.f32.xlu1 %v2801_v55  ;;  %v7801_v55 = vadd.f32 %v5934_v34, %v7722_v58 }
 0x567   : > { %5721 = vmatmul.msk.f32.gmra.mxu1 %vm2349_vm0, %v7659_v7 }
 0x56c   : > { %v7763_v22 = vpop.f32.mrf.mxu1 }
 0x56e   : > { %2796 = vmin.xlane.f32.xlu1 %v2795_v50  ;;  %v7804_v50 = vadd.f32 %v5934_v34, %v7716_v53 }
 0x56f   : > { %5722 = vmatmul.msk.f32.gmra.mxu1 %vm2349_vm0, %v7661_v9  ;;  %v2804_v9 = vsel %vm865_vm1, %v7763_v22, inf }
 0x574   : > { %v7769_v49 = vpop.f32.mrf.mxu1 }
 0x575   : > { %v2807_v26 = vsel %vm865_vm1, %v7769_v49, inf  ;;  %v7855_v52 = vadd.f32 %v5934_v34, %v7769_v49 }
 0x576   : > { %2790 = vmin.xlane.f32.xlu1 %v2789_v16  ;;  %2808 = vmin.xlane.f32.xlu2 %v2807_v26  ;;  %v2675_v16 = vsel %vm865_vm1, %v7801_v55, -inf  ;;  %v2786_v26 = vsel %vm865_vm1, %v7737_v33, inf }
 0x577   : > { %5723 = vmatmul.msk.f32.gmra.mxu1 %vm2349_vm0, %v7653_v41  ;;  %v2798_v41 = vsel %vm865_vm1, %v7753_v54, inf }
 0x57c   : > { %v7777_v7 = vpop.f32.mrf.mxu1 }
 0x57d   : > { %v2810_v31 = vsel %vm865_vm1, %v7777_v7, inf  ;;  %v7870_v13 = vadd.f32 %v5934_v34, %v7777_v7 }
 0x57e   : > { %2784 = vmin.xlane.f32.xlu1 %v2783_v19  ;;  %2805 = vmin.xlane.f32.xlu2 %v2804_v9  ;;  %v2669_v19 = vsel %vm865_vm1, %v7804_v50, -inf  ;;  %v7813_v9 = vadd.f32 %v5934_v34, %v7731_v37 }
 0x57f   : > { %2811 = vmin.xlane.f32.xlu0 %v2810_v31  ;;  %v7816_v31 = vadd.f32 %v5934_v34, %v7725_v62  ;;  %v2714_v11 = vsel %vm865_vm1, %v7870_v13, -inf }
 0x586   : > { %2775 = vmin.xlane.f32.xlu1 %v2774_v51  ;;  %2799 = vmin.xlane.f32.xlu2 %v2798_v41  ;;  %v2684_v51 = vsel %vm865_vm1, %v7813_v9, -inf  ;;  %v2777_v41 = vsel %vm865_vm1, %v7728_v45, inf }
 0x587   : > { %2781 = vmin.xlane.f32.xlu0 %v2780_v30  ;;  %v2678_v30 = vsel %vm865_vm1, %v7816_v31, -inf }
 0x58e   : > { %2766 = vmin.xlane.f32.xlu1 %v2765_v2  ;;  %2793 = vmin.xlane.f32.xlu2 %v2792_v24  ;;  %v7825_v2 = vadd.f32 %v5934_v34, %v7741_v47  ;;  %v7828_v24 = vadd.f32 %v5934_v34, %v7734_v32 }
 0x58f   : > { %2772 = vmin.xlane.f32.xlu0 %v2771_v4 }
 0x590   : > { %v2693_v4 = vsel %vm865_vm1, %v7825_v2, -inf }
 0x596   : > { %2676 = vmax.xlane.f32.xlu1 %v2675_v16  ;;  %2787 = vmin.xlane.f32.xlu2 %v2786_v26  ;;  %v2768_v16 = vsel %vm865_vm1, %v7719_v44, inf  ;;  %v2687_v26 = vsel %vm865_vm1, %v7828_v24, -inf }
 0x597   : > { %2670 = vmax.xlane.f32.xlu0 %v2669_v19  ;;  %v7837_v19 = vadd.f32 %v5934_v34, %v7753_v54 }
 0x59e   : > { %2685 = vmax.xlane.f32.xlu1 %v2684_v51  ;;  %2778 = vmin.xlane.f32.xlu2 %v2777_v41  ;;  %v7840_v51 = vadd.f32 %v5934_v34, %v7719_v44  ;;  %v7843_v41 = vadd.f32 %v5934_v34, %v7745_v48 }
 0x59f   : > { %2679 = vmax.xlane.f32.xlu0 %v2678_v30  ;;  %v2702_v30 = vsel %vm865_vm1, %v7837_v19, -inf }
 0x5a6   : > { %2694 = vmax.xlane.f32.xlu1 %v2693_v4  ;;  %2769 = vmin.xlane.f32.xlu2 %v2768_v16  ;;  %v2672_v4 = vsel %vm865_vm1, %v7840_v51, -inf  ;;  %v2696_v16 = vsel %vm865_vm1, %v7843_v41, -inf }
 0x5a7   : > { %2688 = vmax.xlane.f32.xlu0 %v2687_v26  ;;  %v7852_v26 = vadd.f32 %v5934_v34, %v7728_v45 }
 0x5a9   : > { %v2681_v28 = vsel %vm865_vm1, %v7852_v26, -inf }
 0x5ae   : > { %2703 = vmax.xlane.f32.xlu1 %v2702_v30  ;;  %2673 = vmax.xlane.f32.xlu2 %v2672_v4  ;;  %v2711_v30 = vsel %vm865_vm1, %v7855_v52, -inf  ;;  %v2705_v4 = vsel %vm865_vm1, %v7858_v27, -inf }
 0x5af   : > { %2697 = vmax.xlane.f32.xlu0 %v2696_v16  ;;  %v7867_v16 = vadd.f32 %v5934_v34, %v7737_v33 }
 0x5b1   : > { %v2690_v23 = vsel %vm865_vm1, %v7867_v16, -inf }
 0x5b6   : > { %2682 = vmax.xlane.f32.xlu2 %v2681_v28  ;;  %2712 = vmax.xlane.f32.xlu1 %v2711_v30  ;;  %v7877_v28 = vadd.f32 %v5934_v34, %v7749_v3 }
 0x5b7   : > { %2706 = vmax.xlane.f32.xlu0 %v2705_v4  ;;  %v7882_v4 = vadd.f32 %v5934_v34, %v7763_v22 }
 0x5b8   : > { %v2699_v30 = vsel %vm865_vm1, %v7877_v28, -inf }
 0x5b9   : > { %v2708_v6 = vsel %vm865_vm1, %v7882_v4, -inf }
 0x5be   : > { %2691 = vmax.xlane.f32.xlu2 %v2690_v23 }
 0x5bf   : > { %2715 = vmax.xlane.f32.xlu0 %v2714_v11 }
 0x5c6   : > { %2700 = vmax.xlane.f32.xlu2 %v2699_v30 }
 0x5ce   : > { %2709 = vmax.xlane.f32.xlu2 %v2708_v6 }
 0x5d9   : > { %v2803_v18 = vpop.xlane.xlu1 %2802 }
 0x5da   : > { %v2825_v6 = vsub.f32 %v2803_v18, %v7757_v12 }
 0x5e1   : > { %v2797_v23 = vpop.xlane.xlu1 %2796 }
 0x5e2   : > { %v2823_v18 = vsub.f32 %v2797_v23, %v7749_v3 }
 0x5e9   : > { %v2809_v17 = vpop.xlane.xlu2 %2808  ;;  %v2791_v0 = vpop.xlane.xlu1 %2790 }
 0x5ea   : > { %v2827_v59 = vsub.f32 %v2809_v17, %v7769_v49  ;;  %v2821_v3 = vsub.f32 %v2791_v0, %v7741_v47 }
 0x5ec   : > { %v2857_v63 = vmul.f32 1.442695, %v2827_v59  ;;  %v2853_v59 = vmul.f32 1.442695, %v2825_v6 }
 0x5f1   : > { %v2806_v61 = vpop.xlane.xlu2 %2805  ;;  %v2785_v40 = vpop.xlane.xlu1 %2784 }
 0x5f2   : > { %v2812_v11 = vpop.xlane.xlu0 %2811  ;;  %v2826_v30 = vsub.f32 %v2806_v61, %v7763_v22 }
 0x5f3   : > { %v2828_v38 = vsub.f32 %v2812_v11, %v7777_v7 }
 0x5f4   : > { %v2855_v21 = vmul.f32 1.442695, %v2826_v30 }
 0x5f5   : > { %v2859_v5 = vmul.f32 1.442695, %v2828_v38 }
 0x5f7   : > { %6040 = vpow2.f32 %v2859_v5 }
 0x5f8   : > { %6042 = vpow2.f32 %v2857_v63 }
 0x5f9   : > { %v2800_v34 = vpop.xlane.xlu2 %2799  ;;  %6044 = vpow2.f32 %v2855_v21  ;;  %v2776_v21 = vpop.xlane.xlu1 %2775 }
 0x5fa   : > { %v7889_v25 = vpop.xlane.xlu0 %2781  ;;  %v2824_v42 = vsub.f32 %v2800_v34, %v7753_v54  ;;  %6046 = vpow2.f32 %v2853_v59  ;;  %v2819_v59 = vsub.f32 %v2785_v40, %v7734_v32 }
 0x5fc   : > { %v2851_v17 = vmul.f32 1.442695, %v2824_v42  ;;  %v2849_v42 = vmul.f32 1.442695, %v2823_v18 }
 0x5fd   : > { %v7892_v1 = vpop.eup %6040 }
 0x5fe   : > { %5642 = vmatpush.xpose.msk.msra.mxu0 %vm865_vm1, %v7892_v1  ;;  %5894 = vmatpush.xpose.msk.msra.mxu2 %vm865_vm1, %v7892_v1  ;;  %v7899_v38 = vpop.eup %6042  ;;  %6048 = vpow2.f32 %v2851_v17 }
 0x5ff   : > { %v7907_v12 = vpop.eup %6044 }
 0x600   : > { %v7915_v7 = vpop.eup %6046 }
 0x601   : > { %v2794_v5 = vpop.xlane.xlu2 %2793 }
 0x602   : > { %v2773_v61 = vpop.xlane.xlu0 %2772  ;;  %5643 = vmatpush.xpose.msk.msra.mxu0 %vm865_vm1, %v7899_v38  ;;  %5895 = vmatpush.xpose.msk.msra.mxu2 %vm865_vm1, %v7899_v38  ;;  %v2822_v22 = vsub.f32 %v2794_v5, %v7745_v48 }
 0x603   : > { %v2815_v63 = vsub.f32 %v2773_v61, %v7722_v58  ;;  %v2816_v58 = vsub.f32 %v2776_v21, %v7725_v62  ;;  %v2845_v62 = vmul.f32 1.442695, %v2821_v3 }
 0x604   : > { %v2847_v23 = vmul.f32 1.442695, %v2822_v22  ;;  %v7922_v11 = vpop.eup %6048 }
 0x605   : > { %v2833_v54 = vmul.f32 1.442695, %v2815_v63  ;;  %v2835_v30 = vmul.f32 1.442695, %v2816_v58  ;;  %v2818_v63 = vsub.f32 %v7889_v25, %v7731_v37  ;;  %v2767_v25 = vpop.xlane.xlu1 %2766 }
 0x606   : > { %5644 = vmatpush.xpose.msk.msra.mxu0 %vm865_vm1, %v7907_v12  ;;  %5896 = vmatpush.xpose.msk.msra.mxu2 %vm865_vm1, %v7907_v12  ;;  %v2813_v3 = vsub.f32 %v2767_v25, %v7716_v53 }
 0x607   : > { %6050 = vpow2.f32 %v2833_v54  ;;  %v2839_v32 = vmul.f32 1.442695, %v2818_v63 }
 0x608   : > { %6052 = vpow2.f32 %v2849_v42 }
 0x609   : > { %v2788_v49 = vpop.xlane.xlu2 %2787  ;;  %6054 = vpow2.f32 %v2847_v23 }
 0x60a   : > { %5645 = vmatpush.xpose.msk.msra.mxu0 %vm865_vm1, %v7915_v7  ;;  %5897 = vmatpush.xpose.msk.msra.mxu2 %vm865_vm1, %v7915_v7  ;;  %v2820_v34 = vsub.f32 %v2788_v49, %v7737_v33  ;;  %6056 = vpow2.f32 %v2835_v30  ;;  %v2671_v58 = vpop.xlane.xlu0 %2670 }
 0x60b   : > { %6058 = vpow2.f32 %v2845_v62  ;;  %v2717_v62 = vsub.f32 %v7804_v50, %v2671_v58 }
 0x60c   : > { %v2843_v5 = vmul.f32 1.442695, %v2820_v34 }
 0x60d   : > { %v7924_v48 = vpop.eup %6050  ;;  %v2677_v49 = vpop.xlane.xlu1 %2676 }
 0x60e   : > { %5646 = vmatpush.xpose.msk.msra.mxu0 %vm865_vm1, %v7922_v11  ;;  %5898 = vmatpush.xpose.msk.msra.mxu2 %vm865_vm1, %v7922_v11  ;;  %v7933_v47 = vpop.eup %6052  ;;  %v2719_v30 = vsub.f32 %v7801_v55, %v2677_v49 }
 0x60f   : > { %5677 = vmatmul.msk.f32.vlgmr.msrb.gmra.mxu3 %vm865_vm1, %v7924_v48  ;;  %v7941_v61 = vpop.eup %6054 }
 0x610   : > { %v6057_v17 = vpop.eup %6056  ;;  %v2737_v34 = vmul.f32 1.442695, %v2719_v30  ;;  %v8025_v30 = vpop.f32.mrf.mxu1 }
 0x611   : > { %v2779_v0 = vpop.xlane.xlu2 %2778  ;;  %v7950_v40 = vpop.eup %6058 }
 0x612   : > { %v2817_v6 = vsub.f32 %v2779_v0, %v7728_v45  ;;  %5647 = vmatpush.xpose.msk.msra.mxu0 %vm865_vm1, %v7933_v47  ;;  %5899 = vmatpush.xpose.msk.msra.mxu2 %vm865_vm1, %v7933_v47  ;;  %v2841_v45 = vmul.f32 1.442695, %v2819_v59  ;;  %v2680_v59 = vpop.xlane.xlu0 %2679 }
 0x613   : > { %v2720_v55 = vsub.f32 %v7816_v31, %v2680_v59 }
 0x614   : > { %v2837_v33 = vmul.f32 1.442695, %v2817_v6  ;;  %v2733_v6 = vmul.f32 1.442695, %v2717_v62 }
 0x616   : > { %6060 = vpow2.f32 %v2837_v33  ;;  %5648 = vmatpush.xpose.msk.msra.mxu0 %vm865_vm1, %v7941_v61  ;;  %5900 = vmatpush.xpose.msk.msra.mxu2 %vm865_vm1, %v7941_v61  ;;  %v2739_v33 = vmul.f32 1.442695, %v2720_v55 }
 0x617   : > { %6062 = vpow2.f32 %v2843_v5  ;;  %5678 = vmatmul.msk.f32.gmra.mxu3 %vm865_vm1, %v6057_v17 }
 0x618   : > { %6064 = vpow2.f32 %v2841_v45 }
 0x619   : > { %6066 = vpow2.f32 %v2839_v32  ;;  %v2770_v21 = vpop.xlane.xlu2 %2769 }
 0x61a   : > { %5649 = vmatpush.xpose.msk.msra.mxu0 %vm865_vm1, %v7950_v40  ;;  %5901 = vmatpush.xpose.msk.msra.mxu2 %vm865_vm1, %v7950_v40  ;;  %v2814_v22 = vsub.f32 %v2770_v21, %v7719_v44  ;;  %v2829_v44 = vmul.f32 1.442695, %v2813_v3 }
 0x61c   : > { %v6061_v18 = vpop.eup %6060  ;;  %v2831_v23 = vmul.f32 1.442695, %v2814_v22 }
 0x61d   : > { %v6063_v54 = vpop.eup %6062 }
 0x61e   : > { %5650 = vmatpush.xpose.msk.msra.mxu0 %vm865_vm1, %v6063_v54  ;;  %5902 = vmatpush.xpose.msk.msra.mxu2 %vm865_vm1, %v6063_v54  ;;  %v6065_v37 = vpop.eup %6064  ;;  %6068 = vpow2.f32 %v2831_v23 }
 0x61f   : > { %5679 = vmatmul.msk.f32.gmra.mxu3 %vm865_vm1, %v6061_v18  ;;  %v6067_v42 = vpop.eup %6066  ;;  %6070 = vpow2.f32 %v2829_v44 }
 0x620   : > { %6072 = vpow2.f32 %v2737_v34 }
 0x621   : > { %v2674_v0 = vpop.xlane.xlu2 %2673  ;;  %6074 = vpow2.f32 %v2733_v6  ;;  %v8036_v6 = vpop.f32.mrf.mxu1 }
 0x622   : > { %5651 = vmatpush.xpose.msk.msra.mxu0 %vm865_vm1, %v6065_v37  ;;  %5903 = vmatpush.xpose.msk.msra.mxu2 %vm865_vm1, %v6065_v37  ;;  %v2718_v50 = vsub.f32 %v7840_v51, %v2674_v0  ;;  %6076 = vpow2.f32 %v2739_v33  ;;  %v9251_v33 = vld [vmem:[#allocation10_spill] sm:$0xff] }
 0x624   : > { %v6069_v53 = vpop.eup %6068 }
 0x625   : > { %v6071_v5 = vpop.eup %6070 }
 0x626   : > { %5652 = vmatpush.xpose.msk.msra.mxu0 %vm865_vm1, %v6067_v42  ;;  %5904 = vmatpush.xpose.msk.msra.mxu2 %vm865_vm1, %v6067_v42 }
 0x627   : > { %5680 = vmatmul.msk.f32.gmra.mxu3 %vm865_vm1, %v6067_v42 }
 0x629   : > { %v2683_v45 = vpop.xlane.xlu2 %2682 }
 0x62a   : > { %5653 = vmatpush.xpose.msk.msra.mxu0 %vm865_vm1, %v6061_v18  ;;  %5905 = vmatpush.xpose.msk.msra.mxu2 %vm865_vm1, %v6061_v18  ;;  %v2721_v51 = vsub.f32 %v7852_v26, %v2683_v45  ;;  %v2686_v18 = vpop.xlane.xlu1 %2685 }
 0x62b   : > { %v2722_v25 = vsub.f32 %v7813_v9, %v2686_v18 }
 0x62c   : > { %v2741_v63 = vmul.f32 1.442695, %v2721_v51 }
 0x62d   : > { %v2743_v26 = vmul.f32 1.442695, %v2722_v25 }
 0x62e   : > { %5654 = vmatpush.xpose.msk.msra.mxu0 %vm865_vm1, %v6057_v17  ;;  %5906 = vmatpush.xpose.msk.msra.mxu2 %vm865_vm1, %v6057_v17  ;;  %v2735_v17 = vmul.f32 1.442695, %v2718_v50  ;;  %v8044_v50 = vpop.f32.mrf.mxu1 }
 0x62f   : > { %5681 = vmatmul.msk.f32.gmra.mxu3 %vm865_vm1, %v6065_v37  ;;  %v2689_v37 = vpop.xlane.xlu0 %2688 }
 0x630   : > { %6078 = vpow2.f32 %v2735_v17 }
 0x631   : > { %6080 = vpow2.f32 %v2741_v63  ;;  %v9252_v63 = vld [vmem:[#allocation12_spill] sm:$0xff] }
 0x632   : > { %5655 = vmatpush.xpose.msk.msra.mxu0 %vm865_vm1, %v7924_v48  ;;  %5907 = vmatpush.xpose.msk.msra.mxu2 %vm865_vm1, %v7924_v48  ;;  %v6073_v48 = vpop.eup %6072  ;;  %6082 = vpow2.f32 %v2743_v26  ;;  %v2695_v42 = vpop.xlane.xlu1 %2694 }
 0x633   : > { %v6075_v31 = vpop.eup %6074  ;;  %v3361_v23 = vmul.f32 %v6073_v48, %v6600_v35 }
 0x634   : > { %v6077_v32 = vpop.eup %6076 }
 0x636   : > { %5656 = vmatpush.xpose.msk.msra.mxu0 %vm865_vm1, %v6069_v53  ;;  %5908 = vmatpush.xpose.msk.msra.mxu2 %vm865_vm1, %v6069_v53 }
 0x637   : > { %5682 = vmatmul.msk.f32.gmra.mxu3 %vm865_vm1, %v6063_v54  ;;  %v6079_v54 = vpop.eup %6078 }
 0x638   : > { %v3360_v58 = vmul.f32 %v6079_v54, %v6593_v20 }
 0x63a   : > { %5657 = vmatpush.xpose.msk.msra.mxu0 %vm865_vm1, %v6071_v5  ;;  %5909 = vmatpush.xpose.msk.msra.mxu2 %vm865_vm1, %v6071_v5  ;;  %v2704_v44 = vpop.xlane.xlu1 %2703 }
 0x63b   : > { %v2728_v0 = vsub.f32 %v7837_v19, %v2704_v44 }
 0x63d   : > { %5658 = vmatmul.msk.f32.vlgmr.msra.gmra.mxu0 %vm865_vm1, %v6075_v31  ;;  %5660 = vmatmul.msk.f32.vlgmr.msra.gmra.mxu2 %vm865_vm1, %v6073_v48 }
 0x63e   : > { %5674 = vmatpush.msk.msrb.mxu0 %vm1535_vm5, %v9203_v36 }
 0x63f   : > { %5683 = vmatmul.msk.f32.gmra.mxu3 %vm865_vm1, %v7950_v40  ;;  %v2723_v40 = vsub.f32 %v7828_v24, %v2689_v37  ;;  %v9253_v37 = vld [vmem:[#allocation11_spill] sm:$0xff] }
 0x640   : > { %5691 = vmatpush.msk.msra.mxu0 %vm1535_vm5, %v9203_v36  ;;  %v6081_v36 = vpop.eup %6080 }
 0x641   : > { %v2745_v9 = vmul.f32 1.442695, %v2723_v40  ;;  %v6083_v21 = vpop.eup %6082 }
 0x642   : > { %v3364_v17 = vmul.f32 %v6083_v21, %v9251_v33  ;;  %v2713_v51 = vpop.xlane.xlu1 %2712 }
 0x643   : > { %6084 = vpow2.f32 %v2745_v9  ;;  %v2731_v18 = vsub.f32 %v7855_v52, %v2713_v51  ;;  %v9254_v52 = vld [vmem:[#allocation13_spill] sm:$0xff] }
 0x645   : > { %5659 = vmatmul.msk.f32.gmra.mxu0 %vm865_vm1, %v6079_v54  ;;  %5661 = vmatmul.msk.f32.gmra.mxu2 %vm865_vm1, %v6077_v32  ;;  %v2761_v54 = vmul.f32 1.442695, %v2731_v18 }
 0x647   : > { %5684 = vmatmul.msk.f32.gmra.mxu3 %vm865_vm1, %v7941_v61  ;;  %v2692_v61 = vpop.xlane.xlu2 %2691 }
 0x648   : > { %v2724_v24 = vsub.f32 %v7867_v16, %v2692_v61  ;;  %v2698_v16 = vpop.xlane.xlu0 %2697 }
 0x649   : > { %v6085_v22 = vpop.eup %6084  ;;  %v2726_v49 = vsub.f32 %v7843_v41, %v2698_v16 }
 0x64d   : > { %5662 = vmatmul.msk.f32.gmra.mxu2 %vm865_vm1, %v6081_v36  ;;  %5675 = vmatmul.msk.f32.vlgmr.msrb.gmra.mxu0 %vm865_vm1, %v6071_v5 }
 0x64e   : > { %3504 = vmatpush.msrb.mxu0 %v7687_v56  ;;  %v2747_v56 = vmul.f32 1.442695, %v2724_v24 }
 0x64f   : > { %5685 = vmatmul.msk.f32.gmra.mxu3 %vm865_vm1, %v7933_v47  ;;  %v9250_v47 = vld [vmem:[#allocation8_spill] sm:$0xff]  ;;  %v2701_v3 = vpop.xlane.xlu2 %2700 }
 0x650   : > { %3505 = vmatpush.msrb.mxu0 %v7692_v29  ;;  %v3359_v29 = vmul.f32 %v6075_v31, %v9250_v47  ;;  %6086 = vpow2.f32 %v2747_v56  ;;  %v2727_v62 = vsub.f32 %v7877_v28, %v2701_v3  ;;  %v2755_v28 = vmul.f32 1.442695, %v2728_v0  ;;  %v2707_v59 = vpop.xlane.xlu0 %2706  ;;  %v8050_v31 = vpop.f32.mrf.mxu1 }
 0x651   : > { %v2729_v55 = vsub.f32 %v7858_v27, %v2707_v59  ;;  %v3365_v27 = vmul.f32 %v6085_v22, %v9252_v63 }
 0x652   : > { %3506 = vmatpush.msrb.mxu0 %v7699_v15  ;;  %v2725_v15 = vsub.f32 %v7825_v2, %v2695_v42  ;;  %v2751_v2 = vmul.f32 1.442695, %v2726_v49  ;;  %v2753_v41 = vmul.f32 1.442695, %v2727_v62 }
 0x653   : > { %v2757_v19 = vmul.f32 1.442695, %v2729_v55 }
 0x654   : > { %3507 = vmatpush.msrb.mxu0 %v7705_v14  ;;  %v2749_v14 = vmul.f32 1.442695, %v2725_v15 }
 0x655   : > { %5663 = vmatmul.msk.f32.gmra.mxu2 %vm865_vm1, %v6083_v21  ;;  %5676 = vmatmul.msk.f32.gmra.mxu0 %vm865_vm1, %v6069_v53 }
 0x656   : > { %6088 = vpow2.f32 %v2749_v14 }
 0x657   : > { %5686 = vmatmul.msk.f32.gmra.mxu3 %vm865_vm1, %v7922_v11  ;;  %v6087_v11 = vpop.eup %6086  ;;  %6090 = vpow2.f32 %v2751_v2  ;;  %v2710_v5 = vpop.xlane.xlu2 %2709 }
 0x658   : > { %6092 = vpow2.f32 %v2753_v41  ;;  %v2716_v26 = vpop.xlane.xlu0 %2715  ;;  %v8059_v40 = vpop.f32.mrf.mxu1 }
 0x659   : > { %6094 = vpow2.f32 %v2755_v28  ;;  %v2732_v9 = vsub.f32 %v7870_v13, %v2716_v26 }
 0x65a   : > { %6096 = vpow2.f32 %v2757_v19 }
 0x65b   : > { %v2763_v61 = vmul.f32 1.442695, %v2732_v9 }
 0x65d   : > { %5664 = vmatmul.msk.f32.gmra.mxu2 %vm865_vm1, %v6085_v22  ;;  %5692 = vmatmul.msk.f32.vlgmr.msra.gmra.mxu0 %vm865_vm1, %v3359_v29  ;;  %v9255_v22 = vld [vmem:[#allocation14_spill] sm:$0xff] }
 0x65f   : > { %5687 = vmatmul.msk.f32.gmra.mxu3 %vm865_vm1, %v7915_v7  ;;  %v6089_v7 = vpop.eup %6088 }
 0x660   : > { %v6091_v34 = vpop.eup %6090  ;;  %v3367_v24 = vmul.f32 %v6089_v7, %v9254_v52  ;;  %v8069_v29 = vpop.f32.mrf.mxu1 }
 0x661   : > { %v6093_v53 = vpop.eup %6092  ;;  %v3368_v15 = vmul.f32 %v6091_v34, %v9255_v22 }
 0x662   : > { %v6095_v48 = vpop.eup %6094 }
 0x663   : > { %v3370_v3 = vmul.f32 %v6095_v48, %v6812_v46 }
 0x665   : > { %5665 = vmatmul.msk.f32.gmra.mxu2 %vm865_vm1, %v6087_v11  ;;  %5693 = vmatmul.msk.f32.gmra.mxu0 %vm865_vm1, %v3360_v58  ;;  %v9256_v58 = vld [vmem:[#allocation15_spill] sm:$0xff] }
 0x667   : > { %5688 = vmatmul.msk.f32.gmra.mxu3 %vm865_vm1, %v7907_v12  ;;  %v3362_v12 = vmul.f32 %v6077_v32, %v6636_v10  ;;  %v6097_v32 = vpop.eup %6096 }
 0x668   : > { %v3530_v13 = vpop.f32.mrf.mxu1  ;;  %v3371_v62 = vmul.f32 %v6097_v32, %v6824_v60 }
 0x66d   : > { %5666 = vmatmul.msk.f32.gmra.mxu2 %vm865_vm1, %v6089_v7  ;;  %5694 = vmatmul.msk.f32.gmra.mxu0 %vm865_vm1, %v3361_v23 }
 0x66f   : > { %5689 = vmatmul.msk.f32.gmra.mxu3 %vm865_vm1, %v7899_v38  ;;  %v3363_v38 = vmul.f32 %v6081_v36, %v6626_v57 }
 0x670   : > { %v3533_v2 = vpop.f32.mrf.mxu1 }
 0x675   : > { %5667 = vmatmul.msk.f32.gmra.mxu2 %vm865_vm1, %v6091_v34  ;;  %5695 = vmatmul.msk.f32.gmra.mxu0 %vm865_vm1, %v3362_v12  ;;  %v9257_v34 = vld [vmem:[#allocation16_spill] sm:$0xff] }
 0x677   : > { %5690 = vmatmul.msk.f32.gmra.mxu3 %vm865_vm1, %v7892_v1  ;;  %v2730_v1 = vsub.f32 %v7882_v4, %v2710_v5  ;;  %v3366_v4 = vmul.f32 %v6087_v11, %v9253_v37  ;;  %v3369_v11 = vmul.f32 %v6093_v53, %v9256_v58 }
 0x678   : > { %v3536_v41 = vpop.f32.mrf.mxu1 }
 0x679   : > { %v2759_v45 = vmul.f32 1.442695, %v2730_v1 }
 0x67b   : > { %6098 = vpow2.f32 %v2759_v45 }
 0x67c   : > { %6100 = vpow2.f32 %v2761_v54 }
 0x67d   : > { %5668 = vmatmul.msk.f32.gmra.mxu2 %vm865_vm1, %v6093_v53  ;;  %5696 = vmatmul.msk.f32.gmra.mxu0 %vm865_vm1, %v3363_v38  ;;  %6102 = vpow2.f32 %v2763_v61  ;;  %v9258_v53 = vld [vmem:[#allocation17_spill] sm:$0xff] }
 0x680   : > { %v3539_v28 = vpop.f32.mrf.mxu1 }
 0x681   : > { %v6099_v36 = vpop.eup %6098 }
 0x682   : > { %v6101_v56 = vpop.eup %6100  ;;  %v3372_v0 = vmul.f32 %v6099_v36, %v9257_v34 }
 0x683   : > { %v6103_v14 = vpop.eup %6102  ;;  %v3373_v55 = vmul.f32 %v6101_v56, %v9258_v53 }
 0x685   : > { %5669 = vmatmul.msk.f32.gmra.mxu2 %vm865_vm1, %v6095_v48  ;;  %5697 = vmatmul.msk.f32.gmra.mxu0 %vm865_vm1, %v3364_v17  ;;  %v3374_v48 = vmul.f32 %v6103_v14, %v6861_v39 }
 0x688   : > { %v3542_v19 = vpop.f32.mrf.mxu1 }
 0x68d   : > { %5670 = vmatmul.msk.f32.gmra.mxu2 %vm865_vm1, %v6097_v32  ;;  %5698 = vmatmul.msk.f32.gmra.mxu0 %vm865_vm1, %v3365_v27 }
 0x690   : > { %v3545_v51 = vpop.f32.mrf.mxu1 }
 0x692   : > { %v8056_v25 = vpop.f32.mrf.mxu3 }
 0x695   : > { %5671 = vmatmul.msk.f32.gmra.mxu2 %vm865_vm1, %v6099_v36  ;;  %5699 = vmatmul.msk.f32.gmra.mxu0 %vm865_vm1, %v3366_v4 }
 0x698   : > { %v3548_v18 = vpop.f32.mrf.mxu1 }
 0x69a   : > { %v8064_v21 = vpop.f32.mrf.mxu3 }
 0x69d   : > { %5672 = vmatmul.msk.f32.gmra.mxu2 %vm865_vm1, %v6101_v56  ;;  %5700 = vmatmul.msk.f32.gmra.mxu0 %vm865_vm1, %v3367_v24 }
 0x6a0   : > { %v3551_v4 = vpop.f32.mrf.mxu1 }
 0x6a2   : > { %v8071_v42 = vpop.f32.mrf.mxu3 }
 0x6a5   : > { %5673 = vmatmul.msk.f32.gmra.mxu2 %vm865_vm1, %v6103_v14  ;;  %5701 = vmatmul.msk.f32.gmra.mxu0 %vm865_vm1, %v3368_v15 }
 0x6a8   : > { %v3554_v61 = vpop.f32.mrf.mxu1 }
 0x6aa   : > { %v3326_v16 = vpop.f32.mrf.mxu3 }
 0x6ad   : > { %5702 = vmatmul.msk.f32.gmra.mxu0 %vm865_vm1, %v3369_v11 }
 0x6b2   : > { %v3329_v49 = vpop.f32.mrf.mxu3 }
 0x6b5   : > { %5703 = vmatmul.msk.f32.gmra.mxu0 %vm865_vm1, %v3370_v3 }
 0x6ba   : > { %v3332_v23 = vpop.f32.mrf.mxu3  ;;  %v8080_v7 = vpop.f32.mrf.mxu0 }
 0x6bb   : > { %v3564_v53 = vmul.f32 %v3530_v13, %v3332_v23  ;;  %v3559_v13 = vmul.f32 %v8036_v6, %v8056_v25 }
 0x6bd   : > { %5704 = vmatmul.msk.f32.gmra.mxu0 %vm865_vm1, %v3371_v62 }
 0x6c2   : > { %v3335_v44 = vpop.f32.mrf.mxu3  ;;  %v8084_v12 = vpop.f32.mrf.mxu0 }
 0x6c5   : > { %5705 = vmatmul.msk.f32.gmra.mxu0 %vm865_vm1, %v3372_v0 }
 0x6ca   : > { %v3338_v59 = vpop.f32.mrf.mxu3  ;;  %v8088_v38 = vpop.f32.mrf.mxu0 }
 0x6cd   : > { %5706 = vmatmul.msk.f32.gmra.mxu0 %vm865_vm1, %v3373_v55  ;;  %v3566_v55 = vmul.f32 %v3536_v41, %v3338_v59 }
 0x6d2   : > { %v3341_v5 = vpop.f32.mrf.mxu3  ;;  %v3314_v17 = vpop.f32.mrf.mxu0 }
 0x6d3   : > { %v3567_v0 = vmul.f32 %v3539_v28, %v3341_v5 }
 0x6d5   : > { %5707 = vmatmul.msk.f32.gmra.mxu0 %vm865_vm1, %v3374_v48  ;;  %v3565_v48 = vmul.f32 %v3533_v2, %v3335_v44  ;;  %v3560_v2 = vmul.f32 %v8044_v50, %v8064_v21  ;;  %v3022_v50 = vmax.f32 %v8080_v7, 1e-37 }
 0x6d7   : > { %6104 = vrcp.f32 %v3022_v50  ;;  %vm3043_vm8 = vweird.f32 %v3022_v50 }
 0x6da   : > { %v3344_v1 = vpop.f32.mrf.mxu3  ;;  %v8094_v45 = vpop.f32.mrf.mxu0 }
 0x6db   : > { %v3568_v62 = vmul.f32 %v3542_v19, %v3344_v1  ;;  %v3561_v19 = vmul.f32 %v8050_v31, %v8071_v42  ;;  %v2980_v42 = vpop.f32.mrf.mxu2 }
 0x6dc   : > { %v8135_v59 = vmax.f32 %v2980_v42, 1e-37 }
 0x6dd   : > { %5708 = vmatmul.msk.f32.vlgmr.msrb.gmra.mxu0 %vm2349_vm0, %v7636_v8  ;;  %v6105_v41 = vpop.eup %6104 }
 0x6de   : > { %v3039_v44 = vmul.f32 %v6105_v41, %v3022_v50  ;;  %vm3044_vm7 = vweird.f32 %v6105_v41  ;;  %vm3073_vm2 = vweird.f32 %v8135_v59 }
 0x6df   : > { %vm3045_vm9 = vmor %vm3043_vm8, %vm3044_vm7 }
 0x6e2   : > { %v3347_v27 = vpop.f32.mrf.mxu3  ;;  %v8098_v32 = vpop.f32.mrf.mxu0 }
 0x6e3   : > { %v3569_v8 = vmul.f32 %v3545_v51, %v3347_v27  ;;  %v3562_v51 = vmul.f32 %v8059_v40, %v3326_v16  ;;  %v2983_v23 = vpop.f32.mrf.mxu2 }
 0x6ea   : > { %v3350_v54 = vpop.f32.mrf.mxu3  ;;  %v8100_v26 = vpop.f32.mrf.mxu0 }
 0x6eb   : > { %v3570_v11 = vmul.f32 %v3548_v18, %v3350_v54  ;;  %v2986_v6 = vpop.f32.mrf.mxu2  ;;  %v8140_v18 = vmax.f32 %v2983_v23, 1e-37 }
 0x6ed   : > { %vm3088_vm7 = vweird.f32 %v8140_v18 }
 0x6f2   : > { %v3353_v36 = vpop.f32.mrf.mxu3  ;;  %v8102_v9 = vpop.f32.mrf.mxu0 }
 0x6f3   : > { %v3571_v14 = vmul.f32 %v3551_v4, %v3353_v36  ;;  %v3563_v4 = vmul.f32 %v8069_v29, %v3329_v49  ;;  %v3558_v29 = vmul.f32 %v8025_v30, %v3314_v17  ;;  %v3023_v30 = vmax.f32 %v8084_v12, 1e-37  ;;  %v2989_v5 = vpop.f32.mrf.mxu2 }
 0x6f5   : > { %6106 = vrcp.f32 %v3023_v30  ;;  %vm3058_vm12 = vweird.f32 %v3023_v30  ;;  %v3062_v23 = vand.u32 2147483647, %v3023_v30 }
 0x6f6   : > { %6108 = vrcp.f32 %v8135_v59 }
 0x6f7   : > { %6110 = vrcp.f32 %v8140_v18  ;;  %vm3063_vm14 = vcmp.eq.f32.partialorder %v3062_v23, 8.507059e+37  ;;  %v3092_v23 = vand.u32 2147483647, %v8140_v18 }
 0x6fa   : > { %v3356_v24 = vpop.f32.mrf.mxu3  ;;  %v8104_v56 = vpop.f32.mrf.mxu0 }
 0x6fb   : > { %v3572_v15 = vmul.f32 %v3554_v61, %v3356_v24  ;;  %v6107_v1 = vpop.eup %6106  ;;  %v3049_v24 = vand.u32 2147483648, %v3022_v50 }
 0x6fc   : > { %v3054_v27 = vmul.f32 %v6107_v1, %v3023_v30  ;;  %v6109_v61 = vpop.eup %6108  ;;  %vm3059_vm11 = vweird.f32 %v6107_v1 }
 0x6fd   : > { %3573 = vmatpush.msrb.mxu2 %v3572_v15  ;;  %v3047_v15 = vand.u32 2147483647, %v3022_v50  ;;  %vm3060_vm13 = vmor %vm3058_vm12, %vm3059_vm11  ;;  %vm3074_vm15 = vweird.f32 %v6109_v61 }
 0x6fe   : > { %v3055_v12 = vsub.f32 1.0, %v3054_v27  ;;  %vm3075_vm3 = vmor %vm3073_vm2, %vm3074_vm15 }
 0x6ff   : > { %3574 = vmatpush.msrb.mxu2 %v3571_v14  ;;  %v2992_v14 = vpop.f32.mrf.mxu2  ;;  %vm3048_vm10 = vcmp.eq.f32.partialorder %v3047_v15, 8.507059e+37 }
 0x701   : > { %3575 = vmatpush.msrb.mxu2 %v3570_v11  ;;  %v3069_v11 = vmul.f32 %v6109_v61, %v8135_v59 }
 0x702   : > { %v8106_v3 = vpop.f32.mrf.mxu0 }
 0x703   : > { %3576 = vmatpush.msrb.mxu2 %v3569_v8 }
 0x705   : > { %3577 = vmatpush.msrb.mxu2 %v3568_v62  ;;  %v3056_v62 = vmul.f32 %v6107_v1, %v3055_v12 }
 0x707   : > { %3578 = vmatpush.msrb.mxu2 %v3567_v0  ;;  %v3050_v0 = vor.u32 1.1754944e-38, %v3049_v24  ;;  %v9259_v24 = vld [vmem:[#allocation4_spill] sm:$0xff] }
 0x709   : > { %3579 = vmatpush.msrb.mxu2 %v3566_v55  ;;  %v8146_v55 = vmax.f32 %v2986_v6, 1e-37  ;;  %v2995_v6 = vpop.f32.mrf.mxu2 }
 0x70a   : > { %v8108_v39 = vpop.f32.mrf.mxu0 }
 0x70b   : > { %3580 = vmatpush.msrb.mxu2 %v3565_v48  ;;  %6112 = vrcp.f32 %v8146_v55  ;;  %vm3103_vm11 = vweird.f32 %v8146_v55 }
 0x70d   : > { %3581 = vmatpush.msrb.mxu2 %v3564_v53  ;;  %v3040_v53 = vsub.f32 1.0, %v3039_v44 }
 0x70f   : > { %3582 = vmatpush.msrb.mxu2 %v3563_v4  ;;  %v3041_v7 = vmul.f32 %v6105_v41, %v3040_v53  ;;  %v3070_v4 = vsub.f32 1.0, %v3069_v11  ;;  %v3077_v11 = vand.u32 2147483647, %v8135_v59 }
 0x711   : > { %3583 = vmatpush.msrb.mxu2 %v3562_v51  ;;  %v3042_v54 = vadd.f32 %v6105_v41, %v3041_v7  ;;  %v3071_v44 = vmul.f32 %v6109_v61, %v3070_v4  ;;  %v8152_v7 = vmax.f32 %v2989_v5, 1e-37  ;;  %vm3078_vm4 = vcmp.eq.f32.partialorder %v3077_v11, 8.507059e+37 }
 0x712   : > { %v8114_v28 = vpop.f32.mrf.mxu0 }
 0x713   : > { %3584 = vmatpush.msrb.mxu2 %v3561_v19  ;;  %v3046_v8 = vsel %vm3045_vm9, %v6105_v41, %v3042_v54  ;;  %v3057_v19 = vadd.f32 %v6107_v1, %v3056_v62  ;;  %v3072_v54 = vadd.f32 %v6109_v61, %v3071_v44  ;;  %6114 = vrcp.f32 %v8152_v7 }
 0x714   : > { %v3051_v48 = vsel %vm3048_vm10, %v3050_v0, %v3046_v8  ;;  %v2998_v0 = vpop.f32.mrf.mxu2  ;;  %vm3093_vm9 = vcmp.eq.f32.partialorder %v3092_v23, 8.507059e+37  ;;  %v8168_v44 = vmax.f32 %v2995_v6, 1e-37  ;;  %v9262_v23 = vld [vmem:[#allocation9_spill] sm:$0xff]  ;;  %vm3118_vm15 = vweird.f32 %v8152_v7 }
 0x715   : > { %3585 = vmatpush.msrb.mxu2 %v3560_v2  ;;  %v6111_v2 = vpop.eup %6110  ;;  %v3278_v42 = vmul.f32 %v7052_v43, %v3051_v48  ;;  %v3061_v41 = vsel %vm3060_vm13, %v6107_v1, %v3057_v19  ;;  %v3076_v5 = vsel %vm3075_vm3, %v6109_v61, %v3072_v54  ;;  %v8160_v48 = vmax.f32 %v2992_v14, 1e-37 }
 0x716   : > { %v3084_v50 = vmul.f32 %v6111_v2, %v8140_v18  ;;  %v6113_v12 = vpop.eup %6112  ;;  %vm3089_vm6 = vweird.f32 %v6111_v2 }
 0x717   : > { %3586 = vmatpush.msrb.mxu2 %v3559_v13  ;;  %v3099_v1 = vmul.f32 %v6113_v12, %v8146_v55  ;;  %6116 = vrcp.f32 %v8160_v48  ;;  %vm3090_vm8 = vmor %vm3088_vm7, %vm3089_vm6  ;;  %vm3104_vm10 = vweird.f32 %v6113_v12  ;;  %vm3133_vm6 = vweird.f32 %v8160_v48 }
 0x718   : > { %v3085_v27 = vsub.f32 1.0, %v3084_v50  ;;  %6118 = vrcp.f32 %v8168_v44  ;;  %vm3105_vm12 = vmor %vm3103_vm11, %vm3104_vm10  ;;  %vm3148_vm10 = vweird.f32 %v8168_v44 }
 0x719   : > { %3587 = vmatpush.msrb.mxu2 %v3558_v29  ;;  %v3064_v29 = vand.u32 2147483648, %v3023_v30  ;;  %v3079_v30 = vand.u32 2147483648, %v8135_v59  ;;  %v3094_v59 = vand.u32 2147483648, %v8140_v18  ;;  %v3109_v18 = vand.u32 2147483648, %v8146_v55 }
 0x71a   : > { %v8121_v40 = vpop.f32.mrf.mxu0  ;;  %v3086_v8 = vmul.f32 %v6111_v2, %v3085_v27 }
 0x71b   : > { %v3065_v53 = vor.u32 1.1754944e-38, %v3064_v29  ;;  %v3080_v62 = vor.u32 1.1754944e-38, %v3079_v30  ;;  %v9260_v29 = vld [vmem:[#allocation2_spill] sm:$0xff] }
 0x71c   : > { %v3087_v19 = vadd.f32 %v6111_v2, %v3086_v8  ;;  %v3001_v27 = vpop.f32.mrf.mxu2  ;;  %v3110_v8 = vor.u32 1.1754944e-38, %v3109_v18 }
 0x71d   : > { %v3081_v4 = vsel %vm3078_vm4, %v3080_v62, %v3076_v5  ;;  %v8176_v62 = vmax.f32 %v2998_v0, 1e-37 }
 0x71e   : > { %v3091_v14 = vsel %vm3090_vm8, %v6111_v2, %v3087_v19 }
 0x71f   : > { %6120 = vrcp.f32 %v8176_v62 }
 0x722   : > { %v8123_v16 = vpop.f32.mrf.mxu0 }
 0x72a   : > { %v8125_v31 = vpop.f32.mrf.mxu0 }
 0x732   : > { %v8127_v49 = vpop.f32.mrf.mxu0 }
 0x73a   : > { %v8130_v21 = vpop.f32.mrf.mxu0 }
 0x742   : > { %v8133_v25 = vpop.f32.mrf.mxu0 }
 0x74a   : > { %v8137_v17 = vpop.f32.mrf.mxu0 }
 0x752   : > { %v8142_v36 = vpop.f32.mrf.mxu0 }
 0x75a   : > { %v3509_v51 = vpop.f32.mrf.mxu0 }
 0x75b   : > { %v3557_v13 = vmul.f32 %v3509_v51, %v8088_v38  ;;  %v3066_v38 = vsel %vm3063_vm14, %v3065_v53, %v3061_v41  ;;  %v3100_v51 = vsub.f32 1.0, %v3099_v1  ;;  %v3095_v41 = vor.u32 1.1754944e-38, %v3094_v59 }
 0x75c   : > { %v3279_v15 = vmul.f32 %v9259_v24, %v3066_v38  ;;  %v3107_v1 = vand.u32 2147483647, %v8146_v55  ;;  %v3004_v55 = vpop.f32.mrf.mxu2 }
 0x75d   : > { %3588 = vmatpush.msrb.mxu2 %v3557_v13  ;;  %v6115_v13 = vpop.eup %6114  ;;  %v3101_v50 = vmul.f32 %v6113_v12, %v3100_v51  ;;  %v3096_v53 = vsel %vm3093_vm9, %v3095_v41, %v3091_v14  ;;  %v3122_v14 = vand.u32 2147483647, %v8152_v7 }
 0x75e   : > { %3589 = vmatmul.f32.vlgmr.msrb.gmra.mxu2 %v3278_v42  ;;  %v3280_v42 = vmul.f32 %v9260_v29, %v3081_v4  ;;  %v3114_v61 = vmul.f32 %v6115_v13, %v8152_v7  ;;  %v6117_v30 = vpop.eup %6116  ;;  %vm3108_vm13 = vcmp.eq.f32.partialorder %v3107_v1, 8.507059e+37  ;;  %vm3119_vm14 = vweird.f32 %v6115_v13 }
 0x75f   : > { %v3102_v54 = vadd.f32 %v6113_v12, %v3101_v50  ;;  %v3129_v2 = vmul.f32 %v6117_v30, %v8160_v48  ;;  %v6119_v59 = vpop.eup %6118  ;;  %vm3120_vm2 = vmor %vm3118_vm15, %vm3119_vm14  ;;  %vm3123_vm3 = vcmp.eq.f32.partialorder %v3122_v14, 8.507059e+37  ;;  %vm3134_vm4 = vweird.f32 %v6117_v30 }
 0x760   : > { %v3115_v38 = vsub.f32 1.0, %v3114_v61  ;;  %v3139_v1 = vand.u32 2147483648, %v8160_v48  ;;  %vm3135_vm7 = vmor %vm3133_vm6, %vm3134_vm4  ;;  %vm3149_vm9 = vweird.f32 %v6119_v59  ;;  %vm3163_vm14 = vweird.f32 %v8176_v62 }
 0x761   : > { %v3106_v6 = vsel %vm3105_vm12, %v6113_v12, %v3102_v54  ;;  %v3130_v51 = vsub.f32 1.0, %v3129_v2  ;;  %v3144_v12 = vmul.f32 %v6119_v59, %v8168_v44  ;;  %vm3150_vm11 = vmor %vm3148_vm10, %vm3149_vm9 }
 0x762   : > { %v3116_v5 = vmul.f32 %v6115_v13, %v3115_v38  ;;  %v3111_v4 = vsel %vm3108_vm13, %v3110_v8, %v3106_v6  ;;  %v3137_v6 = vand.u32 2147483647, %v8160_v48  ;;  %v3154_v48 = vand.u32 2147483648, %v8168_v44 }
 0x763   : > { %v3282_v61 = vmul.f32 %v9262_v23, %v3111_v4  ;;  %v3131_v50 = vmul.f32 %v6117_v30, %v3130_v51  ;;  %v3145_v54 = vsub.f32 1.0, %v3144_v12  ;;  %v3140_v4 = vor.u32 1.1754944e-38, %v3139_v1  ;;  %v9264_v12 = vld [vmem:[#allocation20_spill] sm:$0xff] }
 0x764   : > { %v3117_v19 = vadd.f32 %v6115_v13, %v3116_v5  ;;  %vm3138_vm8 = vcmp.eq.f32.partialorder %v3137_v6, 8.507059e+37  ;;  %v8192_v51 = vmax.f32 %v3004_v55, 1e-37 }
 0x765   : > { %v3132_v18 = vadd.f32 %v6117_v30, %v3131_v50  ;;  %v3146_v8 = vmul.f32 %v6119_v59, %v3145_v54  ;;  %v3152_v50 = vand.u32 2147483647, %v8168_v44  ;;  %v3169_v44 = vand.u32 2147483648, %v8176_v62 }
 0x766   : > { %3592 = vmatmul.f32.gmra.mxu2 %v3279_v15  ;;  %v9261_v15 = vld [vmem:[#allocation3_spill] sm:$0xff]  ;;  %v3121_v0 = vsel %vm3120_vm2, %v6115_v13, %v3117_v19  ;;  %vm3193_vm9 = vweird.f32 %v8192_v51 }
 0x767   : > { %v3281_v11 = vmul.f32 %v9261_v15, %v3096_v53  ;;  %v8184_v53 = vmax.f32 %v3001_v27, 1e-37  ;;  %v3007_v27 = vpop.f32.mrf.mxu2  ;;  %v3136_v5 = vsel %vm3135_vm7, %v6117_v30, %v3132_v18  ;;  %vm3153_vm12 = vcmp.eq.f32.partialorder %v3152_v50, 8.507059e+37 }
 0x768   : > { %v3141_v19 = vsel %vm3138_vm8, %v3140_v4, %v3136_v5  ;;  %v8200_v18 = vmax.f32 %v3007_v27, 1e-37  ;;  %v9265_v5 = vld [vmem:[#allocation21_spill] sm:$0xff]  ;;  %v3167_v4 = vand.u32 2147483647, %v8176_v62 }
 0x769   : > { %6122 = vrcp.f32 %v8184_v53  ;;  %vm3178_vm4 = vweird.f32 %v8184_v53 }
 0x76a   : > { %6124 = vrcp.f32 %v8192_v51  ;;  %vm3168_vm2 = vcmp.eq.f32.partialorder %v3167_v4, 8.507059e+37 }
 0x76b   : > { %6126 = vrcp.f32 %v8200_v18 }
 0x76e   : > { %3595 = vmatmul.f32.gmra.mxu2 %v3280_v42  ;;  %v3124_v42 = vand.u32 2147483648, %v8152_v7  ;;  %v9263_v7 = vld [vmem:[#allocation19_spill] sm:$0xff] }
 0x76f   : > { %v3010_v54 = vpop.f32.mrf.mxu2 }
 0x770   : > { %v3125_v41 = vor.u32 1.1754944e-38, %v3124_v42 }
 0x772   : > { %v3126_v38 = vsel %vm3123_vm3, %v3125_v41, %v3121_v0  ;;  %v3284_v0 = vmul.f32 %v9264_v12, %v3141_v19 }
 0x773   : > { %v3283_v2 = vmul.f32 %v9263_v7, %v3126_v38  ;;  %v3155_v38 = vor.u32 1.1754944e-38, %v3154_v48 }
 0x776   : > { %3598 = vmatmul.f32.gmra.mxu2 %v3281_v11  ;;  %v6121_v11 = vpop.eup %6120 }
 0x777   : > { %v3159_v13 = vmul.f32 %v6121_v11, %v8176_v62  ;;  %v6123_v14 = vpop.eup %6122  ;;  %vm3164_vm13 = vweird.f32 %v6121_v11  ;;  %v3013_v50 = vpop.f32.mrf.mxu2  ;;  %v3184_v62 = vand.u32 2147483648, %v8184_v53 }
 0x778   : > { %v3174_v30 = vmul.f32 %v6123_v14, %v8184_v53  ;;  %vm3165_vm15 = vmor %vm3163_vm14, %vm3164_vm13  ;;  %vm3179_vm3 = vweird.f32 %v6123_v14  ;;  %vm3208_vm13 = vweird.f32 %v8200_v18 }
 0x779   : > { %v3160_v42 = vsub.f32 1.0, %v3159_v13  ;;  %v6125_v13 = vpop.eup %6124  ;;  %vm3180_vm6 = vmor %vm3178_vm4, %vm3179_vm3 }
 0x77a   : > { %vm3194_vm8 = vweird.f32 %v6125_v13 }
 0x77b   : > { %v3161_v41 = vmul.f32 %v6121_v11, %v3160_v42  ;;  %v3170_v42 = vor.u32 1.1754944e-38, %v3169_v44  ;;  %v8216_v44 = vmax.f32 %v3013_v50, 1e-37  ;;  %vm3195_vm10 = vmor %vm3193_vm9, %vm3194_vm8 }
 0x77d   : > { %v3162_v6 = vadd.f32 %v6121_v11, %v3161_v41  ;;  %v9266_v41 = vld [vmem:[#allocation22_spill] sm:$0xff]  ;;  %vm3238_vm8 = vweird.f32 %v8216_v44 }
 0x77e   : > { %3601 = vmatmul.f32.gmra.mxu2 %v3282_v61  ;;  %v3147_v61 = vadd.f32 %v6119_v59, %v3146_v8 }
 0x77f   : > { %v3166_v27 = vsel %vm3165_vm15, %v6121_v11, %v3162_v6  ;;  %v3185_v6 = vor.u32 1.1754944e-38, %v3184_v62 }
 0x780   : > { %v3151_v55 = vsel %vm3150_vm11, %v6119_v59, %v3147_v61  ;;  %v3189_v59 = vmul.f32 %v6125_v13, %v8192_v51  ;;  %v8208_v61 = vmax.f32 %v3010_v54, 1e-37  ;;  %v3171_v48 = vsel %vm3168_vm2, %v3170_v42, %v3166_v27  ;;  %v9267_v42 = vld [vmem:[#allocation23_spill] sm:$0xff] }
 0x781   : > { %v3156_v1 = vsel %vm3153_vm12, %v3155_v38, %v3151_v55  ;;  %v6127_v55 = vpop.eup %6126  ;;  %v3286_v38 = vmul.f32 %v9266_v41, %v3171_v48 }
 0x782   : > { %v3285_v8 = vmul.f32 %v9265_v5, %v3156_v1  ;;  %v3182_v1 = vand.u32 2147483647, %v8184_v53  ;;  %6128 = vrcp.f32 %v8208_v61  ;;  %v3204_v11 = vmul.f32 %v6127_v55, %v8200_v18  ;;  %v3016_v53 = vpop.f32.mrf.mxu2 }
 0x783   : > { %6130 = vrcp.f32 %v8216_v44  ;;  %v8224_v62 = vmax.f32 %v3016_v53, 1e-37  ;;  %vm3209_vm12 = vweird.f32 %v6127_v55  ;;  %vm3223_vm3 = vweird.f32 %v8208_v61 }
 0x784   : > { %vm3183_vm7 = vcmp.eq.f32.partialorder %v3182_v1, 8.507059e+37  ;;  %v3205_v4 = vsub.f32 1.0, %v3204_v11  ;;  %vm3210_vm14 = vmor %vm3208_vm13, %vm3209_vm12 }
 0x785   : > { %6132 = vrcp.f32 %v8224_v62  ;;  %vm3253_vm12 = vweird.f32 %v8224_v62 }
 0x786   : > { %3604 = vmatmul.f32.gmra.mxu2 %v3283_v2  ;;  %v3175_v2 = vsub.f32 1.0, %v3174_v30  ;;  %v3206_v50 = vmul.f32 %v6127_v55, %v3205_v4 }
 0x788   : > { %v3176_v19 = vmul.f32 %v6123_v14, %v3175_v2  ;;  %v6129_v27 = vpop.eup %6128 }
 0x789   : > { %vm3224_vm2 = vweird.f32 %v6129_v27 }
 0x78a   : > { %v3177_v30 = vadd.f32 %v6123_v14, %v3176_v19  ;;  %v3199_v19 = vand.u32 2147483648, %v8192_v51  ;;  %v3019_v4 = vpop.f32.mrf.mxu2  ;;  %vm3225_vm4 = vmor %vm3223_vm3, %vm3224_vm2 }
 0x78c   : > { %v3181_v54 = vsel %vm3180_vm6, %v6123_v14, %v3177_v30  ;;  %v3219_v14 = vmul.f32 %v6129_v27, %v8208_v61  ;;  %v3200_v30 = vor.u32 1.1754944e-38, %v3199_v19 }
 0x78e   : > { %3607 = vmatmul.f32.gmra.mxu2 %v3284_v0  ;;  %v3190_v0 = vsub.f32 1.0, %v3189_v59  ;;  %v3220_v11 = vsub.f32 1.0, %v3219_v14 }
 0x790   : > { %v3191_v2 = vmul.f32 %v6125_v13, %v3190_v0  ;;  %v3221_v19 = vmul.f32 %v6129_v27, %v3220_v11 }
 0x792   : > { %v3192_v59 = vadd.f32 %v6125_v13, %v3191_v2  ;;  %v6131_v2 = vpop.eup %6130 }
 0x794   : > { %v3196_v0 = vsel %vm3195_vm10, %v6125_v13, %v3192_v59  ;;  %v3234_v13 = vmul.f32 %v6131_v2, %v8216_v44 }
 0x796   : > { %3610 = vmatmul.f32.gmra.mxu2 %v3285_v8  ;;  %v3186_v8 = vsel %vm3183_vm7, %v3185_v6, %v3181_v54  ;;  %v3207_v54 = vadd.f32 %v6127_v55, %v3206_v50  ;;  %v3214_v6 = vand.u32 2147483648, %v8200_v18  ;;  %v3235_v14 = vsub.f32 1.0, %v3234_v13  ;;  %v6133_v50 = vpop.eup %6132 }
 0x797   : > { %v3287_v48 = vmul.f32 %v9267_v42, %v3186_v8  ;;  %v3212_v42 = vand.u32 2147483647, %v8200_v18  ;;  %v9269_v18 = vld [vmem:[#allocation25_spill] sm:$0xff]  ;;  %vm3239_vm7 = vweird.f32 %v6131_v2 }
 0x798   : > { %v3211_v59 = vsel %vm3210_vm14, %v6127_v55, %v3207_v54  ;;  %v3215_v53 = vor.u32 1.1754944e-38, %v3214_v6  ;;  %v3249_v55 = vmul.f32 %v6133_v50, %v8224_v62  ;;  %v3236_v11 = vmul.f32 %v6131_v2, %v3235_v14  ;;  %vm3240_vm9 = vmor %vm3238_vm8, %vm3239_vm7 }
 0x799   : > { %vm3213_vm15 = vcmp.eq.f32.partialorder %v3212_v42, 8.507059e+37 }
 0x79a   : > { %v3237_v13 = vadd.f32 %v6131_v2, %v3236_v11 }
 0x79e   : > { %3613 = vmatmul.f32.gmra.mxu2 %v3286_v38  ;;  %v3197_v38 = vand.u32 2147483647, %v8192_v51  ;;  %v9268_v51 = vld [vmem:[#allocation24_spill] sm:$0xff] }
 0x7a0   : > { %vm3198_vm11 = vcmp.eq.f32.partialorder %v3197_v38, 8.507059e+37  ;;  %v3216_v38 = vsel %vm3213_vm15, %v3215_v53, %v3211_v59  ;;  %v3244_v59 = vand.u32 2147483648, %v8216_v44 }
 0x7a1   : > { %v3201_v1 = vsel %vm3198_vm11, %v3200_v30, %v3196_v0  ;;  %v3222_v0 = vadd.f32 %v6129_v27, %v3221_v19  ;;  %v3229_v30 = vand.u32 2147483648, %v8208_v61  ;;  %v9270_v19 = vld [vmem:[#allocation26_spill] sm:$0xff]  ;;  %vm3254_vm11 = vweird.f32 %v6133_v50 }
 0x7a2   : > { %v3288_v8 = vmul.f32 %v9268_v51, %v3201_v1  ;;  %v3289_v1 = vmul.f32 %v9269_v18, %v3216_v38  ;;  %v3227_v51 = vand.u32 2147483647, %v8208_v61  ;;  %v3242_v61 = vand.u32 2147483647, %v8216_v44  ;;  %vm3255_vm13 = vmor %vm3253_vm12, %vm3254_vm11 }
 0x7a3   : > { %v3226_v42 = vsel %vm3225_vm4, %v6129_v27, %v3222_v0  ;;  %v3230_v54 = vor.u32 1.1754944e-38, %v3229_v30  ;;  %v3241_v27 = vsel %vm3240_vm9, %v6131_v2, %v3237_v13  ;;  %v3245_v0 = vor.u32 1.1754944e-38, %v3244_v59 }
 0x7a4   : > { %vm3228_vm6 = vcmp.eq.f32.partialorder %v3227_v51, 8.507059e+37  ;;  %vm3243_vm10 = vcmp.eq.f32.partialorder %v3242_v61, 8.507059e+37 }
 0x7a5   : > { %v3231_v6 = vsel %vm3228_vm6, %v3230_v54, %v3226_v42  ;;  %v3246_v51 = vsel %vm3243_vm10, %v3245_v0, %v3241_v27  ;;  %v9271_v42 = vld [vmem:[#allocation30_spill] sm:$0xff]  ;;  %v3257_v54 = vand.u32 2147483647, %v8224_v62  ;;  %v9273_v0 = vld [vmem:[#allocation32_spill] sm:$0xff] }
 0x7a6   : > { %3616 = vmatmul.f32.gmra.mxu2 %v3287_v48  ;;  %v3037_v48 = vmax.f32 %v3019_v4, 1e-37  ;;  %v3290_v53 = vmul.f32 %v9270_v19, %v3231_v6  ;;  %v3291_v11 = vmul.f32 %v9271_v42, %v3246_v51 }
 0x7a7   : > { %vm3258_vm14 = vcmp.eq.f32.partialorder %v3257_v54, 8.507059e+37 }
 0x7a8   : > { %6134 = vrcp.f32 %v3037_v48  ;;  %v3274_v59 = vand.u32 2147483648, %v3037_v48  ;;  %vm3268_vm2 = vweird.f32 %v3037_v48 }
 0x7ae   : > { %3619 = vmatmul.f32.gmra.mxu2 %v3288_v8  ;;  %v3250_v8 = vsub.f32 1.0, %v3249_v55  ;;  %v6135_v4 = vpop.eup %6134  ;;  %v3259_v55 = vand.u32 2147483648, %v8224_v62 }
 0x7af   : > { %v3264_v38 = vmul.f32 %v6135_v4, %v3037_v48  ;;  %vm3269_vm15 = vweird.f32 %v6135_v4 }
 0x7b0   : > { %v3251_v14 = vmul.f32 %v6133_v50, %v3250_v8  ;;  %v3260_v2 = vor.u32 1.1754944e-38, %v3259_v55  ;;  %vm3270_vm3 = vmor %vm3268_vm2, %vm3269_vm15 }
 0x7b1   : > { %v3265_v30 = vsub.f32 1.0, %v3264_v38  ;;  %v3272_v38 = vand.u32 2147483647, %v3037_v48 }
 0x7b3   : > { %v3266_v6 = vmul.f32 %v6135_v4, %v3265_v30  ;;  %vm3273_vm4 = vcmp.eq.f32.partialorder %v3272_v38, 8.507059e+37 }
 0x7b5   : > { %v3267_v13 = vadd.f32 %v6135_v4, %v3266_v6 }
 0x7b6   : > { %3622 = vmatmul.f32.gmra.mxu2 %v3289_v1  ;;  %v3252_v1 = vadd.f32 %v6133_v50, %v3251_v14  ;;  %v3275_v14 = vor.u32 1.1754944e-38, %v3274_v59 }
 0x7b7   : > { %v3271_v27 = vsel %vm3270_vm3, %v6135_v4, %v3267_v13 }
 0x7b8   : > { %v3256_v44 = vsel %vm3255_vm13, %v6133_v50, %v3252_v1  ;;  %v3276_v62 = vsel %vm3273_vm4, %v3275_v14, %v3271_v27 }
 0x7b9   : > { %v3261_v8 = vsel %vm3258_vm14, %v3260_v2, %v3256_v44  ;;  %v3293_v51 = vmul.f32 %v9273_v0, %v3276_v62 }
 0x7be   : > { %3625 = vmatmul.f32.gmra.mxu2 %v3290_v53  ;;  %v9272_v53 = vld [vmem:[#allocation31_spill] sm:$0xff] }
 0x7bf   : > { %v3292_v61 = vmul.f32 %v9272_v53, %v3261_v8 }
 0x7c6   : > { %3628 = vmatmul.f32.gmra.mxu2 %v3291_v11 }
 0x7ce   : > { %3631 = vmatmul.f32.gmra.mxu2 %v3292_v61 }
 0x7d6   : > { %3634 = vmatmul.f32.gmra.mxu2 %v3293_v51 }
 0x7e1   : > { %v3590_v50 = vpop.f32.mrf.mxu2 }
 0x7e2   : > { %v3638_v30 = vmul.f32 %v3590_v50, %v8094_v45 }
 0x7e4   : > { %3674 = vmatmul.f32.vlgmr.msra.gmra.mxu3 %v3638_v30 }
 0x7e9   : > { %v3593_v1 = vpop.f32.mrf.mxu2 }
 0x7ea   : > { %v3639_v55 = vmul.f32 %v3593_v1, %v8098_v32 }
 0x7ec   : > { %3677 = vmatmul.f32.gmra.mxu3 %v3639_v55 }
 0x7f1   : > { %v3596_v11 = vpop.f32.mrf.mxu2 }
 0x7f2   : > { %v3640_v48 = vmul.f32 %v3596_v11, %v8100_v26 }
 0x7f4   : > { %3680 = vmatmul.f32.gmra.mxu3 %v3640_v48 }
 0x7f9   : > { %v3599_v54 = vpop.f32.mrf.mxu2 }
 0x7fa   : > { %v3641_v4 = vmul.f32 %v3599_v54, %v8102_v9 }
 0x7fc   : > { %3683 = vmatmul.f32.gmra.mxu3 %v3641_v4 }
 0x801   : > { %v3602_v44 = vpop.f32.mrf.mxu2 }
 0x802   : > { %v3642_v6 = vmul.f32 %v3602_v44, %v8104_v56 }
 0x804   : > { %3686 = vmatmul.f32.gmra.mxu3 %v3642_v6 }
 0x809   : > { %v3605_v2 = vpop.f32.mrf.mxu2 }
 0x80a   : > { %v3643_v45 = vmul.f32 %v3605_v2, %v8106_v3 }
 0x80c   : > { %3689 = vmatmul.f32.gmra.mxu3 %v3643_v45 }
 0x811   : > { %v3608_v8 = vpop.f32.mrf.mxu2 }
 0x812   : > { %v3644_v32 = vmul.f32 %v3608_v8, %v8108_v39 }
 0x814   : > { %3692 = vmatmul.f32.gmra.mxu3 %v3644_v32 }
 0x819   : > { %v3611_v13 = vpop.f32.mrf.mxu2 }
 0x81a   : > { %v3645_v26 = vmul.f32 %v3611_v13, %v8114_v28 }
 0x81c   : > { %3695 = vmatmul.f32.gmra.mxu3 %v3645_v26 }
 0x821   : > { %v3614_v59 = vpop.f32.mrf.mxu2 }
 0x822   : > { %v3646_v9 = vmul.f32 %v3614_v59, %v8121_v40 }
 0x824   : > { %3698 = vmatmul.f32.gmra.mxu3 %v3646_v9 }
 0x829   : > { %v3617_v61 = vpop.f32.mrf.mxu2 }
 0x82a   : > { %v3647_v56 = vmul.f32 %v3617_v61, %v8123_v16 }
 0x82c   : > { %3701 = vmatmul.f32.gmra.mxu3 %v3647_v56 }
 0x831   : > { %v3620_v38 = vpop.f32.mrf.mxu2 }
 0x832   : > { %v3648_v3 = vmul.f32 %v3620_v38, %v8125_v31 }
 0x834   : > { %3704 = vmatmul.f32.gmra.mxu3 %v3648_v3 }
 0x839   : > { %v3623_v27 = vpop.f32.mrf.mxu2 }
 0x83a   : > { %v3649_v39 = vmul.f32 %v3623_v27, %v8127_v49 }
 0x83c   : > { %3707 = vmatmul.f32.gmra.mxu3 %v3649_v39 }
 0x841   : > { %v3626_v14 = vpop.f32.mrf.mxu2 }
 0x842   : > { %v3650_v28 = vmul.f32 %v3626_v14, %v8130_v21 }
 0x844   : > { %3710 = vmatmul.f32.gmra.mxu3 %v3650_v28 }
 0x849   : > { %v3629_v62 = vpop.f32.mrf.mxu2 }
 0x84a   : > { %v3651_v40 = vmul.f32 %v3629_v62, %v8133_v25 }
 0x84c   : > { %3713 = vmatmul.f32.gmra.mxu3 %v3651_v40 }
 0x851   : > { %v3632_v51 = vpop.f32.mrf.mxu2 }
 0x852   : > { %v3652_v16 = vmul.f32 %v3632_v51, %v8137_v17  ;;  %v8266_v17 = vld [vmem:[%s9060_s12] ss:$0 sm:$0xff] }
 0x854   : > { %3716 = vmatmul.f32.gmra.mxu3 %v3652_v16 }
 0x859   : > { %v3635_v50 = vpop.f32.mrf.mxu2 }
 0x85a   : > { %v3653_v31 = vmul.f32 %v3635_v50, %v8142_v36 }
 0x85c   : > { %3719 = vmatmul.f32.gmra.mxu3 %v3653_v31 }
 0x867   : > { %v3675_v30 = vpop.f32.mrf.mxu3 }
 0x868   : > { %v8272_v2 = vadd.f32 %v8266_v17, %v3675_v30 }
 0x86a   : > { %v3723_v13 = vmax.f32 %v8272_v2, 0.0 }
 0x86c   : > { %v3739_v3 = vsel %vm2349_vm0, %v3723_v13, 0.0 }
 0x86f   : > { %v3678_v1 = vpop.f32.mrf.mxu3 }
 0x870   : > { %v8269_v6 = vadd.f32 %v8266_v17, %v3678_v1 }
 0x872   : > { %v9168_v8 = vmax.f32 %v8269_v6, 0.0 }
 0x874   : > { %v3740_v9 = vsel %vm2349_vm0, %v9168_v8, 0.0 }
 0x875   : > { %v3741_v28 = vadd.f32 %v3740_v9, %v3739_v3 }
 0x877   : > { %v3681_v49 = vpop.f32.mrf.mxu3 }
 0x878   : > { %v8275_v45 = vadd.f32 %v8266_v17, %v3681_v49 }
 0x87a   : > { %v9167_v26 = vmax.f32 %v8275_v45, 0.0 }
 0x87c   : > { %v3742_v27 = vsel %vm2349_vm0, %v9167_v26, 0.0  ;;  %v9274_v26 = vld [vmem:[#allocation33_spill] sm:$0xff] }
 0x87d   : > { %v3743_v16 = vadd.f32 %v3742_v27, %v3741_v28 }
 0x87f   : > { %v3684_v55 = vpop.f32.mrf.mxu3 }
 0x880   : > { %v8279_v32 = vadd.f32 %v8266_v17, %v3684_v55 }
 0x882   : > { %v9165_v61 = vmax.f32 %v8279_v32, 0.0 }
 0x884   : > { %v3744_v62 = vsel %vm2349_vm0, %v9165_v61, 0.0 }
 0x885   : > { %v3745_v1 = vadd.f32 %v3744_v62, %v3743_v16 }
 0x887   : > { %v3687_v11 = vpop.f32.mrf.mxu3 }
 0x888   : > { %v8284_v59 = vadd.f32 %v8266_v17, %v3687_v11 }
 0x88a   : > { %v9164_v39 = vmax.f32 %v8284_v59, 0.0 }
 0x88c   : > { %v3746_v50 = vsel %vm2349_vm0, %v9164_v39, 0.0 }
 0x88f   : > { %v3690_v48 = vpop.f32.mrf.mxu3 }
 0x890   : > { %v8291_v56 = vadd.f32 %v8266_v17, %v3690_v48  ;;  %v3747_v48 = vadd.f32 %v3746_v50, %v3745_v1 }
 0x892   : > { %v9163_v40 = vmax.f32 %v8291_v56, 0.0 }
 0x894   : > { %v3748_v49 = vsel %vm2349_vm0, %v9163_v40, 0.0 }
 0x895   : > { %v3749_v3 = vadd.f32 %v3748_v49, %v3747_v48 }
 0x897   : > { %v3693_v21 = vpop.f32.mrf.mxu3 }
 0x898   : > { %v8301_v14 = vadd.f32 %v8266_v17, %v3693_v21 }
 0x89a   : > { %v9160_v31 = vmax.f32 %v8301_v14, 0.0 }
 0x89f   : > { %v3696_v54 = vpop.f32.mrf.mxu3 }
 0x8a0   : > { %v8308_v51 = vadd.f32 %v8266_v17, %v3696_v54  ;;  %v3750_v54 = vsel %vm2349_vm0, %v9160_v31, 0.0 }
 0x8a1   : > { %v3751_v62 = vadd.f32 %v3750_v54, %v3749_v3 }
 0x8a2   : > { %v9157_v55 = vmax.f32 %v8308_v51, 0.0 }
 0x8a4   : > { %v3752_v27 = vsel %vm2349_vm0, %v9157_v55, 0.0 }
 0x8a5   : > { %v3753_v1 = vadd.f32 %v3752_v27, %v3751_v62 }
 0x8a7   : > { %v3699_v4 = vpop.f32.mrf.mxu3 }
 0x8a8   : > { %v8315_v30 = vadd.f32 %v8266_v17, %v3699_v4 }
 0x8aa   : > { %v9156_v9 = vmax.f32 %v8315_v30, 0.0 }
 0x8ac   : > { %v3754_v16 = vsel %vm2349_vm0, %v9156_v9, 0.0 }
 0x8ad   : > { %v3755_v54 = vadd.f32 %v3754_v16, %v3753_v1 }
 0x8af   : > { %v3702_v44 = vpop.f32.mrf.mxu3 }
 0x8b0   : > { %v8322_v11 = vadd.f32 %v8266_v17, %v3702_v44 }
 0x8b2   : > { %v9158_v28 = vmax.f32 %v8322_v11, 0.0 }
 0x8b4   : > { %v3756_v49 = vsel %vm2349_vm0, %v9158_v28, 0.0 }
 0x8b5   : > { %v3757_v27 = vadd.f32 %v3756_v49, %v3755_v54 }
 0x8b7   : > { %v3705_v25 = vpop.f32.mrf.mxu3 }
 0x8b8   : > { %v8329_v4 = vadd.f32 %v8266_v17, %v3705_v25 }
 0x8ba   : > { %v9159_v50 = vmax.f32 %v8329_v4, 0.0 }
 0x8bc   : > { %v3758_v9 = vsel %vm2349_vm0, %v9159_v50, 0.0 }
 0x8bf   : > { %v3708_v36 = vpop.f32.mrf.mxu3 }
 0x8c0   : > { %v8336_v44 = vadd.f32 %v8266_v17, %v3708_v36 }
 0x8c2   : > { %v9161_v48 = vmax.f32 %v8336_v44, 0.0 }
 0x8c4   : > { %v3760_v62 = vsel %vm2349_vm0, %v9161_v48, 0.0 }
 0x8c7   : > { %v3711_v38 = vpop.f32.mrf.mxu3 }
 0x8c8   : > { %v8343_v25 = vadd.f32 %v8266_v17, %v3711_v38 }
 0x8ca   : > { %v9162_v55 = vmax.f32 %v8343_v25, 0.0 }
 0x8cc   : > { %v3762_v16 = vsel %vm2349_vm0, %v9162_v55, 0.0 }
 0x8cf   : > { %v3714_v21 = vpop.f32.mrf.mxu3 }
 0x8d0   : > { %v8350_v36 = vadd.f32 %v8266_v17, %v3714_v21  ;;  %v3759_v21 = vadd.f32 %v3758_v9, %v3757_v27 }
 0x8d2   : > { %v9166_v28 = vmax.f32 %v8350_v36, 0.0  ;;  %v3761_v50 = vadd.f32 %v3760_v62, %v3759_v21 }
 0x8d4   : > { %v3763_v31 = vadd.f32 %v3762_v16, %v3761_v50 }
 0x8d7   : > { %v3717_v3 = vpop.f32.mrf.mxu3 }
 0x8d8   : > { %v8357_v38 = vadd.f32 %v8266_v17, %v3717_v3  ;;  %v3764_v3 = vsel %vm2349_vm0, %v9166_v28, 0.0 }
 0x8d9   : > { %v3765_v9 = vadd.f32 %v3764_v3, %v3763_v31 }
 0x8da   : > { %v9169_v1 = vmax.f32 %v8357_v38, 0.0 }
 0x8dc   : > { %v3766_v54 = vsel %vm2349_vm0, %v9169_v1, 0.0 }
 0x8dd   : > { %v3767_v55 = vadd.f32 %v3766_v54, %v3765_v9 }
 0x8df   : > { %v3720_v49 = vpop.f32.mrf.mxu3 }
 0x8e0   : > { %v8374_v48 = vadd.f32 %v8266_v17, %v3720_v49  ;;  %v9275_v17 = vmax.f32 %v8269_v6, 0.0 }
 0x8e2   : > { %v3738_v27 = vmax.f32 %v8374_v48, 0.0  ;;  %v9276_v48 = vmax.f32 %v8275_v45, 0.0  ;;  %v9279_v45 = vmax.f32 %v8291_v56, 0.0 }
 0x8e4   : > { %v3768_v40 = vsel %vm2349_vm0, %v3738_v27, 0.0 }
 0x8e5   : > { %v3769_v62 = vadd.f32 %v3768_v40, %v3767_v55  ;;  %v9277_v40 = vmax.f32 %v8279_v32, 0.0 }
 0x8e7   : > { %v3770_v21 = vrot.slane %v3769_v62, 4 }
 0x8e9   : > { %v3771_v39 = vadd.f32 %v3770_v21, %v3769_v62  ;;  %v9280_v62 = vmax.f32 %v8301_v14, 0.0  ;;  %v9282_v14 = vmax.f32 %v8315_v30, 0.0  ;;  %v9284_v30 = vmax.f32 %v8329_v4, 0.0 }
 0x8ea   : > { %v9286_v4 = vmax.f32 %v8343_v25, 0.0  ;;  %v9288_v25 = vmax.f32 %v8357_v38, 0.0 }
 0x8eb   : > { %v3772_v61 = vrot.slane %v3771_v39, 2 }
 0x8ed   : > { %v3773_v28 = vadd.f32 %v3772_v61, %v3771_v39 }
 0x8ef   : > { %v3774_v50 = vrot.slane %v3773_v28, 1 }
 0x8f1   : > { %v3775_v16 = vadd.f32 %v3774_v50, %v3773_v28 }
 0x8f3   : > { %v3776_v8 = vmul.f32 %v3775_v16, %v9274_v26  ;;  %v9281_v16 = vmax.f32 %v8308_v51, 0.0  ;;  %v9283_v51 = vmax.f32 %v8322_v11, 0.0  ;;  %v9285_v11 = vmax.f32 %v8336_v44, 0.0 }
 0x8f4   : > { %v9287_v44 = vmax.f32 %v8350_v36, 0.0 }
 0x8f5   : > { %v8381_v1 = vsub.f32 %v3723_v13, %v3776_v8  ;;  %v8385_v31 = vsub.f32 %v9275_v17, %v3776_v8  ;;  %v8389_v3 = vsub.f32 %v9276_v48, %v3776_v8  ;;  %v8393_v55 = vsub.f32 %v9277_v40, %v3776_v8 }
 0x8f6   : > { %v9278_v13 = vmax.f32 %v8284_v59, 0.0  ;;  %v8407_v28 = vsub.f32 %v9279_v45, %v3776_v8  ;;  %v8415_v59 = vsub.f32 %v9280_v62, %v3776_v8  ;;  %v8422_v17 = vsub.f32 %v9281_v16, %v3776_v8 }
 0x8f7   : > { %v3793_v61 = vmul.f32 %v8381_v1, %v8381_v1  ;;  %v3794_v2 = vmul.f32 %v8385_v31, %v8385_v31  ;;  %v3795_v6 = vmul.f32 %v8389_v3, %v8389_v3  ;;  %v3796_v32 = vmul.f32 %v8393_v55, %v8393_v55 }
 0x8f8   : > { %v8401_v39 = vsub.f32 %v9278_v13, %v3776_v8  ;;  %v3798_v48 = vmul.f32 %v8407_v28, %v8407_v28  ;;  %v3799_v13 = vmul.f32 %v8415_v59, %v8415_v59  ;;  %v8443_v62 = vsub.f32 %v9284_v30, %v3776_v8 }
 0x8f9   : > { %v3809_v49 = vsel %vm2349_vm0, %v3793_v61, 0.0  ;;  %v3810_v54 = vsel %vm2349_vm0, %v3794_v2, 0.0  ;;  %v3812_v50 = vsel %vm2349_vm0, %v3795_v6, 0.0  ;;  %v3814_v40 = vsel %vm2349_vm0, %v3796_v32, 0.0 }
 0x8fa   : > { %v3811_v9 = vadd.f32 %v3810_v54, %v3809_v49  ;;  %v3797_v21 = vmul.f32 %v8401_v39, %v8401_v39  ;;  %v8429_v2 = vsub.f32 %v9282_v14, %v3776_v8  ;;  %v8436_v49 = vsub.f32 %v9283_v51, %v3776_v8 }
 0x8fb   : > { %v3800_v54 = vmul.f32 %v8422_v17, %v8422_v17  ;;  %v3818_v32 = vsel %vm2349_vm0, %v3798_v48, 0.0  ;;  %v8450_v16 = vsub.f32 %v9285_v11, %v3776_v8  ;;  %v8457_v14 = vsub.f32 %v9286_v4, %v3776_v8 }
 0x8fc   : > { %v3813_v56 = vadd.f32 %v3812_v50, %v3811_v9  ;;  %v3816_v6 = vsel %vm2349_vm0, %v3797_v21, 0.0  ;;  %v3801_v50 = vmul.f32 %v8429_v2, %v8429_v2  ;;  %v3820_v21 = vsel %vm2349_vm0, %v3799_v13, 0.0 }
 0x8fd   : > { %v3822_v48 = vsel %vm2349_vm0, %v3800_v54, 0.0  ;;  %v8464_v51 = vsub.f32 %v9287_v44, %v3776_v8  ;;  %v3791_v30 = vsub.f32 %v9288_v25, %v3776_v8  ;;  %v3792_v11 = vsub.f32 %v3738_v27, %v3776_v8 }
 0x8fe   : > { %v3815_v61 = vadd.f32 %v3814_v40, %v3813_v56  ;;  %v3802_v40 = vmul.f32 %v8436_v49, %v8436_v49  ;;  %v3824_v13 = vsel %vm2349_vm0, %v3801_v50, 0.0 }
 0x8ff   : > { %v3806_v36 = vmul.f32 %v8464_v51, %v8464_v51  ;;  %v3807_v4 = vmul.f32 %v3791_v30, %v3791_v30 }
 0x900   : > { %v3817_v45 = vadd.f32 %v3816_v6, %v3815_v61  ;;  %v3803_v6 = vmul.f32 %v8443_v62, %v8443_v62  ;;  %v3826_v54 = vsel %vm2349_vm0, %v3802_v40, 0.0 }
 0x901   : > { %v3834_v38 = vsel %vm2349_vm0, %v3806_v36, 0.0  ;;  %v3915_v36 = vld [vmem:[%s9063_s15 + $0x8] sm:$0xff] }
 0x902   : > { %v3819_v9 = vadd.f32 %v3818_v32, %v3817_v45  ;;  %v3804_v32 = vmul.f32 %v8450_v16, %v8450_v16 }
 0x904   : > { %v3821_v56 = vadd.f32 %v3820_v21, %v3819_v9  ;;  %v3805_v21 = vmul.f32 %v8457_v14, %v8457_v14 }
 0x906   : > { %v3823_v61 = vadd.f32 %v3822_v48, %v3821_v56  ;;  %v3828_v56 = vsel %vm2349_vm0, %v3803_v6, 0.0  ;;  %v3830_v48 = vsel %vm2349_vm0, %v3804_v32, 0.0  ;;  %v3832_v40 = vsel %vm2349_vm0, %v3805_v21, 0.0  ;;  %v3917_v32 = vld [vmem:[%s9063_s15 + $0x18] sm:$0xff]  ;;  %v3916_v21 = vld [vmem:[%s9063_s15 + $0x10] sm:$0xff] }
 0x907   : > { %3978 = vmatpush.msra.mxu0 %v3917_v32 }
 0x908   : > { %v3825_v45 = vadd.f32 %v3824_v13, %v3823_v61 }
 0x909   : > { %3979 = vmatpush.msra.mxu0 %v3916_v21 }
 0x90a   : > { %v3827_v9 = vadd.f32 %v3826_v54, %v3825_v45  ;;  %v3808_v45 = vmul.f32 %v3792_v11, %v3792_v11  ;;  %v3836_v54 = vsel %vm2349_vm0, %v3807_v4, 0.0 }
 0x90b   : > { %3980 = vmatpush.msra.mxu0 %v3915_v36 }
 0x90c   : > { %v3829_v50 = vadd.f32 %v3828_v56, %v3827_v9  ;;  %v3838_v6 = vsel %vm2349_vm0, %v3808_v45, 0.0 }
 0x90e   : > { %v3831_v61 = vadd.f32 %v3830_v48, %v3829_v50 }
 0x910   : > { %v3833_v13 = vadd.f32 %v3832_v40, %v3831_v61  ;;  %v3914_v61 = vld [vmem:[%s9063_s15] sm:$0xff] }
 0x911   : > { %3981 = vmatpush.msra.mxu0 %v3914_v61 }
 0x912   : > { %v3835_v44 = vadd.f32 %v3834_v38, %v3833_v13 }
 0x914   : > { %v3837_v25 = vadd.f32 %v3836_v54, %v3835_v44 }
 0x916   : > { %v3839_v8 = vadd.f32 %v3838_v6, %v3837_v25 }
 0x918   : > { %v3840_v27 = vrot.slane %v3839_v8, 4 }
 0x91a   : > { %v3841_v9 = vadd.f32 %v3840_v27, %v3839_v8  ;;  %v5936_v8 = vld [vmem:[%s9061_s13] ss:$0 sm:$0xff] }
 0x91c   : > { %v3842_v56 = vrot.slane %v3841_v9, 2 }
 0x91e   : > { %v3843_v50 = vadd.f32 %v3842_v56, %v3841_v9 }
 0x920   : > { %v3844_v48 = vrot.slane %v3843_v50, 1 }
 0x922   : > { %v3845_v4 = vadd.f32 %v3844_v48, %v3843_v50 }
 0x924   : > { %v3846_v40 = vmul.f32 %v3845_v4, %v9274_v26  ;;  %v5937_v26 = vld [vmem:[%s9062_s14] ss:$0 sm:$0xff] }
 0x926   : > { %v3847_v13 = vadd.f32 1e-05, %v3846_v40 }
 0x928   : > { %6136 = vrsqrt.f32 %v3847_v13  ;;  %vm3854_vm7 = vweird.f32 %v3847_v13 }
 0x92e   : > { %v6137_v45 = vpop.eup %6136 }
 0x92f   : > { %v3849_v38 = vmul.f32 %v6137_v45, %v3847_v13  ;;  %vm3855_vm6 = vweird.f32 %v6137_v45 }
 0x930   : > { %vm3856_vm8 = vmor %vm3854_vm7, %vm3855_vm6 }
 0x931   : > { %v3850_v44 = vmul.f32 %v6137_v45, %v3849_v38 }
 0x933   : > { %v3851_v54 = vmul.f32 0.5, %v3850_v44 }
 0x935   : > { %v3852_v25 = vsub.f32 1.5, %v3851_v54 }
 0x937   : > { %v3853_v6 = vmul.f32 %v6137_v45, %v3852_v25 }
 0x939   : > { %v3857_v27 = vsel %vm3856_vm8, %v6137_v45, %v3853_v6 }
 0x93a   : > { %v3873_v9 = vmul.f32 %v3857_v27, %v3792_v11  ;;  %v3858_v56 = vmul.f32 %v3857_v27, %v8381_v1  ;;  %v3859_v36 = vmul.f32 %v3857_v27, %v8385_v31  ;;  %v3866_v48 = vmul.f32 %v3857_v27, %v8429_v2 }
 0x93b   : > { %v3867_v61 = vmul.f32 %v3857_v27, %v8436_v49  ;;  %v3868_v11 = vmul.f32 %v3857_v27, %v8443_v62  ;;  %v3869_v1 = vmul.f32 %v3857_v27, %v8450_v16  ;;  %v3870_v4 = vmul.f32 %v3857_v27, %v8457_v14 }
 0x93c   : > { %v3893_v32 = vmul.f32 %v5936_v8, %v3873_v9  ;;  %v3878_v21 = vmul.f32 %v5936_v8, %v3858_v56  ;;  %v3871_v40 = vmul.f32 %v3857_v27, %v8464_v51  ;;  %v3872_v13 = vmul.f32 %v3857_v27, %v3791_v30 }
 0x93d   : > { %v3879_v45 = vmul.f32 %v5936_v8, %v3859_v36  ;;  %v3886_v38 = vmul.f32 %v5936_v8, %v3866_v48  ;;  %v3887_v44 = vmul.f32 %v5936_v8, %v3867_v61  ;;  %v3888_v31 = vmul.f32 %v5936_v8, %v3868_v11 }
 0x93e   : > { %v8501_v50 = vadd.f32 %v5937_v26, %v3878_v21  ;;  %v3889_v54 = vmul.f32 %v5936_v8, %v3869_v1  ;;  %v3890_v25 = vmul.f32 %v5936_v8, %v3870_v4  ;;  %v3891_v6 = vmul.f32 %v5936_v8, %v3871_v40 }
 0x93f   : > { %v3892_v9 = vmul.f32 %v5936_v8, %v3872_v13  ;;  %v8512_v2 = vadd.f32 %v5937_v26, %v3886_v38  ;;  %v8514_v49 = vadd.f32 %v5937_v26, %v3887_v44  ;;  %v8516_v62 = vadd.f32 %v5937_v26, %v3888_v31 }
 0x940   : > { %5740 = vmatmul.msk.f32.vlgmr.msra.gmra.mxu0 %vm2349_vm0, %v8501_v50  ;;  %v8518_v16 = vadd.f32 %v5937_v26, %v3893_v32  ;;  %v8520_v14 = vadd.f32 %v5937_v26, %v3889_v54  ;;  %v8522_v51 = vadd.f32 %v5937_v26, %v3890_v25  ;;  %v8524_v30 = vadd.f32 %v5937_v26, %v3891_v6 }
 0x941   : > { %v8526_v56 = vadd.f32 %v5937_v26, %v3892_v9  ;;  %v3899_v21 = vadd.f32 %v5937_v26, %v3879_v45  ;;  %v3860_v36 = vmul.f32 %v3857_v27, %v8389_v3  ;;  %v3861_v11 = vmul.f32 %v3857_v27, %v8393_v55 }
 0x942   : > { %v3862_v4 = vmul.f32 %v3857_v27, %v8401_v39  ;;  %v3863_v45 = vmul.f32 %v3857_v27, %v8407_v28  ;;  %v3864_v44 = vmul.f32 %v3857_v27, %v8415_v59  ;;  %v3865_v54 = vmul.f32 %v3857_v27, %v8422_v17  ;;  %v4883_v28 = vld [vmem:[%s9065_s17 + $0x18] sm:$0xff]  ;;  %v4882_v59 = vld [vmem:[%s9065_s17 + $0x10] sm:$0xff]  ;;  %v4881_v17 = vld [vmem:[%s9065_s17 + $0x8] sm:$0xff] }
 0x943   : > { %v3880_v48 = vmul.f32 %v5936_v8, %v3860_v36  ;;  %v3881_v32 = vmul.f32 %v5936_v8, %v3861_v11  ;;  %4896 = vmatpush.msrb.mxu0 %v4883_v28 }
 0x944   : > { %v3882_v40 = vmul.f32 %v5936_v8, %v3862_v4  ;;  %v3883_v3 = vmul.f32 %v5936_v8, %v3863_v45  ;;  %v3884_v55 = vmul.f32 %v5936_v8, %v3864_v44  ;;  %v3885_v39 = vmul.f32 %v5936_v8, %v3865_v54  ;;  %v4880_v8 = vld [vmem:[%s9065_s17] sm:$0xff] }
 0x945   : > { %v3900_v61 = vadd.f32 %v5937_v26, %v3880_v48  ;;  %v3901_v1 = vadd.f32 %v5937_v26, %v3881_v32  ;;  %4897 = vmatpush.msrb.mxu0 %v4882_v59  ;;  %v9290_v59 = vld [vmem:[#allocation6_spill] sm:$0xff] }
 0x946   : > { %v3902_v13 = vadd.f32 %v5937_v26, %v3882_v40  ;;  %v3903_v38 = vadd.f32 %v5937_v26, %v3883_v3  ;;  %v3904_v31 = vadd.f32 %v5937_v26, %v3884_v55  ;;  %v3905_v25 = vadd.f32 %v5937_v26, %v3885_v39 }
 0x947   : > { %4898 = vmatpush.msrb.mxu0 %v4881_v17  ;;  %v4678_v17 = vmul.u32 8, %v9290_v59 }
 0x948   : > { %5741 = vmatmul.msk.f32.gmra.mxu0 %vm2349_vm0, %v3899_v21 }
 0x949   : > { %4899 = vmatpush.msrb.mxu0 %v4880_v8  ;;  %v9291_v8 = vld [vmem:[#allocation7_spill] sm:$0xff] }
 0x94a   : > { %vm4679_vm10 = vcmp.lt.s32.totalorder %v9291_v8, %v4678_v17 }
 0x950   : > { %5742 = vmatmul.msk.f32.gmra.mxu0 %vm2349_vm0, %v3900_v61 }
 0x958   : > { %5743 = vmatmul.msk.f32.gmra.mxu0 %vm2349_vm0, %v3901_v1 }
 0x960   : > { %5744 = vmatmul.msk.f32.gmra.mxu0 %vm2349_vm0, %v3902_v13 }
 0x968   : > { %5745 = vmatmul.msk.f32.gmra.mxu0 %vm2349_vm0, %v3903_v38 }
 0x970   : > { %5746 = vmatmul.msk.f32.gmra.mxu0 %vm2349_vm0, %v3904_v31 }
 0x978   : > { %5747 = vmatmul.msk.f32.gmra.mxu0 %vm2349_vm0, %v3905_v25 }
 0x980   : > { %5748 = vmatmul.msk.f32.gmra.mxu0 %vm2349_vm0, %v8512_v2 }
 0x988   : > { %5749 = vmatmul.msk.f32.gmra.mxu0 %vm2349_vm0, %v8514_v49 }
 0x990   : > { %5750 = vmatmul.msk.f32.gmra.mxu0 %vm2349_vm0, %v8516_v62 }
 0x998   : > { %5751 = vmatmul.msk.f32.gmra.mxu0 %vm2349_vm0, %v8520_v14 }
 0x9a0   : > { %5752 = vmatmul.msk.f32.gmra.mxu0 %vm2349_vm0, %v8522_v51 }
 0x9a8   : > { %5753 = vmatmul.msk.f32.gmra.mxu0 %vm2349_vm0, %v8524_v30 }
 0x9b0   : > { %5754 = vmatmul.msk.f32.gmra.mxu0 %vm2349_vm0, %v8526_v56 }
 0x9b8   : > { %5755 = vmatmul.msk.f32.gmra.mxu0 %vm2349_vm0, %v8518_v16 }
 0x9bd   : > { %v8569_v27 = vpop.f32.mrf.mxu0 }
 0x9be   : > { %v4147_v26 = vsel %vm865_vm1, %v8569_v27, inf }
 0x9bf   : > { %4148 = vmin.xlane.f32.xlu2 %v4147_v26  ;;  %v9292_v26 = vmov 0.0  }
 0x9c0   : > { %5823 = vmatmul.msk.f32.vlgmr.msrb.gmra.mxu0 %vm2349_vm0, %v8501_v50 }
 0x9c5   : > { %v8575_v6 = vpop.f32.mrf.mxu0 }
 0x9c6   : > { %v4150_v9 = vsel %vm865_vm1, %v8575_v6, inf }
 0x9c7   : > { %4151 = vmin.xlane.f32.xlu1 %v4150_v9 }
 0x9c8   : > { %5824 = vmatmul.msk.f32.gmra.mxu0 %vm2349_vm0, %v3899_v21 }
 0x9cd   : > { %v8580_v36 = vpop.f32.mrf.mxu0 }
 0x9ce   : > { %v4153_v48 = vsel %vm865_vm1, %v8580_v36, inf }
 0x9cf   : > { %4154 = vmin.xlane.f32.xlu0 %v4153_v48 }
 0x9d0   : > { %5825 = vmatmul.msk.f32.gmra.mxu0 %vm2349_vm0, %v3900_v61 }
 0x9d5   : > { %v8585_v11 = vpop.f32.mrf.mxu0 }
 0x9d6   : > { %v4156_v50 = vsel %vm865_vm1, %v8585_v11, inf }
 0x9d7   : > { %4157 = vmin.xlane.f32.xlu2 %v4156_v50 }
 0x9d8   : > { %5826 = vmatmul.msk.f32.gmra.mxu0 %vm2349_vm0, %v3901_v1 }
 0x9dd   : > { %v8590_v32 = vpop.f32.mrf.mxu0 }
 0x9de   : > { %v4159_v21 = vsel %vm865_vm1, %v8590_v32, inf }
 0x9df   : > { %4160 = vmin.xlane.f32.xlu1 %v4159_v21 }
 0x9e0   : > { %5827 = vmatmul.msk.f32.gmra.mxu0 %vm2349_vm0, %v3902_v13 }
 0x9e5   : > { %v8595_v4 = vpop.f32.mrf.mxu0 }
 0x9e6   : > { %v4162_v61 = vsel %vm865_vm1, %v8595_v4, inf }
 0x9e7   : > { %4163 = vmin.xlane.f32.xlu0 %v4162_v61 }
 0x9e8   : > { %5828 = vmatmul.msk.f32.gmra.mxu0 %vm2349_vm0, %v3903_v38 }
 0x9ed   : > { %v8600_v40 = vpop.f32.mrf.mxu0 }
 0x9ee   : > { %v4165_v1 = vsel %vm865_vm1, %v8600_v40, inf }
 0x9ef   : > { %4166 = vmin.xlane.f32.xlu2 %v4165_v1 }
 0x9f0   : > { %5829 = vmatmul.msk.f32.gmra.mxu0 %vm2349_vm0, %v3904_v31 }
 0x9f5   : > { %v8605_v45 = vpop.f32.mrf.mxu0 }
 0x9f6   : > { %v4168_v13 = vsel %vm865_vm1, %v8605_v45, inf }
 0x9f7   : > { %4169 = vmin.xlane.f32.xlu1 %v4168_v13 }
 0x9f8   : > { %5830 = vmatmul.msk.f32.gmra.mxu0 %vm2349_vm0, %v3905_v25  ;;  %v9289_v25 = vld [vmem:[#allocation5_spill] sm:$0xff] }
 0x9f9   : > { %v4676_v28 = vmul.u32 8, %v9289_v25 }
 0x9fb   : > { %vm4677_vm9 = vcmp.ge.s32.totalorder %v9291_v8, %v4676_v28 }
 0x9fc   : > { %vm4680_vm11 = vmand %vm4677_vm9, %vm4679_vm10 }
 0x9fd   : > { %v8610_v3 = vpop.f32.mrf.mxu0  ;;  %v5788_v9 = vsel %vm4680_vm11, 1.0, %v9292_v26 }
 0x9fe   : > { %v4171_v38 = vsel %vm865_vm1, %v8610_v3, inf  ;;  %5789 = vmatpush.msk.msra.mxu2 %vm1535_vm5, %v5788_v9  ;;  %5806 = vmatpush.msk.msrb.mxu3 %vm1535_vm5, %v5788_v9 }
 0x9ff   : > { %4172 = vmin.xlane.f32.xlu0 %v4171_v38 }
 0xa00   : > { %5831 = vmatmul.msk.f32.gmra.mxu0 %vm2349_vm0, %v8512_v2 }
 0xa05   : > { %v8616_v44 = vpop.f32.mrf.mxu0 }
 0xa06   : > { %v4174_v55 = vsel %vm865_vm1, %v8616_v44, inf }
 0xa07   : > { %4175 = vmin.xlane.f32.xlu2 %v4174_v55 }
 0xa08   : > { %5832 = vmatmul.msk.f32.gmra.mxu0 %vm2349_vm0, %v8514_v49  ;;  %v8639_v49 = vld [vmem:[%s9064_s16] ss:$0 sm:$0xff] }
 0xa09   : > { %v8658_v50 = vadd.f32 %v8639_v49, %v8595_v4  ;;  %v8668_v1 = vadd.f32 %v8639_v49, %v8610_v3  ;;  %v8695_v9 = vadd.f32 %v8639_v49, %v8575_v6 }
 0xa0b   : > { %v4066_v61 = vsel %vm865_vm1, %v8658_v50, -inf }
 0xa0d   : > { %v8622_v31 = vpop.f32.mrf.mxu0 }
 0xa0e   : > { %v4177_v54 = vsel %vm865_vm1, %v8622_v31, inf }
 0xa0f   : > { %4178 = vmin.xlane.f32.xlu2 %v4177_v54 }
 0xa10   : > { %5833 = vmatmul.msk.f32.gmra.mxu0 %vm2349_vm0, %v8516_v62  ;;  %v8645_v62 = vadd.f32 %v8639_v49, %v8580_v36 }
 0xa12   : > { %v4057_v48 = vsel %vm865_vm1, %v8645_v62, -inf }
 0xa15   : > { %v8628_v39 = vpop.f32.mrf.mxu0 }
 0xa16   : > { %v4180_v2 = vsel %vm865_vm1, %v8628_v39, inf }
 0xa17   : > { %4181 = vmin.xlane.f32.xlu2 %v4180_v2 }
 0xa18   : > { %5834 = vmatmul.msk.f32.gmra.mxu0 %vm2349_vm0, %v8520_v14 }
 0xa1d   : > { %v8650_v14 = vpop.f32.mrf.mxu0 }
 0xa1e   : > { %v4183_v17 = vsel %vm865_vm1, %v8650_v14, inf }
 0xa1f   : > { %4058 = vmax.xlane.f32.xlu2 %v4057_v48 }
 0xa20   : > { %5835 = vmatmul.msk.f32.gmra.mxu0 %vm2349_vm0, %v8522_v51  ;;  %v4075_v51 = vsel %vm865_vm1, %v8668_v1, -inf }
 0xa25   : > { %v8660_v21 = vpop.f32.mrf.mxu0 }
 0xa27   : > { %4067 = vmax.xlane.f32.xlu2 %v4066_v61 }
 0xa28   : > { %5836 = vmatmul.msk.f32.gmra.mxu0 %vm2349_vm0, %v8524_v30  ;;  %v8680_v30 = vadd.f32 %v8639_v49, %v8628_v39 }
 0xa2a   : > { %v4084_v59 = vsel %vm865_vm1, %v8680_v30, -inf }
 0xa2d   : > { %v8670_v13 = vpop.f32.mrf.mxu0 }
 0xa2e   : > { %v4189_v38 = vsel %vm865_vm1, %v8670_v13, inf  ;;  %v8699_v48 = vadd.f32 %v8639_v49, %v8670_v13 }
 0xa2f   : > { %4076 = vmax.xlane.f32.xlu2 %v4075_v51  ;;  %4190 = vmin.xlane.f32.xlu0 %v4189_v38 }
 0xa30   : > { %5837 = vmatmul.msk.f32.gmra.mxu0 %vm2349_vm0, %v8526_v56 }
 0xa32   : > { %v4149_v55 = vpop.xlane.xlu2 %4148 }
 0xa33   : > { %v4195_v54 = vsub.f32 %v4149_v55, %v8569_v27  ;;  %v4093_v55 = vsel %vm865_vm1, %v8699_v48, -inf }
 0xa35   : > { %v4211_v2 = vmul.f32 1.442695, %v4195_v54  ;;  %v8683_v28 = vpop.f32.mrf.mxu0  ;;  %v4186_v54 = vsel %vm865_vm1, %v8660_v21, inf }
 0xa36   : > { %v4192_v26 = vsel %vm865_vm1, %v8683_v28, inf }
 0xa37   : > { %6138 = vpow2.f32 %v4211_v2  ;;  %4085 = vmax.xlane.f32.xlu2 %v4084_v59  ;;  %4184 = vmin.xlane.f32.xlu0 %v4183_v17  ;;  %v8714_v2 = vadd.f32 %v8639_v49, %v8590_v32  ;;  %v8719_v17 = vadd.f32 %v8639_v49, %v8569_v27  ;;  %v8731_v27 = vadd.f32 %v8639_v49, %v8605_v45 }
 0xa38   : > { %4193 = vmin.xlane.f32.xlu1 %v4192_v26  ;;  %5838 = vmatmul.msk.f32.gmra.mxu0 %vm2349_vm0, %v8518_v16  ;;  %v4054_v16 = vsel %vm865_vm1, %v8695_v9, -inf }
 0xa3a   : > { %v4152_v56 = vpop.xlane.xlu1 %4151 }
 0xa3b   : > { %v4196_v61 = vsub.f32 %v4152_v56, %v8575_v6 }
 0xa3d   : > { %v8702_v51 = vpop.eup %6138  ;;  %v4213_v38 = vmul.f32 1.442695, %v4196_v61  ;;  %v4063_v61 = vsel %vm865_vm1, %v8714_v2, -inf }
 0xa3e   : > { %5790 = vmatmul.msk.f32.vlgmr.msra.gmra.mxu2 %vm865_vm1, %v8702_v51 }
 0xa3f   : > { %6140 = vpow2.f32 %v4213_v38  ;;  %4055 = vmax.xlane.f32.xlu0 %v4054_v16  ;;  %4094 = vmax.xlane.f32.xlu2 %v4093_v55  ;;  %v4051_v38 = vsel %vm865_vm1, %v8719_v17, -inf  ;;  %v8736_v55 = vadd.f32 %v8639_v49, %v8585_v11 }
 0xa40   : > { %4187 = vmin.xlane.f32.xlu1 %v4186_v54 }
 0xa42   : > { %v4155_v6 = vpop.xlane.xlu0 %4154 }
 0xa43   : > { %v4197_v59 = vsub.f32 %v4155_v6, %v8580_v36 }
 0xa45   : > { %v8721_v26 = vpop.eup %6140  ;;  %v4215_v56 = vmul.f32 1.442695, %v4197_v59  ;;  %v4072_v59 = vsel %vm865_vm1, %v8731_v27, -inf }
 0xa46   : > { %5791 = vmatmul.msk.f32.gmra.mxu2 %vm865_vm1, %v8721_v26 }
 0xa47   : > { %6142 = vpow2.f32 %v4215_v56  ;;  %4064 = vmax.xlane.f32.xlu0 %v4063_v61  ;;  %v4060_v56 = vsel %vm865_vm1, %v8736_v55, -inf }
 0xa48   : > { %4052 = vmax.xlane.f32.xlu1 %v4051_v38 }
 0xa4a   : > { %v4158_v36 = vpop.xlane.xlu2 %4157 }
 0xa4b   : > { %v4198_v16 = vsub.f32 %v4158_v36, %v8585_v11  ;;  %v8748_v11 = vadd.f32 %v8639_v49, %v8622_v31  ;;  %v8753_v36 = vadd.f32 %v8639_v49, %v8600_v40 }
 0xa4d   : > { %v8738_v54 = vpop.eup %6142  ;;  %v4217_v6 = vmul.f32 1.442695, %v4198_v16 }
 0xa4e   : > { %5792 = vmatmul.msk.f32.gmra.mxu2 %vm865_vm1, %v8738_v54 }
 0xa4f   : > { %6144 = vpow2.f32 %v4217_v6  ;;  %4073 = vmax.xlane.f32.xlu0 %v4072_v59  ;;  %v4081_v6 = vsel %vm865_vm1, %v8748_v11, -inf  ;;  %v4069_v59 = vsel %vm865_vm1, %v8753_v36, -inf }
 0xa50   : > { %4061 = vmax.xlane.f32.xlu1 %v4060_v56  ;;  %v8765_v56 = vadd.f32 %v8639_v49, %v8660_v21 }
 0xa52   : > { %v4161_v61 = vpop.xlane.xlu1 %4160 }
 0xa53   : > { %v4199_v38 = vsub.f32 %v4161_v61, %v8590_v32 }
 0xa55   : > { %v8755_v16 = vpop.eup %6144  ;;  %v4219_v0 = vmul.f32 1.442695, %v4199_v38  ;;  %v8770_v38 = vadd.f32 %v8639_v49, %v8616_v44 }
 0xa56   : > { %5793 = vmatmul.msk.f32.gmra.mxu2 %vm865_vm1, %v8755_v16 }
 0xa57   : > { %6146 = vpow2.f32 %v4219_v0  ;;  %4082 = vmax.xlane.f32.xlu0 %v4081_v6  ;;  %v4090_v0 = vsel %vm865_vm1, %v8765_v56, -inf  ;;  %v4078_v6 = vsel %vm865_vm1, %v8770_v38, -inf }
 0xa58   : > { %4070 = vmax.xlane.f32.xlu1 %v4069_v59 }
 0xa5a   : > { %v4164_v32 = vpop.xlane.xlu0 %4163 }
 0xa5b   : > { %v4200_v61 = vsub.f32 %v4164_v32, %v8595_v4  ;;  %v8783_v32 = vadd.f32 %v8639_v49, %v8650_v14 }
 0xa5d   : > { %v8772_v53 = vpop.eup %6146  ;;  %v4221_v42 = vmul.f32 1.442695, %v4200_v61 }
 0xa5e   : > { %5794 = vmatmul.msk.f32.gmra.mxu2 %vm865_vm1, %v8772_v53 }
 0xa5f   : > { %6148 = vpow2.f32 %v4221_v42  ;;  %4091 = vmax.xlane.f32.xlu0 %v4090_v0  ;;  %v4087_v42 = vsel %vm865_vm1, %v8783_v32, -inf }
 0xa60   : > { %4079 = vmax.xlane.f32.xlu1 %v4078_v6 }
 0xa62   : > { %v4167_v4 = vpop.xlane.xlu2 %4166 }
 0xa63   : > { %v4201_v59 = vsub.f32 %v4167_v4, %v8600_v40  ;;  %v8794_v40 = vadd.f32 %v8639_v49, %v8683_v28 }
 0xa65   : > { %v8785_v61 = vpop.eup %6148  ;;  %v4223_v25 = vmul.f32 1.442695, %v4201_v59 }
 0xa66   : > { %5795 = vmatmul.msk.f32.gmra.mxu2 %vm865_vm1, %v8785_v61 }
 0xa67   : > { %6150 = vpow2.f32 %v4223_v25  ;;  %v4096_v25 = vsel %vm865_vm1, %v8794_v40, -inf }
 0xa68   : > { %4088 = vmax.xlane.f32.xlu1 %v4087_v42 }
 0xa6a   : > { %v4170_v0 = vpop.xlane.xlu1 %4169 }
 0xa6b   : > { %v4202_v6 = vsub.f32 %v4170_v0, %v8605_v45 }
 0xa6d   : > { %v8796_v4 = vpop.eup %6150  ;;  %v4225_v19 = vmul.f32 1.442695, %v4202_v6 }
 0xa6e   : > { %5796 = vmatmul.msk.f32.gmra.mxu2 %vm865_vm1, %v8796_v4 }
 0xa6f   : > { %6152 = vpow2.f32 %v4225_v19 }
 0xa70   : > { %4097 = vmax.xlane.f32.xlu1 %v4096_v25 }
 0xa72   : > { %v4173_v59 = vpop.xlane.xlu0 %4172 }
 0xa73   : > { %v4203_v42 = vsub.f32 %v4173_v59, %v8610_v3 }
 0xa75   : > { %v8803_v18 = vpop.eup %6152  ;;  %v4227_v45 = vmul.f32 1.442695, %v4203_v42 }
 0xa76   : > { %5797 = vmatmul.msk.f32.gmra.mxu2 %vm865_vm1, %v8803_v18 }
 0xa77   : > { %6154 = vpow2.f32 %v4227_v45 }
 0xa7a   : > { %v4176_v49 = vpop.xlane.xlu2 %4175 }
 0xa7b   : > { %v4204_v0 = vsub.f32 %v4176_v49, %v8616_v44 }
 0xa7d   : > { %v8808_v6 = vpop.eup %6154  ;;  %v4229_v19 = vmul.f32 1.442695, %v4204_v0 }
 0xa7e   : > { %5798 = vmatmul.msk.f32.gmra.mxu2 %vm865_vm1, %v8808_v6 }
 0xa7f   : > { %6156 = vpow2.f32 %v4229_v19 }
 0xa82   : > { %v4179_v25 = vpop.xlane.xlu2 %4178 }
 0xa83   : > { %v4205_v3 = vsub.f32 %v4179_v25, %v8622_v31 }
 0xa85   : > { %v8813_v59 = vpop.eup %6156  ;;  %v4231_v42 = vmul.f32 1.442695, %v4205_v3 }
 0xa86   : > { %5799 = vmatmul.msk.f32.gmra.mxu2 %vm865_vm1, %v8813_v59 }
 0xa87   : > { %6158 = vpow2.f32 %v4231_v42 }
 0xa8a   : > { %v4182_v45 = vpop.xlane.xlu2 %4181 }
 0xa8b   : > { %v4206_v44 = vsub.f32 %v4182_v45, %v8628_v39  ;;  %v8823_v39 = vpop.f32.mrf.mxu0 }
 0xa8d   : > { %v6159_v49 = vpop.eup %6158  ;;  %v4233_v41 = vmul.f32 1.442695, %v4206_v44 }
 0xa8e   : > { %5800 = vmatmul.msk.f32.gmra.mxu2 %vm865_vm1, %v6159_v49 }
 0xa8f   : > { %6160 = vpow2.f32 %v4233_v41 }
 0xa95   : > { %v6161_v0 = vpop.eup %6160 }
 0xa96   : > { %5801 = vmatmul.msk.f32.gmra.mxu2 %vm865_vm1, %v6161_v0 }
 0xaa2   : > { %v4191_v19 = vpop.xlane.xlu0 %4190 }
 0xaa3   : > { %v4209_v42 = vsub.f32 %v4191_v19, %v8670_v13 }
 0xaa5   : > { %v4239_v45 = vmul.f32 1.442695, %v4209_v42 }
 0xaaa   : > { %v4185_v31 = vpop.xlane.xlu0 %4184 }
 0xaab   : > { %v4207_v25 = vsub.f32 %v4185_v31, %v8650_v14  ;;  %v4194_v3 = vpop.xlane.xlu1 %4193  ;;  %v8828_v14 = vpop.f32.mrf.mxu0 }
 0xaac   : > { %v4210_v8 = vsub.f32 %v4194_v3, %v8683_v28 }
 0xaad   : > { %v4235_v5 = vmul.f32 1.442695, %v4207_v25  ;;  %v4059_v25 = vpop.xlane.xlu2 %4058 }
 0xaae   : > { %v4241_v12 = vmul.f32 1.442695, %v4210_v8 }
 0xaaf   : > { %6162 = vpow2.f32 %v4235_v5 }
 0xab0   : > { %6164 = vpow2.f32 %v4241_v12 }
 0xab1   : > { %6166 = vpow2.f32 %v4239_v45 }
 0xab2   : > { %v4056_v13 = vpop.xlane.xlu0 %4055 }
 0xab3   : > { %v4188_v41 = vpop.xlane.xlu1 %4187  ;;  %v4100_v5 = vsub.f32 %v8695_v9, %v4056_v13  ;;  %v8838_v3 = vpop.f32.mrf.mxu0 }
 0xab4   : > { %v4208_v44 = vsub.f32 %v4188_v41, %v8660_v21 }
 0xab5   : > { %v6163_v7 = vpop.eup %6162 }
 0xab6   : > { %v4237_v23 = vmul.f32 1.442695, %v4208_v44  ;;  %v6165_v15 = vpop.eup %6164  ;;  %5802 = vmatmul.msk.f32.gmra.mxu2 %vm865_vm1, %v6163_v7 }
 0xab7   : > { %5756 = vmatpush.xpose.msk.msrb.mxu1 %vm865_vm1, %v6165_v15  ;;  %v6167_v8 = vpop.eup %6166 }
 0xab8   : > { %6168 = vpow2.f32 %v4237_v23  ;;  %v4117_v23 = vmul.f32 1.442695, %v4100_v5  ;;  %v4068_v5 = vpop.xlane.xlu2 %4067 }
 0xabb   : > { %v4053_v28 = vpop.xlane.xlu1 %4052  ;;  %5757 = vmatpush.xpose.msk.msrb.mxu1 %vm865_vm1, %v6167_v8  ;;  %v8854_v13 = vpop.f32.mrf.mxu0 }
 0xabc   : > { %v4099_v12 = vsub.f32 %v8719_v17, %v4053_v28  ;;  %v4101_v17 = vsub.f32 %v8645_v62, %v4059_v25  ;;  %v4065_v28 = vpop.xlane.xlu0 %4064 }
 0xabe   : > { %v4115_v21 = vmul.f32 1.442695, %v4099_v12  ;;  %v6169_v19 = vpop.eup %6168  ;;  %v4119_v41 = vmul.f32 1.442695, %v4101_v17 }
 0xabf   : > { %5758 = vmatpush.xpose.msk.msrb.mxu1 %vm865_vm1, %v6169_v19  ;;  %5803 = vmatmul.msk.f32.gmra.mxu2 %vm865_vm1, %v6169_v19 }
 0xac0   : > { %6170 = vpow2.f32 %v4115_v21 }
 0xac1   : > { %v8835_v31 = vpop.f32.mrf.mxu2  ;;  %6172 = vpow2.f32 %v4117_v23 }
 0xac2   : > { %6174 = vpow2.f32 %v4119_v41 }
 0xac3   : > { %5759 = vmatpush.xpose.msk.msrb.mxu1 %vm865_vm1, %v6163_v7  ;;  %v4062_v7 = vpop.xlane.xlu1 %4061 }
 0xac4   : > { %v4102_v62 = vsub.f32 %v8736_v55, %v4062_v7  ;;  %v4103_v55 = vsub.f32 %v8714_v2, %v4065_v28  ;;  %v4104_v2 = vsub.f32 %v8658_v50, %v4068_v5  ;;  %v4074_v17 = vpop.xlane.xlu0 %4073  ;;  %v4077_v7 = vpop.xlane.xlu2 %4076 }
 0xac6   : > { %v8840_v42 = vpop.eup %6170  ;;  %v4123_v12 = vmul.f32 1.442695, %v4103_v55 }
 0xac7   : > { %v4751_v9 = vmul.f32 %v8840_v42, %v9250_v47  ;;  %5760 = vmatpush.xpose.msk.msrb.mxu1 %vm865_vm1, %v6161_v0  ;;  %5804 = vmatmul.msk.f32.gmra.mxu2 %vm865_vm1, %v6167_v8  ;;  %v8850_v44 = vpop.eup %6172  ;;  %v4121_v8 = vmul.f32 1.442695, %v4102_v62 }
 0xac8   : > { %v4752_v47 = vmul.f32 %v8850_v44, %v6593_v20 }
 0xac9   : > { %5807 = vmatmul.msk.f32.vlgmr.msrb.gmra.mxu3 %vm865_vm1, %v4751_v9  ;;  %v8848_v45 = vpop.f32.mrf.mxu2  ;;  %6176 = vpow2.f32 %v4121_v8 }
 0xaca   : > { %6178 = vpow2.f32 %v4123_v12 }
 0xacb   : > { %5761 = vmatpush.xpose.msk.msrb.mxu1 %vm865_vm1, %v6159_v49  ;;  %v8864_v49 = vpop.eup %6174  ;;  %v4071_v23 = vpop.xlane.xlu1 %4070 }
 0xacc   : > { %v4753_v20 = vmul.f32 %v8864_v49, %v6600_v35  ;;  %v4105_v50 = vsub.f32 %v8753_v36, %v4071_v23  ;;  %v4106_v36 = vsub.f32 %v8731_v27, %v4074_v17  ;;  %v4083_v12 = vpop.xlane.xlu0 %4082 }
 0xace   : > { %v4129_v41 = vmul.f32 1.442695, %v4106_v36 }
 0xacf   : > { %5762 = vmatpush.xpose.msk.msrb.mxu1 %vm865_vm1, %v8813_v59  ;;  %5805 = vmatmul.msk.f32.gmra.mxu2 %vm865_vm1, %v6165_v15  ;;  %v8873_v15 = vpop.f32.mrf.mxu0  ;;  %v8878_v21 = vpop.eup %6176 }
 0xad0   : > { %v4754_v35 = vmul.f32 %v8878_v21, %v6636_v10  ;;  %v8892_v25 = vpop.eup %6178 }
 0xad1   : > { %5808 = vmatmul.msk.f32.gmra.mxu3 %vm865_vm1, %v4752_v47  ;;  %v8862_v0 = vpop.f32.mrf.mxu2  ;;  %v4755_v10 = vmul.f32 %v8892_v25, %v6626_v57 }
 0xad3   : > { %5763 = vmatpush.xpose.msk.msrb.mxu1 %vm865_vm1, %v8808_v6  ;;  %v4125_v6 = vmul.f32 1.442695, %v4104_v2  ;;  %v4080_v8 = vpop.xlane.xlu1 %4079  ;;  %v4109_v2 = vsub.f32 %v8748_v11, %v4083_v12 }
 0xad5   : > { %6180 = vpow2.f32 %v4125_v6 }
 0xad7   : > { %5764 = vmatpush.xpose.msk.msrb.mxu1 %vm865_vm1, %v8803_v18  ;;  %v8890_v19 = vpop.f32.mrf.mxu0 }
 0xad9   : > { %5809 = vmatmul.msk.f32.gmra.mxu3 %vm865_vm1, %v4753_v20  ;;  %v8876_v59 = vpop.f32.mrf.mxu2 }
 0xadb   : > { %5765 = vmatpush.xpose.msk.msrb.mxu1 %vm865_vm1, %v8796_v4  ;;  %v4127_v4 = vmul.f32 1.442695, %v4105_v50  ;;  %v6181_v9 = vpop.eup %6180  ;;  %v4089_v50 = vpop.xlane.xlu1 %4088 }
 0xadc   : > { %v4756_v57 = vmul.f32 %v6181_v9, %v9251_v33 }
 0xadd   : > { %6182 = vpow2.f32 %v4127_v4  ;;  %v4092_v4 = vpop.xlane.xlu0 %4091 }
 0xade   : > { %6184 = vpow2.f32 %v4129_v41  ;;  %v4112_v17 = vsub.f32 %v8765_v56, %v4092_v4 }
 0xadf   : > { %5766 = vmatpush.xpose.msk.msrb.mxu1 %vm865_vm1, %v8785_v61 }
 0xae0   : > { %v4141_v41 = vmul.f32 1.442695, %v4112_v17 }
 0xae1   : > { %5810 = vmatmul.msk.f32.gmra.mxu3 %vm865_vm1, %v4754_v35  ;;  %v8888_v18 = vpop.f32.mrf.mxu2 }
 0xae3   : > { %5767 = vmatpush.xpose.msk.msrb.mxu1 %vm865_vm1, %v8772_v53  ;;  %v8906_v53 = vpop.f32.mrf.mxu0  ;;  %v6183_v62 = vpop.eup %6182 }
 0xae4   : > { %v4757_v33 = vmul.f32 %v6183_v62, %v9252_v63  ;;  %v6185_v28 = vpop.eup %6184 }
 0xae7   : > { %5768 = vmatpush.xpose.msk.msrb.mxu1 %vm865_vm1, %v8755_v16 }
 0xae9   : > { %5811 = vmatmul.msk.f32.gmra.mxu3 %vm865_vm1, %v4755_v10  ;;  %v8902_v61 = vpop.f32.mrf.mxu2 }
 0xaea   : > { %v4954_v4 = vmul.f32 %v8890_v19, %v8902_v61  ;;  %v4949_v19 = vmul.f32 %v8823_v39, %v8835_v31 }
 0xaeb   : > { %5769 = vmatpush.xpose.msk.msrb.mxu1 %vm865_vm1, %v8738_v54  ;;  %v4107_v54 = vsub.f32 %v8668_v1, %v4077_v7  ;;  %v8918_v27 = vpop.f32.mrf.mxu0  ;;  %v4758_v1 = vmul.f32 %v6185_v28, %v9253_v37  ;;  %v4135_v37 = vmul.f32 1.442695, %v4109_v2 }
 0xaed   : > { %v4131_v47 = vmul.f32 1.442695, %v4107_v54 }
 0xaef   : > { %5770 = vmatpush.xpose.msk.msrb.mxu1 %vm865_vm1, %v8721_v26  ;;  %6186 = vpow2.f32 %v4131_v47  ;;  %v4098_v47 = vpop.xlane.xlu1 %4097 }
 0xaf1   : > { %5812 = vmatmul.msk.f32.gmra.mxu3 %vm865_vm1, %v4756_v57  ;;  %v8913_v16 = vpop.f32.mrf.mxu2 }
 0xaf3   : > { %5771 = vmatpush.xpose.msk.msrb.mxu1 %vm865_vm1, %v8702_v51  ;;  %v4108_v51 = vsub.f32 %v8770_v38, %v4080_v8  ;;  %v4925_v55 = vpop.f32.mrf.mxu0  ;;  %v4114_v8 = vsub.f32 %v8794_v40, %v4098_v47 }
 0xaf5   : > { %v4133_v63 = vmul.f32 1.442695, %v4108_v51  ;;  %v6187_v5 = vpop.eup %6186 }
 0xaf6   : > { %5772 = vmatmul.msk.f32.vlgmr.msrb.gmra.mxu1 %vm865_vm1, %v8840_v42  ;;  %v4759_v38 = vmul.f32 %v6187_v5, %v9254_v52  ;;  %v4111_v52 = vsub.f32 %v8783_v32, %v4089_v50 }
 0xaf7   : > { %6188 = vpow2.f32 %v4133_v63 }
 0xaf8   : > { %6190 = vpow2.f32 %v4135_v37 }
 0xaf9   : > { %5813 = vmatmul.msk.f32.gmra.mxu3 %vm865_vm1, %v4757_v33  ;;  %v8924_v26 = vpop.f32.mrf.mxu2 }
 0xafb   : > { %v8944_v10 = vpop.f32.mrf.mxu0 }
 0xafd   : > { %v6189_v35 = vpop.eup %6188 }
 0xafe   : > { %5773 = vmatmul.msk.f32.gmra.mxu1 %vm865_vm1, %v8850_v44  ;;  %v4086_v44 = vpop.xlane.xlu2 %4085  ;;  %v4760_v23 = vmul.f32 %v6189_v35, %v9255_v22 }
 0xaff   : > { %v4110_v6 = vsub.f32 %v8680_v30, %v4086_v44 }
 0xb01   : > { %5814 = vmatmul.msk.f32.gmra.mxu3 %vm865_vm1, %v4758_v1  ;;  %v4727_v42 = vpop.f32.mrf.mxu2  ;;  %v4137_v11 = vmul.f32 1.442695, %v4110_v6 }
 0xb02   : > { %v8931_v20 = vmul.f32 %v4925_v55, %v4727_v42  ;;  %v9293_v55 = vld [vmem:[#allocation17_spill] sm:$0xff] }
 0xb03   : > { %6192 = vpow2.f32 %v4137_v11  ;;  %v4931_v57 = vpop.f32.mrf.mxu0 }
 0xb06   : > { %5774 = vmatmul.msk.f32.gmra.mxu1 %vm865_vm1, %v8864_v49  ;;  %v6191_v49 = vpop.eup %6190 }
 0xb07   : > { %v4761_v30 = vmul.f32 %v6191_v49, %v9256_v58 }
 0xb09   : > { %5815 = vmatmul.msk.f32.gmra.mxu3 %vm865_vm1, %v4759_v38  ;;  %v6193_v22 = vpop.eup %6192  ;;  %v4730_v36 = vpop.f32.mrf.mxu2 }
 0xb0a   : > { %v4762_v32 = vmul.f32 %v6193_v22, %v6812_v46 }
 0xb0e   : > { %5775 = vmatmul.msk.f32.gmra.mxu1 %vm865_vm1, %v8878_v21  ;;  %v4139_v21 = vmul.f32 1.442695, %v4111_v52 }
 0xb10   : > { %6194 = vpow2.f32 %v4139_v21  ;;  %v4955_v21 = vmul.f32 %v8906_v53, %v8913_v16  ;;  %v4950_v53 = vmul.f32 %v8828_v14, %v8848_v45 }
 0xb11   : > { %5816 = vmatmul.msk.f32.gmra.mxu3 %vm865_vm1, %v4760_v23  ;;  %6196 = vpow2.f32 %v4141_v41  ;;  %v4733_v56 = vpop.f32.mrf.mxu2 }
 0xb12   : > { %v4959_v52 = vmul.f32 %v4931_v57, %v4733_v56 }
 0xb16   : > { %5776 = vmatmul.msk.f32.gmra.mxu1 %vm865_vm1, %v8892_v25  ;;  %v4095_v25 = vpop.xlane.xlu2 %4094  ;;  %v6195_v7 = vpop.eup %6194 }
 0xb17   : > { %v4113_v58 = vsub.f32 %v8699_v48, %v4095_v25  ;;  %v4763_v54 = vmul.f32 %v6195_v7, %v6824_v60  ;;  %v6197_v46 = vpop.eup %6196  ;;  %v4145_v48 = vmul.f32 1.442695, %v4114_v8 }
 0xb18   : > { %v4764_v51 = vmul.f32 %v6197_v46, %v9257_v34 }
 0xb19   : > { %5817 = vmatmul.msk.f32.gmra.mxu3 %vm865_vm1, %v4761_v30  ;;  %v4143_v33 = vmul.f32 1.442695, %v4113_v58  ;;  %v4956_v30 = vmul.f32 %v8918_v27, %v8924_v26  ;;  %v4951_v27 = vmul.f32 %v8838_v3, %v8862_v0 }
 0xb1b   : > { %6198 = vpow2.f32 %v4143_v33 }
 0xb1c   : > { %6200 = vpow2.f32 %v4145_v48 }
 0xb1e   : > { %5777 = vmatmul.msk.f32.gmra.mxu1 %vm865_vm1, %v6181_v9  ;;  %v4934_v9 = vpop.f32.mrf.mxu0 }
 0xb21   : > { %5818 = vmatmul.msk.f32.gmra.mxu3 %vm865_vm1, %v4762_v32  ;;  %v6199_v1 = vpop.eup %6198 }
 0xb22   : > { %v4765_v42 = vmul.f32 %v6199_v1, %v9293_v55  ;;  %v6201_v12 = vpop.eup %6200 }
 0xb26   : > { %5778 = vmatmul.msk.f32.gmra.mxu1 %vm865_vm1, %v6183_v62  ;;  %v4736_v62 = vpop.f32.mrf.mxu2  ;;  %v4937_v60 = vpop.f32.mrf.mxu0 }
 0xb27   : > { %v4960_v50 = vmul.f32 %v4934_v9, %v4736_v62 }
 0xb29   : > { %5819 = vmatmul.msk.f32.gmra.mxu3 %vm865_vm1, %v4763_v54 }
 0xb2e   : > { %5779 = vmatmul.msk.f32.gmra.mxu1 %vm865_vm1, %v6185_v28  ;;  %v4940_v40 = vpop.f32.mrf.mxu0  ;;  %v9294_v28 = vld [vmem:[#allocation18_spill] sm:$0xff] }
 0xb2f   : > { %v4766_v34 = vmul.f32 %v6201_v12, %v9294_v28 }
 0xb31   : > { %5820 = vmatmul.msk.f32.gmra.mxu3 %vm865_vm1, %v4764_v51 }
 0xb36   : > { %5780 = vmatmul.msk.f32.gmra.mxu1 %vm865_vm1, %v6187_v5  ;;  %v4943_v38 = vpop.f32.mrf.mxu0 }
 0xb39   : > { %5821 = vmatmul.msk.f32.gmra.mxu3 %vm865_vm1, %v4765_v42  ;;  %v4739_v63 = vpop.f32.mrf.mxu2 }
 0xb3e   : > { %5781 = vmatmul.msk.f32.gmra.mxu1 %vm865_vm1, %v6189_v35  ;;  %v4946_v5 = vpop.f32.mrf.mxu0  ;;  %v4961_v35 = vmul.f32 %v4937_v60, %v4739_v63 }
 0xb41   : > { %5822 = vmatmul.msk.f32.gmra.mxu3 %vm865_vm1, %v4766_v34 }
 0xb42   : > { %v4742_v2 = vpop.f32.mrf.mxu2 }
 0xb43   : > { %v4962_v11 = vmul.f32 %v4940_v40, %v4742_v2 }
 0xb46   : > { %5782 = vmatmul.msk.f32.gmra.mxu1 %vm865_vm1, %v6191_v49  ;;  %v4958_v49 = vmul.f32 %v8944_v10, %v4730_v36  ;;  %v4953_v10 = vmul.f32 %v8873_v15, %v8888_v18 }
 0xb4a   : > { %v4745_v37 = vpop.f32.mrf.mxu2 }
 0xb4b   : > { %v4963_v23 = vmul.f32 %v4943_v38, %v4745_v37 }
 0xb4e   : > { %5783 = vmatmul.msk.f32.gmra.mxu1 %vm865_vm1, %v6193_v22  ;;  %v4952_v22 = vmul.f32 %v8854_v13, %v8876_v59 }
 0xb52   : > { %v4748_v44 = vpop.f32.mrf.mxu2 }
 0xb53   : > { %v4964_v6 = vmul.f32 %v4946_v5, %v4748_v44 }
 0xb55   : > { %4965 = vmatpush.msra.mxu1 %v4964_v6 }
 0xb56   : > { %5784 = vmatmul.msk.f32.gmra.mxu1 %vm865_vm1, %v6195_v7 }
 0xb57   : > { %4966 = vmatpush.msra.mxu1 %v4963_v23 }
 0xb59   : > { %4967 = vmatpush.msra.mxu1 %v4962_v11 }
 0xb5b   : > { %4968 = vmatpush.msra.mxu1 %v4961_v35 }
 0xb5d   : > { %4969 = vmatpush.msra.mxu1 %v4960_v50 }
 0xb5e   : > { %5785 = vmatmul.msk.f32.gmra.mxu1 %vm865_vm1, %v6197_v46 }
 0xb5f   : > { %4970 = vmatpush.msra.mxu1 %v4959_v52 }
 0xb61   : > { %4971 = vmatpush.msra.mxu1 %v4958_v49 }
 0xb63   : > { %4972 = vmatpush.msra.mxu1 %v8931_v20 }
 0xb65   : > { %4973 = vmatpush.msra.mxu1 %v4956_v30 }
 0xb66   : > { %5786 = vmatmul.msk.f32.gmra.mxu1 %vm865_vm1, %v6199_v1 }
 0xb67   : > { %4974 = vmatpush.msra.mxu1 %v4955_v21 }
 0xb69   : > { %4975 = vmatpush.msra.mxu1 %v4954_v4 }
 0xb6b   : > { %4976 = vmatpush.msra.mxu1 %v4953_v10  ;;  %v9295_v10 = vld [vmem:[#allocation3_spill] sm:$0xff] }
 0xb6d   : > { %4977 = vmatpush.msra.mxu1 %v4952_v22 }
 0xb6e   : > { %5787 = vmatmul.msk.f32.gmra.mxu1 %vm865_vm1, %v6201_v12 }
 0xb6f   : > { %4978 = vmatpush.msra.mxu1 %v4951_v27 }
 0xb71   : > { %4979 = vmatpush.msra.mxu1 %v4950_v53 }
 0xb73   : > { %v4356_v15 = vpop.f32.mrf.mxu1  ;;  %4980 = vmatpush.msra.mxu1 %v4949_v19 }
 0xb74   : > { %v4404_v18 = vmax.f32 %v4356_v15, 1e-37 }
 0xb76   : > { %6202 = vrcp.f32 %v4404_v18  ;;  %v4431_v0 = vand.u32 2147483648, %v4404_v18  ;;  %v4429_v20 = vand.u32 2147483647, %v4404_v18  ;;  %vm4425_vm5 = vweird.f32 %v4404_v18 }
 0xb78   : > { %v4432_v39 = vor.u32 1.1754944e-38, %v4431_v0  ;;  %vm4430_vm12 = vcmp.eq.f32.partialorder %v4429_v20, 8.507059e+37 }
 0xb7b   : > { %v4359_v13 = vpop.f32.mrf.mxu1 }
 0xb7c   : > { %v6203_v59 = vpop.eup %6202  ;;  %v4405_v61 = vmax.f32 %v4359_v13, 1e-37 }
 0xb7d   : > { %v4421_v16 = vmul.f32 %v6203_v59, %v4404_v18  ;;  %vm4426_vm1 = vweird.f32 %v6203_v59 }
 0xb7e   : > { %6204 = vrcp.f32 %v4405_v61  ;;  %vm4427_vm0 = vmor %vm4425_vm5, %vm4426_vm1  ;;  %v4446_v7 = vand.u32 2147483648, %v4405_v61  ;;  %v4444_v54 = vand.u32 2147483647, %v4405_v61  ;;  %vm4440_vm14 = vweird.f32 %v4405_v61 }
 0xb7f   : > { %v4422_v3 = vsub.f32 1.0, %v4421_v16 }
 0xb80   : > { %v4447_v46 = vor.u32 1.1754944e-38, %v4446_v7  ;;  %vm4445_vm2 = vcmp.eq.f32.partialorder %v4444_v54, 8.507059e+37  ;;  %v9297_v54 = vld [vmem:[#allocation19_spill] sm:$0xff] }
 0xb81   : > { %v4423_v26 = vmul.f32 %v6203_v59, %v4422_v3 }
 0xb83   : > { %v4424_v14 = vadd.f32 %v6203_v59, %v4423_v26  ;;  %v4362_v45 = vpop.f32.mrf.mxu1  ;;  %v9296_v26 = vld [vmem:[#allocation9_spill] sm:$0xff] }
 0xb84   : > { %v6205_v17 = vpop.eup %6204  ;;  %v4406_v31 = vmax.f32 %v4362_v45, 1e-37 }
 0xb85   : > { %v4436_v36 = vmul.f32 %v6205_v17, %v4405_v61  ;;  %v4428_v32 = vsel %vm4427_vm0, %v6203_v59, %v4424_v14  ;;  %vm4441_vm13 = vweird.f32 %v6205_v17 }
 0xb86   : > { %6206 = vrcp.f32 %v4406_v31  ;;  %v4433_v57 = vsel %vm4430_vm12, %v4432_v39, %v4428_v32  ;;  %vm4442_vm15 = vmor %vm4440_vm14, %vm4441_vm13  ;;  %v4461_v1 = vand.u32 2147483648, %v4406_v31  ;;  %v4459_v55 = vand.u32 2147483647, %v4406_v31 }
 0xb87   : > { %v4437_v41 = vsub.f32 1.0, %v4436_v36  ;;  %v4660_v25 = vmul.f32 %v7052_v43, %v4433_v57  ;;  %vm4455_vm4 = vweird.f32 %v4406_v31 }
 0xb88   : > { %v4462_v28 = vor.u32 1.1754944e-38, %v4461_v1  ;;  %vm4460_vm7 = vcmp.eq.f32.partialorder %v4459_v55, 8.507059e+37 }
 0xb89   : > { %4981 = vmatmul.f32.vlgmr.msra.gmra.mxu1 %v4660_v25  ;;  %v4438_v58 = vmul.f32 %v6205_v17, %v4437_v41 }
 0xb8b   : > { %v4365_v56 = vpop.f32.mrf.mxu1  ;;  %v4439_v33 = vadd.f32 %v6205_v17, %v4438_v58 }
 0xb8c   : > { %v6207_v9 = vpop.eup %6206  ;;  %v4407_v47 = vmax.f32 %v4365_v56, 1e-37 }
 0xb8d   : > { %v4451_v8 = vmul.f32 %v6207_v9, %v4406_v31  ;;  %v4443_v51 = vsel %vm4442_vm15, %v6205_v17, %v4439_v33  ;;  %vm4456_vm3 = vweird.f32 %v6207_v9 }
 0xb8e   : > { %6208 = vrcp.f32 %v4407_v47  ;;  %v4448_v48 = vsel %vm4445_vm2, %v4447_v46, %v4443_v51  ;;  %vm4457_vm6 = vmor %vm4455_vm4, %vm4456_vm3  ;;  %v4476_v5 = vand.u32 2147483648, %v4407_v47  ;;  %v4474_v6 = vand.u32 2147483647, %v4407_v47 }
 0xb8f   : > { %v4452_v62 = vsub.f32 1.0, %v4451_v8  ;;  %v4661_v43 = vmul.f32 %v9259_v24, %v4448_v48  ;;  %vm4470_vm9 = vweird.f32 %v4407_v47 }
 0xb90   : > { %v4477_v52 = vor.u32 1.1754944e-38, %v4476_v5  ;;  %vm4475_vm11 = vcmp.eq.f32.partialorder %v4474_v6, 8.507059e+37 }
 0xb91   : > { %4984 = vmatmul.f32.gmra.mxu1 %v4661_v43  ;;  %v4453_v60 = vmul.f32 %v6207_v9, %v4452_v62 }
 0xb93   : > { %v4368_v42 = vpop.f32.mrf.mxu1  ;;  %v4454_v63 = vadd.f32 %v6207_v9, %v4453_v60 }
 0xb94   : > { %v6209_v12 = vpop.eup %6208  ;;  %v4408_v40 = vmax.f32 %v4368_v42, 1e-37  ;;  %v9298_v42 = vld [vmem:[#allocation20_spill] sm:$0xff] }
 0xb95   : > { %v4466_v34 = vmul.f32 %v6209_v12, %v4407_v47  ;;  %v4458_v2 = vsel %vm4457_vm6, %v6207_v9, %v4454_v63  ;;  %vm4471_vm8 = vweird.f32 %v6209_v12 }
 0xb96   : > { %6210 = vrcp.f32 %v4408_v40  ;;  %v4463_v38 = vsel %vm4460_vm7, %v4462_v28, %v4458_v2  ;;  %vm4472_vm10 = vmor %vm4470_vm9, %vm4471_vm8  ;;  %v4491_v22 = vand.u32 2147483648, %v4408_v40  ;;  %v4489_v53 = vand.u32 2147483647, %v4408_v40 }
 0xb97   : > { %v4467_v37 = vsub.f32 1.0, %v4466_v34  ;;  %v4662_v24 = vmul.f32 %v9260_v29, %v4463_v38  ;;  %vm4485_vm5 = vweird.f32 %v4408_v40 }
 0xb98   : > { %v4492_v59 = vor.u32 1.1754944e-38, %v4491_v22  ;;  %vm4490_vm12 = vcmp.eq.f32.partialorder %v4489_v53, 8.507059e+37 }
 0xb99   : > { %4987 = vmatmul.f32.gmra.mxu1 %v4662_v24  ;;  %v4468_v44 = vmul.f32 %v6209_v12, %v4467_v37 }
 0xb9b   : > { %v4371_v23 = vpop.f32.mrf.mxu1  ;;  %v4469_v11 = vadd.f32 %v6209_v12, %v4468_v44 }
 0xb9c   : > { %v6211_v35 = vpop.eup %6210  ;;  %v4409_v50 = vmax.f32 %v4371_v23, 1e-37 }
 0xb9d   : > { %v4481_v49 = vmul.f32 %v6211_v35, %v4408_v40  ;;  %v4473_v30 = vsel %vm4472_vm10, %v6209_v12, %v4469_v11  ;;  %vm4486_vm1 = vweird.f32 %v6211_v35  ;;  %v9299_v11 = vld [vmem:[#allocation21_spill] sm:$0xff] }
 0xb9e   : > { %6212 = vrcp.f32 %v4409_v50  ;;  %v4478_v21 = vsel %vm4475_vm11, %v4477_v52, %v4473_v30  ;;  %vm4487_vm0 = vmor %vm4485_vm5, %vm4486_vm1  ;;  %v4506_v14 = vand.u32 2147483648, %v4409_v50  ;;  %v4504_v17 = vand.u32 2147483647, %v4409_v50 }
 0xb9f   : > { %v4482_v4 = vsub.f32 1.0, %v4481_v49  ;;  %v4663_v29 = vmul.f32 %v9295_v10, %v4478_v21  ;;  %vm4500_vm14 = vweird.f32 %v4409_v50  ;;  %v9302_v10 = vmov 1.0  }
 0xba0   : > { %v4507_v57 = vor.u32 1.1754944e-38, %v4506_v14  ;;  %vm4505_vm2 = vcmp.eq.f32.partialorder %v4504_v17, 8.507059e+37 }
 0xba1   : > { %4990 = vmatmul.f32.gmra.mxu1 %v4663_v29  ;;  %v4483_v27 = vmul.f32 %v6211_v35, %v4482_v4  ;;  %v9301_v4 = vld [vmem:[#allocation7_spill] sm:$0xff] }
 0xba3   : > { %v4374_v19 = vpop.f32.mrf.mxu1  ;;  %v4484_v15 = vadd.f32 %v6211_v35, %v4483_v27 }
 0xba4   : > { %v6213_v18 = vpop.eup %6212  ;;  %v4410_v13 = vmax.f32 %v4374_v19, 1e-37 }
 0xba5   : > { %v4496_v61 = vmul.f32 %v6213_v18, %v4409_v50  ;;  %v4488_v16 = vsel %vm4487_vm0, %v6211_v35, %v4484_v15  ;;  %vm4501_vm13 = vweird.f32 %v6213_v18  ;;  %v9300_v50 = vld [vmem:[#allocation27_spill] sm:$0xff] }
 0xba6   : > { %6214 = vrcp.f32 %v4410_v13  ;;  %v4493_v3 = vsel %vm4490_vm12, %v4492_v59, %v4488_v16  ;;  %vm4502_vm15 = vmor %vm4500_vm14, %vm4501_vm13  ;;  %v4521_v33 = vand.u32 2147483648, %v4410_v13  ;;  %v4519_v47 = vand.u32 2147483647, %v4410_v13 }
 0xba7   : > { %v4497_v0 = vsub.f32 1.0, %v4496_v61  ;;  %v4664_v20 = vmul.f32 %v9296_v26, %v4493_v3  ;;  %vm4515_vm4 = vweird.f32 %v4410_v13  ;;  %v5071_v52 = vand.u32 7, %v9300_v50  ;;  %v9303_v61 = vld [vmem:[#allocation22_spill] sm:$0xff] }
 0xba8   : > { %v4522_v62 = vor.u32 1.1754944e-38, %v4521_v33  ;;  %vm4520_vm7 = vcmp.eq.f32.partialorder %v4519_v47, 8.507059e+37 }
 0xba9   : > { %4993 = vmatmul.f32.gmra.mxu1 %v4664_v20  ;;  %v4498_v45 = vmul.f32 %v6213_v18, %v4497_v0  ;;  %vm5241_vm5 = vcmp.eq.s32.totalorder %v5071_v52, %v9301_v4 }
 0xbaa   : > { %5843 = vmatpush.msk.msrb.mxu2 %vm5241_vm5, %v9302_v10 }
 0xbab   : > { %v4377_v39 = vpop.f32.mrf.mxu1  ;;  %v4499_v31 = vadd.f32 %v6213_v18, %v4498_v45 }
 0xbac   : > { %v6215_v36 = vpop.eup %6214  ;;  %v4411_v32 = vmax.f32 %v4377_v39, 1e-37 }
 0xbad   : > { %v4511_v41 = vmul.f32 %v6215_v36, %v4410_v13  ;;  %v4503_v25 = vsel %vm4502_vm15, %v6213_v18, %v4499_v31  ;;  %vm4516_vm3 = vweird.f32 %v6215_v36 }
 0xbae   : > { %6216 = vrcp.f32 %v4411_v32  ;;  %v4508_v7 = vsel %vm4505_vm2, %v4507_v57, %v4503_v25  ;;  %vm4517_vm6 = vmor %vm4515_vm4, %vm4516_vm3  ;;  %v4536_v12 = vand.u32 2147483648, %v4411_v32  ;;  %v4534_v28 = vand.u32 2147483647, %v4411_v32 }
 0xbaf   : > { %v4512_v58 = vsub.f32 1.0, %v4511_v41  ;;  %v4665_v56 = vmul.f32 %v9297_v54, %v4508_v7  ;;  %vm4530_vm9 = vweird.f32 %v4411_v32  ;;  %v9304_v41 = vld [vmem:[#allocation23_spill] sm:$0xff] }
 0xbb0   : > { %v4537_v24 = vor.u32 1.1754944e-38, %v4536_v12  ;;  %vm4535_vm11 = vcmp.eq.f32.partialorder %v4534_v28, 8.507059e+37 }
 0xbb1   : > { %4996 = vmatmul.f32.gmra.mxu1 %v4665_v56  ;;  %v4513_v9 = vmul.f32 %v6215_v36, %v4512_v58 }
 0xbb3   : > { %v4380_v46 = vpop.f32.mrf.mxu1  ;;  %v4514_v8 = vadd.f32 %v6215_v36, %v4513_v9 }
 0xbb4   : > { %v6217_v51 = vpop.eup %6216  ;;  %v4412_v48 = vmax.f32 %v4380_v46, 1e-37 }
 0xbb5   : > { %v4526_v43 = vmul.f32 %v6217_v51, %v4411_v32  ;;  %v4518_v1 = vsel %vm4517_vm6, %v6215_v36, %v4514_v8  ;;  %vm4531_vm8 = vweird.f32 %v6217_v51 }
 0xbb6   : > { %6218 = vrcp.f32 %v4412_v48  ;;  %v4523_v60 = vsel %vm4520_vm7, %v4522_v62, %v4518_v1  ;;  %vm4532_vm10 = vmor %vm4530_vm9, %vm4531_vm8  ;;  %v4551_v49 = vand.u32 2147483648, %v4412_v48  ;;  %v4549_v21 = vand.u32 2147483647, %v4412_v48 }
 0xbb7   : > { %v4527_v55 = vsub.f32 1.0, %v4526_v43  ;;  %v4666_v63 = vmul.f32 %v9298_v42, %v4523_v60  ;;  %vm4545_vm0 = vweird.f32 %v4412_v48  ;;  %v9305_v43 = vld [vmem:[#allocation24_spill] sm:$0xff] }
 0xbb8   : > { %v4552_v19 = vor.u32 1.1754944e-38, %v4551_v49  ;;  %vm4550_vm13 = vcmp.eq.f32.partialorder %v4549_v21, 8.507059e+37  ;;  %v9306_v60 = vld [vmem:[#allocation28_spill] sm:$0xff] }
 0xbb9   : > { %4999 = vmatmul.f32.gmra.mxu1 %v4666_v63  ;;  %v4528_v40 = vmul.f32 %v6217_v51, %v4527_v55  ;;  %v5064_v55 = vand.u32 7, %v9306_v60 }
 0xbbb   : > { %v4383_v34 = vpop.f32.mrf.mxu1  ;;  %v4529_v2 = vadd.f32 %v6217_v51, %v4528_v40 }
 0xbbc   : > { %v6219_v38 = vpop.eup %6218  ;;  %v4413_v37 = vmax.f32 %v4383_v34, 1e-37 }
 0xbbd   : > { %v4541_v5 = vmul.f32 %v6219_v38, %v4412_v48  ;;  %v4533_v44 = vsel %vm4532_vm10, %v6217_v51, %v4529_v2  ;;  %vm4546_vm1 = vweird.f32 %v6219_v38  ;;  %vm5240_vm10 = vcmp.eq.s32.totalorder %v5064_v55, %v9301_v4 }
 0xbbe   : > { %6220 = vrcp.f32 %v4413_v37  ;;  %v4538_v6 = vsel %vm4535_vm11, %v4537_v24, %v4533_v44  ;;  %vm4547_vm12 = vmor %vm4545_vm0, %vm4546_vm1  ;;  %v4566_v3 = vand.u32 2147483648, %v4413_v37  ;;  %v4564_v26 = vand.u32 2147483647, %v4413_v37  ;;  %5844 = vmatpush.msk.msrb.mxu2 %vm5240_vm10, %v9302_v10 }
 0xbbf   : > { %v4542_v23 = vsub.f32 1.0, %v4541_v5  ;;  %v4667_v35 = vmul.f32 %v9299_v11, %v4538_v6  ;;  %vm4560_vm15 = vweird.f32 %v4413_v37  ;;  %v9307_v6 = vld [vmem:[#allocation25_spill] sm:$0xff] }
 0xbc0   : > { %v4567_v39 = vor.u32 1.1754944e-38, %v4566_v3  ;;  %vm4565_vm3 = vcmp.eq.f32.partialorder %v4564_v26, 8.507059e+37  ;;  %v9310_v3 = vld [vmem:[#allocation5_spill] sm:$0xff] }
 0xbc1   : > { %5002 = vmatmul.f32.gmra.mxu1 %v4667_v35  ;;  %v4543_v30 = vmul.f32 %v6219_v38, %v4542_v23 }
 0xbc3   : > { %v4386_v29 = vpop.f32.mrf.mxu1  ;;  %v4544_v22 = vadd.f32 %v6219_v38, %v4543_v30 }
 0xbc4   : > { %v6221_v27 = vpop.eup %6220  ;;  %v4414_v53 = vmax.f32 %v4386_v29, 1e-37 }
 0xbc5   : > { %v4556_v15 = vmul.f32 %v6221_v27, %v4413_v37  ;;  %v4548_v18 = vsel %vm4547_vm12, %v6219_v38, %v4544_v22  ;;  %vm4561_vm14 = vweird.f32 %v6221_v27 }
 0xbc6   : > { %6222 = vrcp.f32 %v4414_v53  ;;  %v4553_v13 = vsel %vm4550_vm13, %v4552_v19, %v4548_v18  ;;  %vm4562_vm2 = vmor %vm4560_vm15, %vm4561_vm14  ;;  %v4581_v7 = vand.u32 2147483648, %v4414_v53  ;;  %v4579_v54 = vand.u32 2147483647, %v4414_v53 }
 0xbc7   : > { %v4557_v59 = vsub.f32 1.0, %v4556_v15  ;;  %v4668_v16 = vmul.f32 %v9303_v61, %v4553_v13  ;;  %vm4575_vm6 = vweird.f32 %v4414_v53  ;;  %v9308_v15 = vld [vmem:[#allocation26_spill] sm:$0xff]  ;;  %v9309_v13 = vld [vmem:[#allocation29_spill] sm:$0xff]  ;;  %v4832_v61 = vpop.f32.mrf.mxu3 }
 0xbc8   : > { %v4582_v46 = vor.u32 1.1754944e-38, %v4581_v7  ;;  %vm4580_vm8 = vcmp.eq.f32.partialorder %v4579_v54, 8.507059e+37 }
 0xbc9   : > { %5005 = vmatmul.f32.gmra.mxu1 %v4668_v16  ;;  %v4558_v0 = vmul.f32 %v6221_v27, %v4557_v59  ;;  %v5057_v59 = vand.u32 7, %v9309_v13 }
 0xbcb   : > { %v4389_v20 = vpop.f32.mrf.mxu1  ;;  %v4559_v14 = vadd.f32 %v6221_v27, %v4558_v0  ;;  %v5050_v0 = vand.u32 7, %v9310_v3 }
 0xbcc   : > { %v6223_v45 = vpop.eup %6222  ;;  %v4415_v17 = vmax.f32 %v4389_v20, 1e-37 }
 0xbcd   : > { %v4571_v31 = vmul.f32 %v6223_v45, %v4414_v53  ;;  %v4563_v36 = vsel %vm4562_vm2, %v6221_v27, %v4559_v14  ;;  %vm4576_vm4 = vweird.f32 %v6223_v45  ;;  %vm5239_vm2 = vcmp.eq.s32.totalorder %v5057_v59, %v9301_v4 }
 0xbce   : > { %6224 = vrcp.f32 %v4415_v17  ;;  %v4568_v32 = vsel %vm4565_vm3, %v4567_v39, %v4563_v36  ;;  %vm4577_vm7 = vmor %vm4575_vm6, %vm4576_vm4  ;;  %v4596_v42 = vand.u32 2147483648, %v4415_v17  ;;  %v4594_v12 = vand.u32 2147483647, %v4415_v17  ;;  %5845 = vmatpush.msk.msrb.mxu2 %vm5239_vm2, %v9302_v10 }
 0xbcf   : > { %v4572_v57 = vsub.f32 1.0, %v4571_v31  ;;  %v4669_v25 = vmul.f32 %v9304_v41, %v4568_v32  ;;  %vm4590_vm11 = vweird.f32 %v4415_v17  ;;  %vm5238_vm3 = vcmp.eq.s32.totalorder %v5050_v0, %v9301_v4 }
 0xbd0   : > { %v4597_v38 = vor.u32 1.1754944e-38, %v4596_v42  ;;  %vm4595_vm5 = vcmp.eq.f32.partialorder %v4594_v12, 8.507059e+37  ;;  %5846 = vmatpush.msk.msrb.mxu2 %vm5238_vm3, %v9302_v10 }
 0xbd1   : > { %5008 = vmatmul.f32.gmra.mxu1 %v4669_v25  ;;  %v4573_v58 = vmul.f32 %v6223_v45, %v4572_v57  ;;  %v9311_v25 = vld [vmem:[#allocation30_spill] sm:$0xff] }
 0xbd3   : > { %v4392_v56 = vpop.f32.mrf.mxu1  ;;  %v4574_v33 = vadd.f32 %v6223_v45, %v4573_v58 }
 0xbd4   : > { %v6225_v9 = vpop.eup %6224  ;;  %v4416_v47 = vmax.f32 %v4392_v56, 1e-37  ;;  %v4835_v56 = vpop.f32.mrf.mxu3 }
 0xbd5   : > { %v4586_v8 = vmul.f32 %v6225_v9, %v4415_v17  ;;  %v4578_v51 = vsel %vm4577_vm7, %v6223_v45, %v4574_v33  ;;  %vm4591_vm9 = vweird.f32 %v6225_v9 }
 0xbd6   : > { %6226 = vrcp.f32 %v4416_v47  ;;  %v4583_v48 = vsel %vm4580_vm8, %v4582_v46, %v4578_v51  ;;  %vm4592_vm1 = vmor %vm4590_vm11, %vm4591_vm9  ;;  %v4611_v11 = vand.u32 2147483648, %v4416_v47  ;;  %v4609_v50 = vand.u32 2147483647, %v4416_v47 }
 0xbd7   : > { %v4587_v62 = vsub.f32 1.0, %v4586_v8  ;;  %v4670_v1 = vmul.f32 %v9305_v43, %v4583_v48  ;;  %vm4605_vm12 = vweird.f32 %v4416_v47  ;;  %v9312_v48 = vld [vmem:[#allocation31_spill] sm:$0xff] }
 0xbd8   : > { %v4612_v29 = vor.u32 1.1754944e-38, %v4611_v11  ;;  %vm4610_vm14 = vcmp.eq.f32.partialorder %v4609_v50, 8.507059e+37 }
 0xbd9   : > { %5011 = vmatmul.f32.gmra.mxu1 %v4670_v1  ;;  %v4588_v63 = vmul.f32 %v6225_v9, %v4587_v62 }
 0xbdb   : > { %v4395_v40 = vpop.f32.mrf.mxu1  ;;  %v4589_v28 = vadd.f32 %v6225_v9, %v4588_v63 }
 0xbdc   : > { %v6227_v34 = vpop.eup %6226  ;;  %v4417_v2 = vmax.f32 %v4395_v40, 1e-37  ;;  %v4838_v42 = vpop.f32.mrf.mxu3 }
 0xbdd   : > { %v4601_v37 = vmul.f32 %v6227_v34, %v4416_v47  ;;  %v4593_v24 = vsel %vm4592_vm1, %v6225_v9, %v4589_v28  ;;  %vm4606_vm0 = vweird.f32 %v6227_v34  ;;  %v9313_v28 = vld [vmem:[#allocation32_spill] sm:$0xff] }
 0xbde   : > { %6228 = vrcp.f32 %v4417_v2  ;;  %v4598_v5 = vsel %vm4595_vm5, %v4597_v38, %v4593_v24  ;;  %vm4607_vm13 = vmor %vm4605_vm12, %vm4606_vm0  ;;  %v4626_v16 = vand.u32 2147483648, %v4417_v2  ;;  %v4624_v20 = vand.u32 2147483647, %v4417_v2 }
 0xbdf   : > { %v4602_v44 = vsub.f32 1.0, %v4601_v37  ;;  %v4671_v23 = vmul.f32 %v9307_v6, %v4598_v5  ;;  %vm4620_vm4 = vweird.f32 %v4417_v2 }
 0xbe0   : > { %v4627_v31 = vor.u32 1.1754944e-38, %v4626_v16  ;;  %vm4625_vm7 = vcmp.eq.f32.partialorder %v4624_v20, 8.507059e+37 }
 0xbe1   : > { %5014 = vmatmul.f32.gmra.mxu1 %v4671_v23  ;;  %v4603_v35 = vmul.f32 %v6227_v34, %v4602_v44 }
 0xbe3   : > { %v4398_v52 = vpop.f32.mrf.mxu1  ;;  %v4604_v49 = vadd.f32 %v6227_v34, %v4603_v35 }
 0xbe4   : > { %v6229_v30 = vpop.eup %6228  ;;  %v4418_v21 = vmax.f32 %v4398_v52, 1e-37 }
 0xbe5   : > { %v4616_v22 = vmul.f32 %v6229_v30, %v4417_v2  ;;  %v4608_v27 = vsel %vm4607_vm13, %v6227_v34, %v4604_v49  ;;  %vm4621_vm15 = vweird.f32 %v6229_v30  ;;  %v4841_v2 = vpop.f32.mrf.mxu3 }
 0xbe6   : > { %6230 = vrcp.f32 %v4418_v21  ;;  %v4613_v53 = vsel %vm4610_vm14, %v4612_v29, %v4608_v27  ;;  %vm4622_vm6 = vmor %vm4620_vm4, %vm4621_vm15  ;;  %v4641_v58 = vand.u32 2147483648, %v4418_v21  ;;  %v4639_v54 = vand.u32 2147483647, %v4418_v21 }
 0xbe7   : > { %v4617_v19 = vsub.f32 1.0, %v4616_v22  ;;  %v4672_v18 = vmul.f32 %v9308_v15, %v4613_v53  ;;  %vm4635_vm9 = vweird.f32 %v4418_v21 }
 0xbe8   : > { %v4642_v47 = vor.u32 1.1754944e-38, %v4641_v58  ;;  %vm4640_vm11 = vcmp.eq.f32.partialorder %v4639_v54, 8.507059e+37 }
 0xbe9   : > { %5017 = vmatmul.f32.gmra.mxu1 %v4672_v18  ;;  %v4618_v26 = vmul.f32 %v6229_v30, %v4617_v19 }
 0xbeb   : > { %v4401_v14 = vpop.f32.mrf.mxu1  ;;  %v4619_v45 = vadd.f32 %v6229_v30, %v4618_v26 }
 0xbec   : > { %v6231_v17 = vpop.eup %6230  ;;  %v4419_v39 = vmax.f32 %v4401_v14, 1e-37 }
 0xbed   : > { %v4631_v36 = vmul.f32 %v6231_v17, %v4418_v21  ;;  %v4623_v32 = vsel %vm4622_vm6, %v6229_v30, %v4619_v45  ;;  %vm4636_vm8 = vweird.f32 %v6231_v17  ;;  %v4844_v44 = vpop.f32.mrf.mxu3 }
 0xbee   : > { %6232 = vrcp.f32 %v4419_v39  ;;  %v4628_v57 = vsel %vm4625_vm7, %v4627_v31, %v4623_v32  ;;  %vm4637_vm10 = vmor %vm4635_vm9, %vm4636_vm8  ;;  %v4656_v43 = vand.u32 2147483648, %v4419_v39  ;;  %v4654_v60 = vand.u32 2147483647, %v4419_v39 }
 0xbef   : > { %v4632_v41 = vsub.f32 1.0, %v4631_v36  ;;  %v4673_v7 = vmul.f32 %v9311_v25, %v4628_v57  ;;  %vm4650_vm5 = vweird.f32 %v4419_v39 }
 0xbf0   : > { %v4657_v63 = vor.u32 1.1754944e-38, %v4656_v43  ;;  %vm4655_vm12 = vcmp.eq.f32.partialorder %v4654_v60, 8.507059e+37 }
 0xbf1   : > { %5020 = vmatmul.f32.gmra.mxu1 %v4673_v7  ;;  %v4633_v4 = vmul.f32 %v6231_v17, %v4632_v41 }
 0xbf3   : > { %v4634_v33 = vadd.f32 %v6231_v17, %v4633_v4 }
 0xbf4   : > { %v6233_v9 = vpop.eup %6232 }
 0xbf5   : > { %v4646_v10 = vmul.f32 %v6233_v9, %v4419_v39  ;;  %v4638_v46 = vsel %vm4637_vm10, %v6231_v17, %v4634_v33  ;;  %vm4651_vm1 = vweird.f32 %v6233_v9  ;;  %v4847_v11 = vpop.f32.mrf.mxu3  ;;  %v5939_v33 = vld [vmem:[%s9066_s18] ss:$0 sm:$0xff] }
 0xbf6   : > { %v4643_v8 = vsel %vm4640_vm11, %v4642_v47, %v4638_v46  ;;  %vm4652_vm0 = vmor %vm4650_vm5, %vm4651_vm1 }
 0xbf7   : > { %v4647_v51 = vsub.f32 1.0, %v4646_v10  ;;  %v4674_v62 = vmul.f32 %v9312_v48, %v4643_v8 }
 0xbf9   : > { %5023 = vmatmul.f32.gmra.mxu1 %v4674_v62  ;;  %v4648_v1 = vmul.f32 %v6233_v9, %v4647_v51 }
 0xbfb   : > { %v4649_v55 = vadd.f32 %v6233_v9, %v4648_v1 }
 0xbfd   : > { %v4653_v12 = vsel %vm4652_vm0, %v6233_v9, %v4649_v55  ;;  %v4850_v52 = vpop.f32.mrf.mxu3 }
 0xbfe   : > { %v4658_v40 = vsel %vm4655_vm12, %v4657_v63, %v4653_v12 }
 0xbff   : > { %v4675_v34 = vmul.f32 %v9313_v28, %v4658_v40 }
 0xc01   : > { %5026 = vmatmul.f32.gmra.mxu1 %v4675_v34 }
 0xc05   : > { %v4853_v21 = vpop.f32.mrf.mxu3 }
 0xc06   : > { %v4982_v38 = vpop.f32.mrf.mxu1 }
 0xc07   : > { %v5302_v37 = vmul.f32 %v4982_v38, %v4832_v61 }
 0xc09   : > { %5338 = vmatmul.f32.vlgmr.msrb.gmra.mxu2 %v5302_v37 }
 0xc0d   : > { %v4856_v19 = vpop.f32.mrf.mxu3 }
 0xc0e   : > { %v4985_v24 = vpop.f32.mrf.mxu1 }
 0xc0f   : > { %v5303_v5 = vmul.f32 %v4985_v24, %v4835_v56 }
 0xc11   : > { %5341 = vmatmul.f32.gmra.mxu2 %v5303_v5 }
 0xc15   : > { %v4859_v13 = vpop.f32.mrf.mxu3 }
 0xc16   : > { %v4988_v6 = vpop.f32.mrf.mxu1 }
 0xc17   : > { %v5304_v23 = vmul.f32 %v4988_v6, %v4838_v42 }
 0xc19   : > { %5344 = vmatmul.f32.gmra.mxu2 %v5304_v23 }
 0xc1d   : > { %v4862_v16 = vpop.f32.mrf.mxu3 }
 0xc1e   : > { %v4991_v35 = vpop.f32.mrf.mxu1 }
 0xc1f   : > { %v5305_v50 = vmul.f32 %v4991_v35, %v4841_v2 }
 0xc21   : > { %5347 = vmatmul.f32.gmra.mxu2 %v5305_v50 }
 0xc25   : > { %v4865_v26 = vpop.f32.mrf.mxu3 }
 0xc26   : > { %v4994_v49 = vpop.f32.mrf.mxu1 }
 0xc27   : > { %v5306_v30 = vmul.f32 %v4994_v49, %v4844_v44 }
 0xc29   : > { %5350 = vmatmul.f32.gmra.mxu2 %v5306_v30 }
 0xc2d   : > { %v4868_v39 = vpop.f32.mrf.mxu3 }
 0xc2e   : > { %v4997_v29 = vpop.f32.mrf.mxu1 }
 0xc2f   : > { %v5307_v22 = vmul.f32 %v4997_v29, %v4847_v11 }
 0xc31   : > { %5353 = vmatmul.f32.gmra.mxu2 %v5307_v22 }
 0xc35   : > { %v4871_v32 = vpop.f32.mrf.mxu3 }
 0xc36   : > { %v5000_v27 = vpop.f32.mrf.mxu1 }
 0xc37   : > { %v5308_v53 = vmul.f32 %v5000_v27, %v4850_v52 }
 0xc39   : > { %5356 = vmatmul.f32.gmra.mxu2 %v5308_v53 }
 0xc3d   : > { %v4874_v25 = vpop.f32.mrf.mxu3 }
 0xc3e   : > { %v5003_v15 = vpop.f32.mrf.mxu1 }
 0xc3f   : > { %v5309_v18 = vmul.f32 %v5003_v15, %v4853_v21 }
 0xc41   : > { %5359 = vmatmul.f32.gmra.mxu2 %v5309_v18 }
 0xc45   : > { %v4877_v4 = vpop.f32.mrf.mxu3 }
 0xc46   : > { %v5006_v59 = vpop.f32.mrf.mxu1 }
 0xc47   : > { %v5310_v61 = vmul.f32 %v5006_v59, %v4856_v19 }
 0xc49   : > { %5362 = vmatmul.f32.gmra.mxu2 %v5310_v61 }
 0xc4e   : > { %v5009_v3 = vpop.f32.mrf.mxu1 }
 0xc4f   : > { %v5311_v0 = vmul.f32 %v5009_v3, %v4859_v13 }
 0xc51   : > { %5365 = vmatmul.f32.gmra.mxu2 %v5311_v0 }
 0xc56   : > { %v5012_v20 = vpop.f32.mrf.mxu1 }
 0xc57   : > { %v5312_v14 = vmul.f32 %v5012_v20, %v4862_v16 }
 0xc59   : > { %5368 = vmatmul.f32.gmra.mxu2 %v5312_v14 }
 0xc5e   : > { %v5015_v45 = vpop.f32.mrf.mxu1 }
 0xc5f   : > { %v5313_v17 = vmul.f32 %v5015_v45, %v4865_v26 }
 0xc61   : > { %5371 = vmatmul.f32.gmra.mxu2 %v5313_v17 }
 0xc66   : > { %v5018_v31 = vpop.f32.mrf.mxu1 }
 0xc67   : > { %v5314_v36 = vmul.f32 %v5018_v31, %v4868_v39 }
 0xc69   : > { %5374 = vmatmul.f32.gmra.mxu2 %v5314_v36 }
 0xc6e   : > { %v5021_v57 = vpop.f32.mrf.mxu1 }
 0xc6f   : > { %v5315_v41 = vmul.f32 %v5021_v57, %v4871_v32 }
 0xc71   : > { %5377 = vmatmul.f32.gmra.mxu2 %v5315_v41 }
 0xc76   : > { %v5024_v7 = vpop.f32.mrf.mxu1 }
 0xc77   : > { %v5316_v58 = vmul.f32 %v5024_v7, %v4874_v25 }
 0xc79   : > { %5380 = vmatmul.f32.gmra.mxu2 %v5316_v58 }
 0xc7e   : > { %v5027_v54 = vpop.f32.mrf.mxu1 }
 0xc7f   : > { %v5317_v56 = vmul.f32 %v5027_v54, %v4877_v4 }
 0xc81   : > { %5383 = vmatmul.f32.gmra.mxu2 %v5317_v56 }
 0xc8c   : > { %v5339_v9 = vpop.f32.mrf.mxu2 }
 0xc8d   : > { %v5340_v47 = vadd.f32 %v5939_v33, %v5339_v9 }
 0xc8f   : > { %5387 = vst [vmem:[%s9027_s25] sm:$0xff] %v5340_v47 }
 0xc94   : > { %v5342_v10 = vpop.f32.mrf.mxu2 }
 0xc95   : > { %v5343_v46 = vadd.f32 %v5939_v33, %v5342_v10 }
 0xc97   : > { %5388 = vst [vmem:[%s9027_s25 + $0x8] sm:$0xff] %v5343_v46 }
 0xc9c   : > { %v5345_v8 = vpop.f32.mrf.mxu2 }
 0xc9d   : > { %v5346_v51 = vadd.f32 %v5939_v33, %v5345_v8 }
 0xc9f   : > { %5389 = vst [vmem:[%s9027_s25 + $0x10] sm:$0xff] %v5346_v51 }
 0xca4   : > { %v5348_v48 = vpop.f32.mrf.mxu2 }
 0xca5   : > { %v5349_v62 = vadd.f32 %v5939_v33, %v5348_v48 }
 0xca7   : > { %5390 = vst [vmem:[%s9027_s25 + $0x18] sm:$0xff] %v5349_v62 }
 0xcac   : > { %v5351_v43 = vpop.f32.mrf.mxu2 }
 0xcad   : > { %v5352_v1 = vadd.f32 %v5939_v33, %v5351_v43 }
 0xcaf   : > { %5391 = vst [vmem:[%s9027_s25 + $0x20] sm:$0xff] %v5352_v1 }
 0xcb4   : > { %v5354_v60 = vpop.f32.mrf.mxu2 }
 0xcb5   : > { %v5355_v55 = vadd.f32 %v5939_v33, %v5354_v60 }
 0xcb7   : > { %5392 = vst [vmem:[%s9027_s25 + $0x28] sm:$0xff] %v5355_v55 }
 0xcbc   : > { %v5357_v42 = vpop.f32.mrf.mxu2 }
 0xcbd   : > { %v5358_v63 = vadd.f32 %v5939_v33, %v5357_v42 }
 0xcbf   : > { %5393 = vst [vmem:[%s9027_s25 + $0x30] sm:$0xff] %v5358_v63 }
 0xcc4   : > { %v5360_v12 = vpop.f32.mrf.mxu2 }
 0xcc5   : > { %v5361_v40 = vadd.f32 %v5939_v33, %v5360_v12 }
 0xcc7   : > { %5394 = vst [vmem:[%s9027_s25 + $0x38] sm:$0xff] %v5361_v40 }
 0xccc   : > { %v5363_v28 = vpop.f32.mrf.mxu2 }
 0xccd   : > { %v5364_v34 = vadd.f32 %v5939_v33, %v5363_v28 }
 0xccf   : > { %5395 = vst [vmem:[%s9027_s25 + $0x40] sm:$0xff] %v5364_v34 }
 0xcd4   : > { %v5366_v2 = vpop.f32.mrf.mxu2 }
 0xcd5   : > { %v5367_v38 = vadd.f32 %v5939_v33, %v5366_v2 }
 0xcd7   : > { %5396 = vst [vmem:[%s9027_s25 + $0x48] sm:$0xff] %v5367_v38 }
 0xcdc   : > { %v5369_v37 = vpop.f32.mrf.mxu2 }
 0xcdd   : > { %v5370_v24 = vadd.f32 %v5939_v33, %v5369_v37 }
 0xcdf   : > { %5397 = vst [vmem:[%s9027_s25 + $0x50] sm:$0xff] %v5370_v24 }
 0xce4   : > { %v5372_v5 = vpop.f32.mrf.mxu2 }
 0xce5   : > { %v5373_v44 = vadd.f32 %v5939_v33, %v5372_v5 }
 0xce7   : > { %5398 = vst [vmem:[%s9027_s25 + $0x58] sm:$0xff] %v5373_v44 }
 0xcec   : > { %v5375_v6 = vpop.f32.mrf.mxu2 }
 0xced   : > { %v5376_v23 = vadd.f32 %v5939_v33, %v5375_v6 }
 0xcef   : > { %5399 = vst [vmem:[%s9027_s25 + $0x60] sm:$0xff] %v5376_v23 }
 0xcf4   : > { %v5378_v11 = vpop.f32.mrf.mxu2 }
 0xcf5   : > { %v5379_v35 = vadd.f32 %v5939_v33, %v5378_v11 }
 0xcf7   : > { %5400 = vst [vmem:[%s9027_s25 + $0x68] sm:$0xff] %v5379_v35 }
 0xcfc   : > { %v5381_v50 = vpop.f32.mrf.mxu2 }
 0xcfd   : > { %v5382_v52 = vadd.f32 %v5939_v33, %v5381_v50 }
 0xcff   : > { %5401 = vst [vmem:[%s9027_s25 + $0x70] sm:$0xff] %v5382_v52 }
 0xd04   : > { %v5384_v49 = vpop.f32.mrf.mxu2 }
 0xd05   : > { %v5385_v30 = vadd.f32 %v5939_v33, %v5384_v49 }
 0xd07   : > { %5402 = vst [vmem:[%s9027_s25 + $0x78] sm:$0xff] %v5385_v30 }
 0xd08 PF: > { %s31_s2 = sadd.s32 1, %s6240_s2  }
 0xd09   : > { %p28_p4 = scmp.ge.s32.totalorder %s31_s2, 4  }
 0xd0b   :  { %30 = sbr.rel (!%p28_p4) target bundleno = 7 (0x7), region = 140 }

</bundles_post_ra>
